<compile_context>
chip_gen: v7x
topology: tpu7x:2x2x1
jax: 0.10.0
libtpu: 0.0.40
codegen_flags: <defaults>
</compile_context>

<pallas_src>
import jax
import jax.numpy as jnp
from jax.experimental import pallas as pl
from jax.experimental.pallas import tpu as pltpu


def _round_up(v, m):
    return (v + m - 1) // m * m


def _elu(z):
    # Clamp the exp argument so the untaken branch never produces inf (no inf*0 risk).
    return jnp.where(z > 0, z, jnp.exp(jnp.minimum(z, 0.0)) - 1.0)


# ---------------------------------------------------------------------------
# Fused single-call path (small graphs: whole padded graph fits in VMEM).
# ---------------------------------------------------------------------------
def _fused_kernel(x_ref, e_ref, w_ref, b_ref, o_ref):
    n_pad = x_ref.shape[0]
    o_pad = b_ref.shape[1]

    # One 2*O_pad-wide RHS: a single MXU push produces both the self term and xw.
    z = jnp.dot(x_ref[...], w_ref[...], preferred_element_type=jnp.float32)
    a = z[:, :o_pad] + b_ref[...]                    # x @ (Ws - Wn) + b   (f32)
    xw = z[:, o_pad:].astype(jnp.bfloat16)           # x @ Wn              (bf16)

    edges = e_ref[...]                               # [n_pad, D] int32, -1 padded
    valid = edges >= 0                               # [n_pad, D], computed once
    col = jax.lax.broadcasted_iota(jnp.int32, (n_pad, n_pad), 1)

    m = jnp.full((n_pad, o_pad), -jnp.inf, jnp.float32)
    for d in range(edges.shape[1]):                  # D is small & static -> unrolled
        onehot = (edges[:, d:d + 1] == col).astype(jnp.bfloat16)
        g = jnp.dot(onehot, xw, preferred_element_type=jnp.float32)
        m = jnp.maximum(m, jnp.where(valid[:, d:d + 1], g, -jnp.inf))

    # Nodes with zero valid neighbors stay -inf (torch max over all -inf rows).
    o_ref[...] = jnp.where(m == -jnp.inf, -jnp.inf, _elu(a + m))


def _edge_conv_fused(x, edge_index, weight, bias):
    n, f = x.shape
    o = weight.shape[0]
    o_pad = _round_up(o, 128)
    n_pad = _round_up(n, 128)

    w_self = weight[:, :f].T                         # [F, O]
    w_neigh = weight[:, f:].T                        # [F, O]
    # Fused RHS [F, 2*O_pad]: cols [0, o_pad) -> (Ws - Wn), [o_pad, 2*o_pad) -> Wn.
    w_cat = jnp.concatenate(
        [jnp.pad(w_self - w_neigh, ((0, 0), (0, o_pad - o))),
         jnp.pad(w_neigh, ((0, 0), (0, o_pad - o)))], axis=1).astype(jnp.bfloat16)
    b = jnp.pad(bias.reshape(1, o), ((0, 0), (0, o_pad - o))).astype(jnp.float32)

    x_p = jnp.pad(x, ((0, n_pad - n), (0, 0))).astype(jnp.bfloat16)
    e_p = jnp.pad(edge_index.astype(jnp.int32), ((0, n_pad - n), (0, 0)),
                  constant_values=-1)

    out_pad = pl.pallas_call(
        _fused_kernel,
        out_shape=jax.ShapeDtypeStruct((n_pad, o_pad), jnp.float32),
        compiler_params=pltpu.CompilerParams(vmem_limit_bytes=32 * 1024 * 1024),
    )(x_p, e_p, w_cat, b)
    return out_pad[:n, :o]


# ---------------------------------------------------------------------------
# Tiled two-kernel path (larger graphs).
# ---------------------------------------------------------------------------
def _transform_kernel(x_ref, wn_ref, xw_ref):
    # xw = x @ Wn only; `a` is recomputed in the gather kernel's finalize step, so the
    # [N, O_pad] f32 self-term never roundtrips through HBM.
    xw_ref[...] = jnp.dot(x_ref[...], wn_ref[...],
                          preferred_element_type=jnp.float32).astype(xw_ref.dtype)


def _gather_max_kernel(e_ref, x_ref, wd_ref, b_ref, xw_ref, o_ref, m_ref):
    k = pl.program_id(1)
    tk = xw_ref.shape[0]

    @pl.when(k == 0)
    def _init():
        m_ref[...] = jnp.full(m_ref.shape, -jnp.inf, m_ref.dtype)

    # Fold the tile base into the edge side once; -1 padding slots become negative and
    # are rejected by the same compare that rejects out-of-tile ids.
    e_rel = e_ref[...] - k * tk                      # [TM, D] int32
    valid = (e_rel >= 0) & (e_rel < tk)              # [TM, D], computed once per step
    xw = xw_ref[...]                                 # [TK, O_pad] bf16
    tm, d_max = e_rel.shape
    col = jax.lax.broadcasted_iota(jnp.int32, (tm, tk), 1)

    for d in range(d_max):                           # D small & static -> unrolled
        onehot = (e_rel[:, d:d + 1] == col).astype(jnp.bfloat16)
        g = jnp.dot(onehot, xw, preferred_element_type=jnp.float32)
        # Read-modify-write through VMEM keeps the unrolled loop's live vreg set small.
        m_ref[...] = jnp.maximum(m_ref[...],
                                 jnp.where(valid[:, d:d + 1], g, -jnp.inf))

    @pl.when(k == pl.num_programs(1) - 1)
    def _finalize():
        # a = x_i @ (Ws - Wn) + b, recomputed once per row tile (not per k step, not
        # per neighbor slot) and added only here: max_d,k(a + g) == a + max_d,k(g).
        a = jnp.dot(x_ref[...], wd_ref[...],
                    preferred_element_type=jnp.float32) + b_ref[...]
        m = m_ref[...]
        o_ref[...] = jnp.where(m == -jnp.inf, -jnp.inf, _elu(a + m))


def _edge_conv_tiled(x, edge_index, weight, bias, *, tm=128, tk=256, tm_transform=512):
    n, f = x.shape
    d = edge_index.shape[1]
    o = weight.shape[0]
    o_pad = _round_up(o, 128)
    pad_mult = max(tm, tk, tm_transform)             # power-of-two tile sizes
    n_pad = _round_up(n, pad_mult)

    w_self = weight[:, :f].T
    w_neigh = weight[:, f:].T
    wd = jnp.pad(w_self - w_neigh, ((0, 0), (0, o_pad - o))).astype(jnp.bfloat16)
    wn = jnp.pad(w_neigh, ((0, 0), (0, o_pad - o))).astype(jnp.bfloat16)
    b = jnp.pad(bias.reshape(1, o), ((0, 0), (0, o_pad - o))).astype(jnp.float32)

    x_p = jnp.pad(x, ((0, n_pad - n), (0, 0))).astype(jnp.bfloat16)
    e_p = jnp.pad(edge_index.astype(jnp.int32), ((0, n_pad - n), (0, 0)),
                  constant_values=-1)

    # Kernel 1: xw = x @ Wn with large row tiles (kernel is mem/launch-overhead-bound).
    xw = pl.pallas_call(
        _transform_kernel,
        out_shape=jax.ShapeDtypeStruct((n_pad, o_pad), jnp.bfloat16),
        grid=(n_pad // tm_transform,),
        in_specs=[
            pl.BlockSpec((tm_transform, f), lambda i: (i, 0)),
            pl.BlockSpec((f, o_pad), lambda i: (0, 0)),
        ],
        out_specs=pl.BlockSpec((tm_transform, o_pad), lambda i: (i, 0)),
        compiler_params=pltpu.CompilerParams(
            dimension_semantics=("parallel",),
            vmem_limit_bytes=32 * 1024 * 1024),
    )(x_p, wn)

    # Kernel 2: one-hot MXU gather + running max over source-node tiles.
    out_pad = pl.pallas_call(
        _gather_max_kernel,
        out_shape=jax.ShapeDtypeStruct((n_pad, o_pad), jnp.float32),
        grid=(n_pad // tm, n_pad // tk),
        in_specs=[
            pl.BlockSpec((tm, d), lambda i, k: (i, 0)),      # edge ids (resident over k)
            pl.BlockSpec((tm, f), lambda i, k: (i, 0)),      # x row tile (resident over k)
            pl.BlockSpec((f, o_pad), lambda i, k: (0, 0)),   # Ws - Wn
            pl.BlockSpec((1, o_pad), lambda i, k: (0, 0)),   # bias
            pl.BlockSpec((tk, o_pad), lambda i, k: (k, 0)),  # xw source-node tile
        ],
        out_specs=pl.BlockSpec((tm, o_pad), lambda i, k: (i, 0)),
        scratch_shapes=[pltpu.VMEM((tm, o_pad), jnp.float32)],
        compiler_params=pltpu.CompilerParams(
            dimension_semantics=("parallel", "arbitrary"),
            vmem_limit_bytes=32 * 1024 * 1024),
    )(e_p, x_p, wd, b, xw)

    return out_pad[:n, :o]


def edge_conv(x, edge_index, weight, bias, *, mode="auto", **tile_kwargs):
    """EdgeConv forward.

    x:          [N, F]  float32 node features
    edge_index: [N, D]  int32 neighbor ids, padded with -1
    weight:     [O, 2F] float32 (torch nn.Linear layout)
    bias:       [O]     float32
    mode:       "auto" | "fused" | "tiled"
    returns     [N, O]  float32
    """
    n = x.shape[0]
    if mode == "fused" or (mode == "auto" and _round_up(n, 128) <= 512):
        return _edge_conv_fused(x, edge_index, weight, bias)
    return _edge_conv_tiled(x, edge_index, weight, bias, **tile_kwargs)


def edge_conv_reference(x, edge_index, weight, bias):
    """Pure-JAX f32 reference mirroring the torch forward exactly."""
    n, f = x.shape
    d = edge_index.shape[1]
    padded = jnp.concatenate([x, jnp.zeros((1, f), x.dtype)], axis=0)
    neigh = padded[edge_index]                               # -1 wraps to the zero row
    x_rep = jnp.broadcast_to(x[:, None, :], (n, d, f))
    feat = jnp.concatenate([x_rep, neigh - x_rep], axis=-1)  # [N, D, 2F]
    z = jnp.einsum('ndk,ok->ndo', feat, weight) + bias       # Linear(2F -> O)
    z = jnp.where(z > 0, z, jnp.exp(z) - 1.0)                # ELU
    z = jnp.where((edge_index != -1)[:, :, None], z, -jnp.inf)
    return jnp.max(z, axis=1)


if __name__ == "__main__":
    key = jax.random.PRNGKey(0)
    F_IN, O_OUT, D = 32, 48, 8   # in_channels, out_channels, max neighbors

    def make_inputs(n, key):
        k_x, k_e, k_m, k_w, k_b = jax.random.split(key, 5)
        x = jax.random.normal(k_x, (n, F_IN), dtype=jnp.float32)
        # Neighbor ids in [0, n); ~30% slots padded with -1, but column 0 kept valid so
        # every node has at least one neighbor (same -inf hazard exists in torch).
        edge_index = jax.random.randint(k_e, (n, D), 0, n, dtype=jnp.int32)
        pad_mask = jax.random.bernoulli(k_m, p=0.3, shape=(n, D))
        pad_mask = pad_mask.at[:, 0].set(False)
        edge_index = jnp.where(pad_mask, jnp.int32(-1), edge_index)
        # nn.Linear(2F, O, bias=True) parameters in torch layout.
        weight = jax.random.normal(k_w, (O_OUT, 2 * F_IN), dtype=jnp.float32) * 0.1
        bias = jax.random.normal(k_b, (O_OUT,), dtype=jnp.float32) * 0.1
        return x, edge_index, weight, bias

    k1, k2 = jax.random.split(key)

    # Small graph -> fused single-kernel path.
    x, e, w, b = make_inputs(96, k1)
    out = jax.block_until_ready(edge_conv(x, e, w, b))
    ref = edge_conv_reference(x, e, w, b)
    assert out.shape == (96, O_OUT)
    # bf16 MXU inputs (f32 accumulation) vs pure-f32 reference -> loose tolerance.
    assert jnp.allclose(out, ref, atol=3e-2, rtol=3e-2), "fused path mismatch"

    # Larger graph -> two-kernel tiled path (multiple row tiles and k steps).
    x, e, w, b = make_inputs(300, k2)
    out = jax.block_until_ready(edge_conv(x, e, w, b, mode="tiled"))
    ref = edge_conv_reference(x, e, w, b)
    assert out.shape == (300, O_OUT)
    assert jnp.allclose(out, ref, atol=3e-2, rtol=3e-2), "tiled path mismatch"

    print("KERNEL_OK")
</pallas_src>

<mosaic_0001>
module attributes {stable_mosaic.version = 11 : i64} {
  func.func @_fused_kernel(%arg0: memref<128x32xbf16, #tpu.memory_space<vmem>>, %arg1: memref<128x8xi32, #tpu.memory_space<vmem>>, %arg2: memref<32x256xbf16, #tpu.memory_space<vmem>>, %arg3: memref<1x128xf32, #tpu.memory_space<vmem>>, %arg4: memref<128x128xf32, #tpu.memory_space<vmem>>) attributes {dimension_semantics = [], scalar_prefetch = 0 : i64, scratch_operands = 0 : i64, tpu.core_type = #tpu.core_type<tc>} {
    %c0 = arith.constant 0 : index
    %c0_0 = arith.constant 0 : index
    %0 = vector.load %arg0[%c0, %c0_0] : memref<128x32xbf16, #tpu.memory_space<vmem>>, vector<128x32xbf16>
    %c0_1 = arith.constant 0 : index
    %c0_2 = arith.constant 0 : index
    %1 = vector.load %arg2[%c0_1, %c0_2] : memref<32x256xbf16, #tpu.memory_space<vmem>>, vector<32x256xbf16>
    %cst = arith.constant dense<0.000000e+00> : vector<128x256xf32>
    %2 = tpu.matmul %0, %1, %cst {dimension_numbers = #tpu.dot_dimension_numbers<[1], [0], [0], [1], [0, 0, 1, 1], [], []>} : vector<128x32xbf16>, vector<32x256xbf16>, vector<128x256xf32> -> vector<128x256xf32>
    %3 = vector.extract_strided_slice %2 {offsets = [0, 0], sizes = [128, 128], strides = [1, 1]} : vector<128x256xf32> to vector<128x128xf32>
    %c0_3 = arith.constant 0 : index
    %c0_4 = arith.constant 0 : index
    %4 = vector.load %arg3[%c0_3, %c0_4] : memref<1x128xf32, #tpu.memory_space<vmem>>, vector<1x128xf32>
    %5 = vector.broadcast %4 : vector<1x128xf32> to vector<128x128xf32>
    %6 = arith.addf %3, %5 : vector<128x128xf32>
    %7 = vector.extract_strided_slice %2 {offsets = [0, 128], sizes = [128, 128], strides = [1, 1]} : vector<128x256xf32> to vector<128x128xf32>
    %8 = arith.truncf %7 : vector<128x128xf32> to vector<128x128xbf16>
    %c0_5 = arith.constant 0 : index
    %c0_6 = arith.constant 0 : index
    %9 = vector.load %arg1[%c0_5, %c0_6] : memref<128x8xi32, #tpu.memory_space<vmem>>, vector<128x8xi32>
    %c0_i32 = arith.constant 0 : i32
    %10 = vector.broadcast %c0_i32 : i32 to vector<128x8xi32>
    %11 = arith.cmpi sge, %9, %10 : vector<128x8xi32>
    %12 = tpu.iota {dimensions = array<i32: 1>} : vector<128x128xi32>
    %cst_7 = arith.constant 0xFF800000 : f32
    %13 = vector.broadcast %cst_7 : f32 to vector<128x128xf32>
    %14 = vector.extract_strided_slice %9 {offsets = [0, 0], sizes = [128, 1], strides = [1, 1]} : vector<128x8xi32> to vector<128x1xi32>
    %15 = vector.broadcast %14 : vector<128x1xi32> to vector<128x128xi32>
    %16 = arith.cmpi eq, %15, %12 : vector<128x128xi32>
    %17 = arith.extui %16 : vector<128x128xi1> to vector<128x128xi32>
    %18 = arith.sitofp %17 : vector<128x128xi32> to vector<128x128xf32>
    %19 = arith.truncf %18 : vector<128x128xf32> to vector<128x128xbf16>
    %cst_8 = arith.constant dense<0.000000e+00> : vector<128x128xf32>
    %20 = tpu.matmul %19, %8, %cst_8 {dimension_numbers = #tpu.dot_dimension_numbers<[1], [0], [0], [1], [0, 0, 1, 1], [], []>} : vector<128x128xbf16>, vector<128x128xbf16>, vector<128x128xf32> -> vector<128x128xf32>
    %21 = vector.extract_strided_slice %11 {offsets = [0, 0], sizes = [128, 1], strides = [1, 1]} : vector<128x8xi1> to vector<128x1xi1>
    %cst_9 = arith.constant 0xFF800000 : f32
    %22 = vector.shape_cast %21 : vector<128x1xi1> to vector<128x1xi1>
    %23 = vector.broadcast %22 : vector<128x1xi1> to vector<128x128xi1>
    %24 = vector.broadcast %cst_9 : f32 to vector<128x128xf32>
    %25 = arith.select %23, %20, %24 : vector<128x128xi1>, vector<128x128xf32>
    %26 = arith.maximumf %13, %25 : vector<128x128xf32>
    %27 = vector.extract_strided_slice %9 {offsets = [0, 1], sizes = [128, 1], strides = [1, 1]} : vector<128x8xi32> to vector<128x1xi32>
    %28 = vector.broadcast %27 : vector<128x1xi32> to vector<128x128xi32>
    %29 = arith.cmpi eq, %28, %12 : vector<128x128xi32>
    %30 = arith.extui %29 : vector<128x128xi1> to vector<128x128xi32>
    %31 = arith.sitofp %30 : vector<128x128xi32> to vector<128x128xf32>
    %32 = arith.truncf %31 : vector<128x128xf32> to vector<128x128xbf16>
    %cst_10 = arith.constant dense<0.000000e+00> : vector<128x128xf32>
    %33 = tpu.matmul %32, %8, %cst_10 {dimension_numbers = #tpu.dot_dimension_numbers<[1], [0], [0], [1], [0, 0, 1, 1], [], []>} : vector<128x128xbf16>, vector<128x128xbf16>, vector<128x128xf32> -> vector<128x128xf32>
    %34 = vector.extract_strided_slice %11 {offsets = [0, 1], sizes = [128, 1], strides = [1, 1]} : vector<128x8xi1> to vector<128x1xi1>
    %cst_11 = arith.constant 0xFF800000 : f32
    %35 = vector.shape_cast %34 : vector<128x1xi1> to vector<128x1xi1>
    %36 = vector.broadcast %35 : vector<128x1xi1> to vector<128x128xi1>
    %37 = vector.broadcast %cst_11 : f32 to vector<128x128xf32>
    %38 = arith.select %36, %33, %37 : vector<128x128xi1>, vector<128x128xf32>
    %39 = arith.maximumf %26, %38 : vector<128x128xf32>
    %40 = vector.extract_strided_slice %9 {offsets = [0, 2], sizes = [128, 1], strides = [1, 1]} : vector<128x8xi32> to vector<128x1xi32>
    %41 = vector.broadcast %40 : vector<128x1xi32> to vector<128x128xi32>
    %42 = arith.cmpi eq, %41, %12 : vector<128x128xi32>
    %43 = arith.extui %42 : vector<128x128xi1> to vector<128x128xi32>
    %44 = arith.sitofp %43 : vector<128x128xi32> to vector<128x128xf32>
    %45 = arith.truncf %44 : vector<128x128xf32> to vector<128x128xbf16>
    %cst_12 = arith.constant dense<0.000000e+00> : vector<128x128xf32>
    %46 = tpu.matmul %45, %8, %cst_12 {dimension_numbers = #tpu.dot_dimension_numbers<[1], [0], [0], [1], [0, 0, 1, 1], [], []>} : vector<128x128xbf16>, vector<128x128xbf16>, vector<128x128xf32> -> vector<128x128xf32>
    %47 = vector.extract_strided_slice %11 {offsets = [0, 2], sizes = [128, 1], strides = [1, 1]} : vector<128x8xi1> to vector<128x1xi1>
    %cst_13 = arith.constant 0xFF800000 : f32
    %48 = vector.shape_cast %47 : vector<128x1xi1> to vector<128x1xi1>
    %49 = vector.broadcast %48 : vector<128x1xi1> to vector<128x128xi1>
    %50 = vector.broadcast %cst_13 : f32 to vector<128x128xf32>
    %51 = arith.select %49, %46, %50 : vector<128x128xi1>, vector<128x128xf32>
    %52 = arith.maximumf %39, %51 : vector<128x128xf32>
    %53 = vector.extract_strided_slice %9 {offsets = [0, 3], sizes = [128, 1], strides = [1, 1]} : vector<128x8xi32> to vector<128x1xi32>
    %54 = vector.broadcast %53 : vector<128x1xi32> to vector<128x128xi32>
    %55 = arith.cmpi eq, %54, %12 : vector<128x128xi32>
    %56 = arith.extui %55 : vector<128x128xi1> to vector<128x128xi32>
    %57 = arith.sitofp %56 : vector<128x128xi32> to vector<128x128xf32>
    %58 = arith.truncf %57 : vector<128x128xf32> to vector<128x128xbf16>
    %cst_14 = arith.constant dense<0.000000e+00> : vector<128x128xf32>
    %59 = tpu.matmul %58, %8, %cst_14 {dimension_numbers = #tpu.dot_dimension_numbers<[1], [0], [0], [1], [0, 0, 1, 1], [], []>} : vector<128x128xbf16>, vector<128x128xbf16>, vector<128x128xf32> -> vector<128x128xf32>
    %60 = vector.extract_strided_slice %11 {offsets = [0, 3], sizes = [128, 1], strides = [1, 1]} : vector<128x8xi1> to vector<128x1xi1>
    %cst_15 = arith.constant 0xFF800000 : f32
    %61 = vector.shape_cast %60 : vector<128x1xi1> to vector<128x1xi1>
    %62 = vector.broadcast %61 : vector<128x1xi1> to vector<128x128xi1>
    %63 = vector.broadcast %cst_15 : f32 to vector<128x128xf32>
    %64 = arith.select %62, %59, %63 : vector<128x128xi1>, vector<128x128xf32>
    %65 = arith.maximumf %52, %64 : vector<128x128xf32>
    %66 = vector.extract_strided_slice %9 {offsets = [0, 4], sizes = [128, 1], strides = [1, 1]} : vector<128x8xi32> to vector<128x1xi32>
    %67 = vector.broadcast %66 : vector<128x1xi32> to vector<128x128xi32>
    %68 = arith.cmpi eq, %67, %12 : vector<128x128xi32>
    %69 = arith.extui %68 : vector<128x128xi1> to vector<128x128xi32>
    %70 = arith.sitofp %69 : vector<128x128xi32> to vector<128x128xf32>
    %71 = arith.truncf %70 : vector<128x128xf32> to vector<128x128xbf16>
    %cst_16 = arith.constant dense<0.000000e+00> : vector<128x128xf32>
    %72 = tpu.matmul %71, %8, %cst_16 {dimension_numbers = #tpu.dot_dimension_numbers<[1], [0], [0], [1], [0, 0, 1, 1], [], []>} : vector<128x128xbf16>, vector<128x128xbf16>, vector<128x128xf32> -> vector<128x128xf32>
    %73 = vector.extract_strided_slice %11 {offsets = [0, 4], sizes = [128, 1], strides = [1, 1]} : vector<128x8xi1> to vector<128x1xi1>
    %cst_17 = arith.constant 0xFF800000 : f32
    %74 = vector.shape_cast %73 : vector<128x1xi1> to vector<128x1xi1>
    %75 = vector.broadcast %74 : vector<128x1xi1> to vector<128x128xi1>
    %76 = vector.broadcast %cst_17 : f32 to vector<128x128xf32>
    %77 = arith.select %75, %72, %76 : vector<128x128xi1>, vector<128x128xf32>
    %78 = arith.maximumf %65, %77 : vector<128x128xf32>
    %79 = vector.extract_strided_slice %9 {offsets = [0, 5], sizes = [128, 1], strides = [1, 1]} : vector<128x8xi32> to vector<128x1xi32>
    %80 = vector.broadcast %79 : vector<128x1xi32> to vector<128x128xi32>
    %81 = arith.cmpi eq, %80, %12 : vector<128x128xi32>
    %82 = arith.extui %81 : vector<128x128xi1> to vector<128x128xi32>
    %83 = arith.sitofp %82 : vector<128x128xi32> to vector<128x128xf32>
    %84 = arith.truncf %83 : vector<128x128xf32> to vector<128x128xbf16>
    %cst_18 = arith.constant dense<0.000000e+00> : vector<128x128xf32>
    %85 = tpu.matmul %84, %8, %cst_18 {dimension_numbers = #tpu.dot_dimension_numbers<[1], [0], [0], [1], [0, 0, 1, 1], [], []>} : vector<128x128xbf16>, vector<128x128xbf16>, vector<128x128xf32> -> vector<128x128xf32>
    %86 = vector.extract_strided_slice %11 {offsets = [0, 5], sizes = [128, 1], strides = [1, 1]} : vector<128x8xi1> to vector<128x1xi1>
    %cst_19 = arith.constant 0xFF800000 : f32
    %87 = vector.shape_cast %86 : vector<128x1xi1> to vector<128x1xi1>
    %88 = vector.broadcast %87 : vector<128x1xi1> to vector<128x128xi1>
    %89 = vector.broadcast %cst_19 : f32 to vector<128x128xf32>
    %90 = arith.select %88, %85, %89 : vector<128x128xi1>, vector<128x128xf32>
    %91 = arith.maximumf %78, %90 : vector<128x128xf32>
    %92 = vector.extract_strided_slice %9 {offsets = [0, 6], sizes = [128, 1], strides = [1, 1]} : vector<128x8xi32> to vector<128x1xi32>
    %93 = vector.broadcast %92 : vector<128x1xi32> to vector<128x128xi32>
    %94 = arith.cmpi eq, %93, %12 : vector<128x128xi32>
    %95 = arith.extui %94 : vector<128x128xi1> to vector<128x128xi32>
    %96 = arith.sitofp %95 : vector<128x128xi32> to vector<128x128xf32>
    %97 = arith.truncf %96 : vector<128x128xf32> to vector<128x128xbf16>
    %cst_20 = arith.constant dense<0.000000e+00> : vector<128x128xf32>
    %98 = tpu.matmul %97, %8, %cst_20 {dimension_numbers = #tpu.dot_dimension_numbers<[1], [0], [0], [1], [0, 0, 1, 1], [], []>} : vector<128x128xbf16>, vector<128x128xbf16>, vector<128x128xf32> -> vector<128x128xf32>
    %99 = vector.extract_strided_slice %11 {offsets = [0, 6], sizes = [128, 1], strides = [1, 1]} : vector<128x8xi1> to vector<128x1xi1>
    %cst_21 = arith.constant 0xFF800000 : f32
    %100 = vector.shape_cast %99 : vector<128x1xi1> to vector<128x1xi1>
    %101 = vector.broadcast %100 : vector<128x1xi1> to vector<128x128xi1>
    %102 = vector.broadcast %cst_21 : f32 to vector<128x128xf32>
    %103 = arith.select %101, %98, %102 : vector<128x128xi1>, vector<128x128xf32>
    %104 = arith.maximumf %91, %103 : vector<128x128xf32>
    %105 = vector.extract_strided_slice %9 {offsets = [0, 7], sizes = [128, 1], strides = [1, 1]} : vector<128x8xi32> to vector<128x1xi32>
    %106 = vector.broadcast %105 : vector<128x1xi32> to vector<128x128xi32>
    %107 = arith.cmpi eq, %106, %12 : vector<128x128xi32>
    %108 = arith.extui %107 : vector<128x128xi1> to vector<128x128xi32>
    %109 = arith.sitofp %108 : vector<128x128xi32> to vector<128x128xf32>
    %110 = arith.truncf %109 : vector<128x128xf32> to vector<128x128xbf16>
    %cst_22 = arith.constant dense<0.000000e+00> : vector<128x128xf32>
    %111 = tpu.matmul %110, %8, %cst_22 {dimension_numbers = #tpu.dot_dimension_numbers<[1], [0], [0], [1], [0, 0, 1, 1], [], []>} : vector<128x128xbf16>, vector<128x128xbf16>, vector<128x128xf32> -> vector<128x128xf32>
    %112 = vector.extract_strided_slice %11 {offsets = [0, 7], sizes = [128, 1], strides = [1, 1]} : vector<128x8xi1> to vector<128x1xi1>
    %cst_23 = arith.constant 0xFF800000 : f32
    %113 = vector.shape_cast %112 : vector<128x1xi1> to vector<128x1xi1>
    %114 = vector.broadcast %113 : vector<128x1xi1> to vector<128x128xi1>
    %115 = vector.broadcast %cst_23 : f32 to vector<128x128xf32>
    %116 = arith.select %114, %111, %115 : vector<128x128xi1>, vector<128x128xf32>
    %117 = arith.maximumf %104, %116 : vector<128x128xf32>
    %cst_24 = arith.constant 0xFF800000 : f32
    %118 = vector.broadcast %cst_24 : f32 to vector<128x128xf32>
    %119 = arith.cmpf oeq, %117, %118 : vector<128x128xf32>
    %120 = arith.addf %6, %117 : vector<128x128xf32>
    %cst_25 = arith.constant 0.000000e+00 : f32
    %121 = vector.broadcast %cst_25 : f32 to vector<128x128xf32>
    %122 = arith.cmpf ogt, %120, %121 : vector<128x128xf32>
    %cst_26 = arith.constant 0.000000e+00 : f32
    %123 = vector.broadcast %cst_26 : f32 to vector<128x128xf32>
    %124 = arith.minimumf %120, %123 : vector<128x128xf32>
    %125 = math.exp %124 : vector<128x128xf32>
    %cst_27 = arith.constant 1.000000e+00 : f32
    %126 = vector.broadcast %cst_27 : f32 to vector<128x128xf32>
    %127 = arith.subf %125, %126 : vector<128x128xf32>
    %128 = arith.select %122, %120, %127 : vector<128x128xi1>, vector<128x128xf32>
    %cst_28 = arith.constant 0xFF800000 : f32
    %129 = vector.broadcast %cst_28 : f32 to vector<128x128xf32>
    %130 = arith.select %119, %129, %128 : vector<128x128xi1>, vector<128x128xf32>
    %c0_29 = arith.constant 0 : index
    %c0_30 = arith.constant 0 : index
    %131 = vector.load %arg4[%c0_29, %c0_30] : memref<128x128xf32, #tpu.memory_space<vmem>>, vector<128x128xf32>
    tpu.vector_store %arg4[%c0_29, %c0_30], %130 {strides = array<i32>} : memref<128x128xf32, #tpu.memory_space<vmem>>, vector<128x128xf32>,
    return
  }
}

</mosaic_0001>

<bundles_post_ra>
// kernel: tpu_custom_call.1
= control target key start
LH: loop header
LB: loop body
LE: loop exit
PB: predicated region body
PF: predicated region fallthrough
CT: control target
= control target key end

     0   :  { %v3679_v2 = vmov 0   ;;  %vm99_vm0 = vcmask 261120   ;;  %s5814_s0 = inlined_call_operand.vmem [shape: bf16[128,32], index: 0, kind: input, shape index: {}]   ;;  %s5815_s1 = inlined_call_operand.vmem [shape: s32[128,8], index: 1, kind: input, shape index: {}]   ;;  %s5816_s2 = inlined_call_operand.vmem [shape: bf16[32,256], index: 2, kind: input, shape index: {}]   ;;  %s5817_s3 = inlined_call_operand.vmem [shape: f32[1,128], index: 3, kind: input, shape index: {}]   ;;  %s5818_s4 = inlined_call_operand.hbm [shape: f32[128,128], index: 4, kind: output, shape index: {}]  }
   0x1   :  { %v3719_v0 = vld [vmem:[%s5815_s1 + $0x10] sm:$0xff]  ;;  %v3724_v1 = vld [vmem:[%s5815_s1] sm:$0xff]  ;;  %3560 = vset.pattern.permute.xlu1 %v3679_v2  ;;  %3559 = vset.pattern.permute.xlu0 %v3679_v2  ;;  %v3739_v5 = vld [vmem:[%s5815_s1 + $0x18] sm:$0xff] }
   0x2   :  { %v3593_v3 = vld [vmem:[%s5816_s2 + $0x4] ss:$8 sps:$4 sm:$0xff]   ;;  %v3595_v4 = vld [vmem:[%s5816_s2] ss:$8 sps:$4 sm:$0xff]   ;;  %309 = vperm.xlu1 %3560, %v3719_v0   ;;  %303 = vperm.xlu0 %3559, %v3724_v1   ;;  %v3596_v7 = vld [vmem:[%s5816_s2 + $0x14] ss:$8 sps:$4 sm:$0xff]  }
   0x3   :  { %124 = vmatprep.subr.bf16.mxu0 %v3593_v3  ;;  %v3744_v6 = vld [vmem:[%s5815_s1 + $0x8] sm:$0xff]  ;;  %156 = vmatprep.mubr.bf16.mxu0 %v3679_v2  ;;  %v3598_v8 = vld [vmem:[%s5816_s2 + $0x10] ss:$8 sps:$4 sm:$0xff]   ;;  %v3763_v10 = vld [vmem:[%s5815_s1 + $0x20] sm:$0xff] }
   0x4   :  { %125 = vmatpush1.bf16.msra.mxu0 %v3595_v4  ;;  %v3758_v9 = vld [vmem:[%s5815_s1 + $0x28] sm:$0xff]  ;;  %v3599_v11 = vld [vmem:[%s5814_s0] sm:$0xff]   ;;  %v3773_v12 = vld [vmem:[%s5815_s1 + $0x38] sm:$0xff] }
   0x5   :  { %126 = vmatprep.subr.bf16.mxu0 %v3596_v7  ;;  %v3779_v13 = vld [vmem:[%s5815_s1 + $0x30] sm:$0xff]  ;;  %v3787_v14 = vld [vmem:[%s5815_s1 + $0x48] sm:$0xff]  ;;  %v3792_v15 = vld [vmem:[%s5815_s1 + $0x40] sm:$0xff] }
   0x6   :  { %312 = vperm.xlu1 %3560, %v3739_v5   ;;  %306 = vperm.xlu0 %3559, %v3744_v6   ;;  %v3600_v16 = vld [vmem:[%s5814_s0 + $0x8] sm:$0xff]  }
   0x8   :  { %127 = vmatpush1.bf16.msra.mxu0 %v3598_v8 }
   0xa   :  { %318 = vperm.xlu1 %3560, %v3758_v9   ;;  %315 = vperm.xlu0 %3559, %v3763_v10  }
   0xb   :  { %2866 = vmatmul.mubr.msk.bf16.vlgmr.msra.gmra.mrb[0].mxu0 %vm99_vm0, %v3599_v11 }
   0xc   :  { %166 = vmatprep.mubr.bf16.mxu0 %v3679_v2 }
   0xe   :  { %324 = vperm.xlu1 %3560, %v3773_v12   ;;  %321 = vperm.xlu0 %3559, %v3779_v13  }
   0xf   :  { %9 = vsyncpa [#allocation3], 0  ;;  %v3803_v17 = vld [vmem:[%s5815_s1 + $0x58] sm:$0xff]  ;;  %v3808_v18 = vld [vmem:[%s5815_s1 + $0x50] sm:$0xff]  ;;  %vm285_vm1 = vcmp.ge.s32.totalorder %v3744_v6, 0  ;;  %vm284_vm2 = vcmp.ge.s32.totalorder %v3724_v1, 0  ;;  %v300_v46 = vlaneseq }
  0x10   :  { %v3816_v19 = vld [vmem:[%s5815_s1 + $0x68] sm:$0xff]  ;;  %v3821_v20 = vld [vmem:[%s5815_s1 + $0x60] sm:$0xff]  ;;  %v3601_v21 = vld [vmem:[%s5814_s0 + $0x10] sm:$0xff]   ;;  %v3845_v24 = vsel %vm285_vm1, 1, %v3679_v2  ;;  %v3848_v25 = vsel %vm284_vm2, 1, %v3679_v2  ;;  %vm287_vm3 = vcmp.ge.s32.totalorder %v3739_v5, 0 }
  0x11   :  { %v3832_v22 = vld [vmem:[%s5815_s1 + $0x78] sm:$0xff]  ;;  %v3837_v23 = vld [vmem:[%s5815_s1 + $0x70] sm:$0xff]  ;;  %vm286_vm4 = vcmp.ge.s32.totalorder %v3719_v0, 0  ;;  %v3859_v27 = vsel %vm287_vm3, 1, %v3679_v2  ;;  %vm289_vm5 = vcmp.ge.s32.totalorder %v3758_v9, 0  ;;  %vm288_vm6 = vcmp.ge.s32.totalorder %v3763_v10, 0 }
  0x12   :  { %330 = vperm.xlu1 %3560, %v3787_v14   ;;  %327 = vperm.xlu0 %3559, %v3792_v15   ;;  %v3602_v26 = vld [vmem:[%s5814_s0 + $0x18] sm:$0xff]   ;;  %v3862_v28 = vsel %vm286_vm4, 1, %v3679_v2  ;;  %v3870_v29 = vsel %vm289_vm5, 1, %v3679_v2  ;;  %v3873_v30 = vsel %vm288_vm6, 1, %v3679_v2  ;;  %v3603_v31 = vld [vmem:[%s5814_s0 + $0x20] sm:$0xff]   ;;  %vm291_vm7 = vcmp.ge.s32.totalorder %v3773_v12, 0 }
  0x13   :  { %2867 = vmatmul.mubr.msk.bf16.gmra.mrb[4].mxu0 %vm99_vm0, %v3600_v16  ;;  %vm290_vm8 = vcmp.ge.s32.totalorder %v3779_v13, 0  ;;  %v3884_v32 = vsel %vm291_vm7, 1, %v3679_v2  ;;  %vm293_vm9 = vcmp.ge.s32.totalorder %v3787_v14, 0  ;;  %vm292_vm10 = vcmp.ge.s32.totalorder %v3792_v15, 0  ;;  %v3604_v36 = vld [vmem:[%s5814_s0 + $0x28] sm:$0xff]   ;;  %v3605_v41 = vld [vmem:[%s5814_s0 + $0x30] sm:$0xff]  }
  0x14   :  { %176 = vmatprep.mubr.bf16.mxu0 %v3679_v2  ;;  %v3887_v33 = vsel %vm290_vm8, 1, %v3679_v2  ;;  %v3895_v34 = vsel %vm293_vm9, 1, %v3679_v2  ;;  %v3898_v35 = vsel %vm292_vm10, 1, %v3679_v2  ;;  %vm295_vm11 = vcmp.ge.s32.totalorder %v3803_v17, 0  ;;  %v3606_v44 = vld [vmem:[%s5814_s0 + $0x38] sm:$0xff]  }
  0x15   :  { %5868 = vst [vmem:[#allocation5_spill] sm:$0xff] %v3895_v34  ;;  %vm294_vm12 = vcmp.ge.s32.totalorder %v3808_v18, 0  ;;  %v3909_v37 = vsel %vm295_vm11, 1, %v3679_v2  ;;  %vm297_vm13 = vcmp.ge.s32.totalorder %v3816_v19, 0  ;;  %vm296_vm14 = vcmp.ge.s32.totalorder %v3821_v20, 0 }
  0x16   :  { %336 = vperm.xlu1 %3560, %v3803_v17   ;;  %333 = vperm.xlu0 %3559, %v3808_v18   ;;  %5869 = vst [vmem:[#allocation6_spill] sm:$0xff] %v3909_v37  ;;  %v3912_v38 = vsel %vm294_vm12, 1, %v3679_v2  ;;  %v3920_v39 = vsel %vm297_vm13, 1, %v3679_v2  ;;  %v3923_v40 = vsel %vm296_vm14, 1, %v3679_v2  ;;  %vm299_vm15 = vcmp.ge.s32.totalorder %v3832_v22, 0 }
  0x17   :  { %5870 = vst [vmem:[#allocation7_spill] sm:$0xff] %v3920_v39  ;;  %vm298_vm1 = vcmp.ge.s32.totalorder %v3837_v23, 0  ;;  %v3934_v42 = vsel %vm299_vm15, 1, %v3679_v2  ;;  %v3680_v45 = vmov 1   ;;  %v3980_v49 = vand.u32 127, %v300_v46 }
  0x18   :  { %5871 = vst [vmem:[#allocation8_spill] sm:$0xff] %v3934_v42  ;;  %v3937_v43 = vsel %vm298_vm1, 1, %v3679_v2  ;;  %v3681_v50 = vmov 2   ;;  %v5819_v55 = vmov 1.0|1.0  }
  0x1a   :  { %342 = vperm.xlu1 %3560, %v3816_v19   ;;  %339 = vperm.xlu0 %3559, %v3821_v20  }
  0x1b   :  { %2868 = vmatmul.mubr.msk.bf16.gmra.mrb[8].mxu0 %vm99_vm0, %v3601_v21 }
  0x1c   :  { %186 = vmatprep.mubr.bf16.mxu0 %v3679_v2 }
  0x1e   :  { %348 = vperm.xlu1 %3560, %v3832_v22   ;;  %345 = vperm.xlu0 %3559, %v3837_v23  }
  0x22   :  { %523 = vperm.xlu1 %3560, %v3845_v24   ;;  %520 = vperm.xlu0 %3559, %v3848_v25  }
  0x23   :  { %2869 = vmatmul.mubr.msk.bf16.gmra.mrb[12].mxu0 %vm99_vm0, %v3602_v26 }
  0x24   :  { %196 = vmatprep.mubr.bf16.mxu0 %v3679_v2 }
  0x26   :  { %529 = vperm.xlu1 %3560, %v3859_v27   ;;  %526 = vperm.xlu0 %3559, %v3862_v28  }
  0x2a   :  { %535 = vperm.xlu1 %3560, %v3870_v29   ;;  %532 = vperm.xlu0 %3559, %v3873_v30  }
  0x2b   :  { %2870 = vmatmul.mubr.msk.bf16.gmra.mrb[16].mxu0 %vm99_vm0, %v3603_v31 }
  0x2c   :  { %206 = vmatprep.mubr.bf16.mxu0 %v3679_v2 }
  0x2e   :  { %541 = vperm.xlu1 %3560, %v3884_v32   ;;  %538 = vperm.xlu0 %3559, %v3887_v33  }
  0x32   :  { %547 = vperm.xlu1 %3560, %v3895_v34   ;;  %544 = vperm.xlu0 %3559, %v3898_v35  }
  0x33   :  { %2871 = vmatmul.mubr.msk.bf16.gmra.mrb[20].mxu0 %vm99_vm0, %v3604_v36 }
  0x34   :  { %216 = vmatprep.mubr.bf16.mxu0 %v3679_v2 }
  0x36   :  { %553 = vperm.xlu1 %3560, %v3909_v37   ;;  %550 = vperm.xlu0 %3559, %v3912_v38  }
  0x3a   :  { %559 = vperm.xlu1 %3560, %v3920_v39   ;;  %556 = vperm.xlu0 %3559, %v3923_v40  }
  0x3b   :  { %2872 = vmatmul.mubr.msk.bf16.gmra.mrb[24].mxu0 %vm99_vm0, %v3605_v41 }
  0x3c   :  { %226 = vmatprep.mubr.bf16.mxu0 %v3679_v2 }
  0x3e   :  { %565 = vperm.xlu1 %3560, %v3934_v42   ;;  %562 = vperm.xlu0 %3559, %v3937_v43  }
  0x42   :  { %3562 = vset.pattern.permute.xlu1 %v3680_v45  ;;  %3561 = vset.pattern.permute.xlu0 %v3680_v45 }
  0x43   :  { %603 = vperm.xlu1 %3562, %v3744_v6   ;;  %600 = vperm.xlu0 %3561, %v3724_v1  }
  0x44   :  { %2873 = vmatmul.mubr.msk.bf16.gmra.mrb[28].mxu0 %vm99_vm0, %v3606_v44 }
  0x47   :  { %606 = vperm.xlu1 %3562, %v3719_v0   ;;  %609 = vperm.xlu0 %3561, %v3739_v5  }
  0x4b   :  { %612 = vperm.xlu1 %3562, %v3763_v10   ;;  %615 = vperm.xlu0 %3561, %v3758_v9  }
  0x4f   :  { %618 = vperm.xlu1 %3562, %v3779_v13   ;;  %621 = vperm.xlu0 %3561, %v3773_v12  }
  0x53   :  { %624 = vperm.xlu1 %3562, %v3792_v15   ;;  %627 = vperm.xlu0 %3561, %v3787_v14  }
  0x57   :  { %630 = vperm.xlu1 %3562, %v3808_v18   ;;  %633 = vperm.xlu0 %3561, %v3803_v17  }
  0x5b   :  { %636 = vperm.xlu1 %3562, %v3821_v20   ;;  %639 = vperm.xlu0 %3561, %v3816_v19  }
  0x5f   :  { %642 = vperm.xlu1 %3562, %v3837_v23   ;;  %645 = vperm.xlu0 %3561, %v3832_v22  }
  0x63   :  { %801 = vperm.xlu1 %3562, %v3848_v25   ;;  %804 = vperm.xlu0 %3561, %v3845_v24  }
  0x67   :  { %807 = vperm.xlu1 %3562, %v3862_v28   ;;  %810 = vperm.xlu0 %3561, %v3859_v27  }
  0x6b   :  { %813 = vperm.xlu1 %3562, %v3873_v30   ;;  %816 = vperm.xlu0 %3561, %v3870_v29  }
  0x6f   :  { %819 = vperm.xlu1 %3562, %v3887_v33   ;;  %822 = vperm.xlu0 %3561, %v3884_v32  }
  0x73   :  { %825 = vperm.xlu1 %3562, %v3898_v35   ;;  %828 = vperm.xlu0 %3561, %v3895_v34  }
  0x77   :  { %831 = vperm.xlu1 %3562, %v3912_v38   ;;  %834 = vperm.xlu0 %3561, %v3909_v37  }
  0x7b   :  { %837 = vperm.xlu1 %3562, %v3923_v40   ;;  %840 = vperm.xlu0 %3561, %v3920_v39  }
  0x7f   :  { %843 = vperm.xlu1 %3562, %v3937_v43   ;;  %846 = vperm.xlu0 %3561, %v3934_v42  }
  0x81   :  { %v3978_v47 = vpop.permute.xlu1 %309  ;;  %v304_v48 = vpop.permute.xlu0 %303 }
  0x82   :  { %vm350_vm0 = vcmp.eq.s32.totalorder %v304_v48, %v3980_v49  ;;  %vm352_vm9 = vcmp.eq.s32.totalorder %v3978_v47, %v3980_v49 }
  0x83   :  { %3563 = vset.pattern.permute.xlu1 %v3681_v50  ;;  %3564 = vset.pattern.permute.xlu0 %v3681_v50 }
  0x84   :  { %897 = vperm.xlu1 %3563, %v3724_v1   ;;  %900 = vperm.xlu0 %3564, %v3744_v6  }
  0x85   :  { %v3984_v51 = vpop.permute.xlu1 %312  ;;  %v307_v52 = vpop.permute.xlu0 %306 }
  0x86   :  { %vm351_vm2 = vcmp.eq.s32.totalorder %v307_v52, %v3980_v49  ;;  %vm353_vm7 = vcmp.eq.s32.totalorder %v3984_v51, %v3980_v49 }
  0x87   :  { %vm2891_vm3 = vmpackc.low %vm351_vm2, %vm350_vm0 }
  0x88   :  { %903 = vperm.xlu1 %3563, %v3719_v0   ;;  %909 = vperm.xlu0 %3564, %v3763_v10   ;;  %vm2893_vm12 = vmpackc.low %vm353_vm7, %vm352_vm9 }
  0x89   :  { %v3990_v53 = vpop.permute.xlu1 %318  ;;  %v3992_v54 = vpop.permute.xlu0 %315  ;;  %3291 = vmatprep.mubr.msk.bf16.mxu1 %vm2891_vm3, %v5819_v55  ;;  %v3683_v55 = vmov 3  }
  0x8a   :  { %vm355_vm10 = vcmp.eq.s32.totalorder %v3990_v53, %v3980_v49  ;;  %vm354_vm11 = vcmp.eq.s32.totalorder %v3992_v54, %v3980_v49 }
  0x8b   :  { %vm2895_vm0 = vmpackc.low %vm355_vm10, %vm354_vm11 }
  0x8c   :  { %906 = vperm.xlu1 %3563, %v3739_v5   ;;  %915 = vperm.xlu0 %3564, %v3779_v13  }
  0x8d   :  { %v3997_v56 = vpop.permute.xlu1 %324  ;;  %v3999_v57 = vpop.permute.xlu0 %321 }
  0x8e   :  { %vm357_vm3 = vcmp.eq.s32.totalorder %v3997_v56, %v3980_v49 }
  0x90   :  { %912 = vperm.xlu1 %3563, %v3758_v9   ;;  %921 = vperm.xlu0 %3564, %v3792_v15  }
  0x91   :  { %v4003_v58 = vpop.permute.xlu1 %330  ;;  %v4005_v59 = vpop.permute.xlu0 %327 }
  0x92   :  { %vm359_vm7 = vcmp.eq.s32.totalorder %v4003_v58, %v3980_v49 }
  0x94   :  { %918 = vperm.xlu1 %3563, %v3773_v12   ;;  %927 = vperm.xlu0 %3564, %v3808_v18  }
  0x95   :  { %v4009_v60 = vpop.permute.xlu1 %336  ;;  %v4011_v61 = vpop.permute.xlu0 %333 }
  0x98   :  { %924 = vperm.xlu1 %3563, %v3787_v14   ;;  %933 = vperm.xlu0 %3564, %v3821_v20  }
  0x99   :  { %v4015_v62 = vpop.permute.xlu1 %342  ;;  %v4017_v63 = vpop.permute.xlu0 %339 }
  0x9c   :  { %930 = vperm.xlu1 %3563, %v3803_v17   ;;  %939 = vperm.xlu0 %3564, %v3837_v23  }
  0x9d   :  { %v4021_v2 = vpop.permute.xlu1 %348  ;;  %v4023_v3 = vpop.permute.xlu0 %345 }
  0xa0   :  { %936 = vperm.xlu1 %3563, %v3816_v19   ;;  %1098 = vperm.xlu0 %3564, %v3848_v25  }
  0xa1   :  { %v4027_v4 = vpop.permute.xlu1 %523  ;;  %v4029_v7 = vpop.permute.xlu0 %520 }
  0xa2   :  { %5872 = vst [vmem:[#allocation9_spill] sm:$0xff] %v4027_v4  ;;  %5873 = vst [vmem:[#allocation10_spill] sm:$0xff] %v4029_v7 }
  0xa4   :  { %942 = vperm.xlu1 %3563, %v3832_v22   ;;  %1104 = vperm.xlu0 %3564, %v3862_v28  }
  0xa5   :  { %v4033_v8 = vpop.permute.xlu1 %529  ;;  %v4035_v11 = vpop.permute.xlu0 %526 }
  0xa6   :  { %5874 = vst [vmem:[#allocation11_spill] sm:$0xff] %v4033_v8  ;;  %5875 = vst [vmem:[#allocation12_spill] sm:$0xff] %v4035_v11 }
  0xa8   :  { %1101 = vperm.xlu1 %3563, %v3845_v24   ;;  %1110 = vperm.xlu0 %3564, %v3873_v30  }
  0xa9   :  { %v4039_v16 = vpop.permute.xlu1 %535  ;;  %v4041_v21 = vpop.permute.xlu0 %532 }
  0xaa   :  { %5876 = vst [vmem:[#allocation13_spill] sm:$0xff] %v4039_v16  ;;  %5877 = vst [vmem:[#allocation14_spill] sm:$0xff] %v4041_v21 }
  0xac   :  { %1107 = vperm.xlu1 %3563, %v3859_v27   ;;  %1116 = vperm.xlu0 %3564, %v3887_v33  }
  0xad   :  { %v4045_v26 = vpop.permute.xlu1 %541  ;;  %v4047_v31 = vpop.permute.xlu0 %538 }
  0xae   :  { %5878 = vst [vmem:[#allocation15_spill] sm:$0xff] %v4045_v26  ;;  %5879 = vst [vmem:[#allocation16_spill] sm:$0xff] %v4047_v31 }
  0xb0   :  { %1113 = vperm.xlu1 %3563, %v3870_v29   ;;  %1122 = vperm.xlu0 %3564, %v3898_v35  }
  0xb1   :  { %v4051_v36 = vpop.permute.xlu1 %547  ;;  %v4053_v41 = vpop.permute.xlu0 %544 }
  0xb2   :  { %5880 = vst [vmem:[#allocation17_spill] sm:$0xff] %v4051_v36  ;;  %5881 = vst [vmem:[#allocation18_spill] sm:$0xff] %v4053_v41 }
  0xb4   :  { %1119 = vperm.xlu1 %3563, %v3884_v32   ;;  %1128 = vperm.xlu0 %3564, %v3912_v38  }
  0xb5   :  { %v4057_v44 = vpop.permute.xlu1 %553  ;;  %v4059_v45 = vpop.permute.xlu0 %550 }
  0xb6   :  { %5882 = vst [vmem:[#allocation19_spill] sm:$0xff] %v4057_v44  ;;  %5883 = vst [vmem:[#allocation20_spill] sm:$0xff] %v4059_v45 }
  0xb8   :  { %1125 = vperm.xlu1 %3563, %v3895_v34   ;;  %1134 = vperm.xlu0 %3564, %v3923_v40  }
  0xb9   :  { %v4063_v46 = vpop.permute.xlu1 %559  ;;  %v4065_v48 = vpop.permute.xlu0 %556 }
  0xba   :  { %5884 = vst [vmem:[#allocation21_spill] sm:$0xff] %v4063_v46  ;;  %5885 = vst [vmem:[#allocation22_spill] sm:$0xff] %v4065_v48 }
  0xbc   :  { %1131 = vperm.xlu1 %3563, %v3909_v37   ;;  %1140 = vperm.xlu0 %3564, %v3937_v43  }
  0xbd   :  { %v4069_v50 = vpop.permute.xlu1 %565  ;;  %v4071_v52 = vpop.permute.xlu0 %562 }
  0xbe   :  { %5886 = vst [vmem:[#allocation23_spill] sm:$0xff] %v4069_v50  ;;  %5887 = vst [vmem:[#allocation24_spill] sm:$0xff] %v4071_v52 }
  0xc0   :  { %1137 = vperm.xlu1 %3563, %v3920_v39   ;;  %3565 = vset.pattern.permute.xlu0 %v3683_v55 }
  0xc1   :  { %1194 = vperm.xlu0 %3565, %v3724_v1  }
  0xc2   :  { %v4075_v36 = vpop.permute.xlu1 %603  ;;  %v4077_v44 = vpop.permute.xlu0 %600 }
  0xc4   :  { %1143 = vperm.xlu1 %3563, %v3934_v42  }
  0xc5   :  { %1203 = vperm.xlu0 %3565, %v3739_v5  }
  0xc6   :  { %v4081_v46 = vpop.permute.xlu1 %606  ;;  %v4083_v48 = vpop.permute.xlu0 %609 }
  0xc8   :  { %3566 = vset.pattern.permute.xlu1 %v3683_v55 }
  0xc9   :  { %1197 = vperm.xlu1 %3566, %v3744_v6   ;;  %1209 = vperm.xlu0 %3565, %v3758_v9  }
  0xca   :  { %v4087_v50 = vpop.permute.xlu1 %612  ;;  %v4089_v52 = vpop.permute.xlu0 %615 }
  0xcd   :  { %1200 = vperm.xlu1 %3566, %v3719_v0   ;;  %1215 = vperm.xlu0 %3565, %v3773_v12  }
  0xce   :  { %v4093_v41 = vpop.permute.xlu1 %618  ;;  %v4095_v45 = vpop.permute.xlu0 %621 }
  0xcf   :  { %5888 = vst [vmem:[#allocation25_spill] sm:$0xff] %v4093_v41  ;;  %5889 = vst [vmem:[#allocation26_spill] sm:$0xff] %v4095_v45 }
  0xd1   :  { %1206 = vperm.xlu1 %3566, %v3763_v10   ;;  %1221 = vperm.xlu0 %3565, %v3787_v14  }
  0xd2   :  { %v4099_v55 = vpop.permute.xlu1 %624  ;;  %v4101_v26 = vpop.permute.xlu0 %627 }
  0xd3   :  { %5890 = vst [vmem:[#allocation27_spill] sm:$0xff] %v4099_v55  ;;  %5891 = vst [vmem:[#allocation28_spill] sm:$0xff] %v4101_v26 }
  0xd5   :  { %1212 = vperm.xlu1 %3566, %v3779_v13   ;;  %1227 = vperm.xlu0 %3565, %v3803_v17  }
  0xd6   :  { %v4105_v31 = vpop.permute.xlu1 %630  ;;  %v4107_v16 = vpop.permute.xlu0 %633 }
  0xd7   :  { %5892 = vst [vmem:[#allocation29_spill] sm:$0xff] %v4105_v31  ;;  %5893 = vst [vmem:[#allocation30_spill] sm:$0xff] %v4107_v16 }
  0xd9   :  { %1218 = vperm.xlu1 %3566, %v3792_v15   ;;  %1233 = vperm.xlu0 %3565, %v3816_v19  }
  0xda   :  { %v4111_v21 = vpop.permute.xlu1 %636  ;;  %v4113_v4 = vpop.permute.xlu0 %639 }
  0xdb   :  { %5894 = vst [vmem:[#allocation31_spill] sm:$0xff] %v4111_v21  ;;  %5895 = vst [vmem:[#allocation32_spill] sm:$0xff] %v4113_v4 }
  0xdd   :  { %1224 = vperm.xlu1 %3566, %v3808_v18   ;;  %1239 = vperm.xlu0 %3565, %v3832_v22  }
  0xde   :  { %v4117_v8 = vpop.permute.xlu1 %642  ;;  %v4119_v11 = vpop.permute.xlu0 %645 }
  0xdf   :  { %5896 = vst [vmem:[#allocation33_spill] sm:$0xff] %v4117_v8  ;;  %5897 = vst [vmem:[#allocation34_spill] sm:$0xff] %v4119_v11  ;;  %v4121_v7 = vpop.f32.mrb[0].mxu0 }
  0xe0   :  { %5898 = vst [vmem:[#allocation35_spill] sm:$0xff] %v4121_v7  ;;  %v160_v31 = vpop.f32.mrb[1].mxu0 }
  0xe1   :  { %1230 = vperm.xlu1 %3566, %v3821_v20   ;;  %1398 = vperm.xlu0 %3565, %v3845_v24   ;;  %v4125_v16 = vpop.f32.mrb[2].mxu0 }
  0xe2   :  { %5899 = vst [vmem:[#allocation36_spill] sm:$0xff] %v4125_v16  ;;  %v4127_v21 = vpop.permute.xlu1 %801  ;;  %v4129_v4 = vpop.permute.xlu0 %804 }
  0xe3   :  { %5900 = vst [vmem:[#allocation37_spill] sm:$0xff] %v4127_v21  ;;  %5901 = vst [vmem:[#allocation38_spill] sm:$0xff] %v4129_v4  ;;  %v164_v26 = vpop.f32.mrb[3].mxu0 }
  0xe4   :  { %v4131_v55 = vpack.c.bf16 %v164_v26, %v160_v31 }
  0xe5   :  { %1236 = vperm.xlu1 %3566, %v3837_v23   ;;  %1404 = vperm.xlu0 %3565, %v3859_v27  }
  0xe6   :  { %v4135_v11 = vpop.permute.xlu1 %807  ;;  %v4137_v7 = vpop.permute.xlu0 %810  ;;  %3275 = vmatprep.subr.bf16.mxu1 %v4131_v55  ;;  %3339 = vmatprep.subr.bf16.mxu0 %v4131_v55 }
  0xe7   :  { %5902 = vst [vmem:[#allocation39_spill] sm:$0xff] %v4135_v11  ;;  %5903 = vst [vmem:[#allocation40_spill] sm:$0xff] %v4137_v7  ;;  %v4141_v16 = vpop.f32.mrb[4].mxu0  ;;  %3276 = vmatpush3.bf16.msra.mxu1 %v4131_v55  ;;  %3340 = vmatpush3.bf16.msra.mxu0 %v4131_v55 }
  0xe8   :  { %5904 = vst [vmem:[#allocation41_spill] sm:$0xff] %v4141_v16  ;;  %v170_v26 = vpop.f32.mrb[5].mxu0 }
  0xe9   :  { %1395 = vperm.xlu1 %3566, %v3848_v25   ;;  %1410 = vperm.xlu0 %3565, %v3870_v29   ;;  %v4147_v31 = vpop.f32.mrb[6].mxu0 }
  0xea   :  { %5905 = vst [vmem:[#allocation42_spill] sm:$0xff] %v4147_v31  ;;  %v4149_v4 = vpop.permute.xlu1 %813  ;;  %v4151_v7 = vpop.permute.xlu0 %816 }
  0xeb   :  { %5906 = vst [vmem:[#allocation43_spill] sm:$0xff] %v4149_v4  ;;  %5907 = vst [vmem:[#allocation44_spill] sm:$0xff] %v4151_v7  ;;  %v174_v21 = vpop.f32.mrb[7].mxu0 }
  0xec   :  { %v4153_v11 = vpack.c.bf16 %v174_v21, %v170_v26 }
  0xed   :  { %1401 = vperm.xlu1 %3566, %v3862_v28   ;;  %1416 = vperm.xlu0 %3565, %v3884_v32  }
  0xee   :  { %v4157_v16 = vpop.permute.xlu1 %819  ;;  %v4159_v8 = vpop.permute.xlu0 %822  ;;  %3277 = vmatprep.subr.bf16.mxu1 %v4153_v11  ;;  %3341 = vmatprep.subr.bf16.mxu0 %v4153_v11 }
  0xef   :  { %5908 = vst [vmem:[#allocation45_spill] sm:$0xff] %v4157_v16  ;;  %5909 = vst [vmem:[#allocation46_spill] sm:$0xff] %v4159_v8  ;;  %v4163_v31 = vpop.f32.mrb[8].mxu0  ;;  %3278 = vmatpush3.bf16.msra.mxu1 %v4153_v11  ;;  %3342 = vmatpush3.bf16.msra.mxu0 %v4153_v11 }
  0xf0   :  { %5910 = vst [vmem:[#allocation47_spill] sm:$0xff] %v4163_v31  ;;  %v180_v21 = vpop.f32.mrb[9].mxu0 }
  0xf1   :  { %1407 = vperm.xlu1 %3566, %v3873_v30   ;;  %1422 = vperm.xlu0 %3565, %v3895_v34   ;;  %v4169_v26 = vpop.f32.mrb[10].mxu0 }
  0xf2   :  { %5911 = vst [vmem:[#allocation48_spill] sm:$0xff] %v4169_v26  ;;  %v4171_v7 = vpop.permute.xlu1 %825  ;;  %v4173_v8 = vpop.permute.xlu0 %828 }
  0xf3   :  { %5912 = vst [vmem:[#allocation49_spill] sm:$0xff] %v4171_v7  ;;  %5913 = vst [vmem:[#allocation50_spill] sm:$0xff] %v4173_v8  ;;  %v184_v16 = vpop.f32.mrb[11].mxu0 }
  0xf4   :  { %v4175_v4 = vpack.c.bf16 %v184_v16, %v180_v21 }
  0xf5   :  { %1413 = vperm.xlu1 %3566, %v3887_v33   ;;  %1428 = vperm.xlu0 %3565, %v3909_v37  }
  0xf6   :  { %v4179_v31 = vpop.permute.xlu1 %831  ;;  %v4181_v45 = vpop.permute.xlu0 %834  ;;  %3279 = vmatprep.subr.bf16.mxu1 %v4175_v4  ;;  %3343 = vmatprep.subr.bf16.mxu0 %v4175_v4 }
  0xf7   :  { %5914 = vst [vmem:[#allocation51_spill] sm:$0xff] %v4179_v31  ;;  %5915 = vst [vmem:[#allocation52_spill] sm:$0xff] %v4181_v45  ;;  %v4185_v26 = vpop.f32.mrb[12].mxu0  ;;  %3280 = vmatpush3.bf16.msra.mxu1 %v4175_v4  ;;  %3344 = vmatpush3.bf16.msra.mxu0 %v4175_v4 }
  0xf8   :  { %5916 = vst [vmem:[#allocation53_spill] sm:$0xff] %v4185_v26  ;;  %v190_v16 = vpop.f32.mrb[13].mxu0 }
  0xf9   :  { %1419 = vperm.xlu1 %3566, %v3898_v35   ;;  %1434 = vperm.xlu0 %3565, %v3920_v39   ;;  %v4191_v21 = vpop.f32.mrb[14].mxu0 }
  0xfa   :  { %5917 = vst [vmem:[#allocation54_spill] sm:$0xff] %v4191_v21  ;;  %v4193_v8 = vpop.permute.xlu1 %837  ;;  %v4195_v45 = vpop.permute.xlu0 %840 }
  0xfb   :  { %5918 = vst [vmem:[#allocation55_spill] sm:$0xff] %v4193_v8  ;;  %5919 = vst [vmem:[#allocation56_spill] sm:$0xff] %v4195_v45  ;;  %v194_v7 = vpop.f32.mrb[15].mxu0 }
  0xfc   :  { %v4197_v31 = vpack.c.bf16 %v194_v7, %v190_v16  ;;  %v3684_v16 = vmov 4  }
  0xfd   :  { %1425 = vperm.xlu1 %3566, %v3912_v38   ;;  %1440 = vperm.xlu0 %3565, %v3934_v42  }
  0xfe   :  { %v4201_v26 = vpop.permute.xlu1 %843  ;;  %v4203_v41 = vpop.permute.xlu0 %846  ;;  %3281 = vmatprep.subr.bf16.mxu1 %v4197_v31  ;;  %3345 = vmatprep.subr.bf16.mxu0 %v4197_v31 }
  0xff   :  { %5920 = vst [vmem:[#allocation57_spill] sm:$0xff] %v4201_v26  ;;  %5921 = vst [vmem:[#allocation58_spill] sm:$0xff] %v4203_v41  ;;  %v4207_v21 = vpop.f32.mrb[16].mxu0  ;;  %3282 = vmatpush3.bf16.msra.mxu1 %v4197_v31  ;;  %3346 = vmatpush3.bf16.msra.mxu0 %v4197_v31 }
 0x100   :  { %5922 = vst [vmem:[#allocation59_spill] sm:$0xff] %v4207_v21  ;;  %v200_v7 = vpop.f32.mrb[17].mxu0  ;;  %v5924_v21 = vmov 1.0|1.0  }
 0x101   :  { %1431 = vperm.xlu1 %3566, %v3923_v40   ;;  %3568 = vset.pattern.permute.xlu0 %v3684_v16  ;;  %v4212_v45 = vpop.f32.mrb[18].mxu0 }
 0x102   :  { %5923 = vst [vmem:[#allocation60_spill] sm:$0xff] %v4212_v45  ;;  %1494 = vperm.xlu0 %3568, %v3744_v6   ;;  %v204_v41 = vpop.f32.mrb[19].mxu0 }
 0x103   :  { %v898_v26 = vpop.permute.xlu1 %897  ;;  %v901_v8 = vpop.permute.xlu0 %900  ;;  %v4215_v42 = vpack.c.bf16 %v204_v41, %v200_v7 }
 0x104   :  { %vm944_vm4 = vcmp.eq.s32.totalorder %v898_v26, %v3980_v49  ;;  %vm945_vm5 = vcmp.eq.s32.totalorder %v901_v8, %v3980_v49 }
 0x105   :  { %vm2955_vm6 = vmpackc.low %vm945_vm5, %vm944_vm4  ;;  %1437 = vperm.xlu1 %3566, %v3937_v43   ;;  %3283 = vmatprep.subr.bf16.mxu1 %v4215_v42  ;;  %vm356_vm4 = vcmp.eq.s32.totalorder %v3999_v57, %v3980_v49 }
 0x106   :  { %3355 = vmatprep.mubr.msk.bf16.mxu0 %vm2955_vm6, %v5924_v21  ;;  %1503 = vperm.xlu0 %3568, %v3763_v10   ;;  %v4223_v45 = vpop.f32.mrb[20].mxu0  ;;  %vm2897_vm9 = vmpackc.low %vm357_vm3, %vm356_vm4  ;;  %vm363_vm3 = vcmp.eq.s32.totalorder %v4015_v62, %v3980_v49  ;;  %vm362_vm4 = vcmp.eq.s32.totalorder %v4017_v63, %v3980_v49  ;;  %v5856_v62 = vmov 5   ;;  %v4457_v63 = vld [vmem:[%s5815_s1] sm:$0xff] }
 0x107   :  { %5925 = vst [vmem:[#allocation61_spill] sm:$0xff] %v4223_v45  ;;  %v4225_v6 = vpop.permute.xlu1 %903  ;;  %v4227_v39 = vpop.permute.xlu0 %909  ;;  %3347 = vmatprep.subr.bf16.mxu0 %v4215_v42  ;;  %3284 = vmatpush3.bf16.msra.mxu1 %v4215_v42 }
 0x108   :  { %v210_v8 = vpop.f32.mrb[21].mxu0  ;;  %3348 = vmatpush3.bf16.msra.mxu0 %v4215_v42  ;;  %vm946_vm13 = vcmp.eq.s32.totalorder %v4225_v6, %v3980_v49  ;;  %vm948_vm14 = vcmp.eq.s32.totalorder %v4227_v39, %v3980_v49  ;;  %v5940_v6 = vld [vmem:[#allocation7_spill] sm:$0xff] }
 0x109   :  { %3567 = vset.pattern.permute.xlu1 %v3684_v16  ;;  %v4232_v41 = vpop.f32.mrb[22].mxu0 }
 0x10a   :  { %5926 = vst [vmem:[#allocation62_spill] sm:$0xff] %v4232_v41  ;;  %1491 = vperm.xlu1 %3567, %v3724_v1   ;;  %1509 = vperm.xlu0 %3568, %v3779_v13   ;;  %v214_v10 = vpop.f32.mrb[23].mxu0 }
 0x10b   :  { %v907_v26 = vpop.permute.xlu1 %906  ;;  %v4236_v7 = vpop.permute.xlu0 %915  ;;  %v4238_v45 = vpack.c.bf16 %v214_v10, %v210_v8 }
 0x10c   :  { %vm947_vm8 = vcmp.eq.s32.totalorder %v907_v26, %v3980_v49  ;;  %vm950_vm5 = vcmp.eq.s32.totalorder %v4236_v7, %v3980_v49  ;;  %v4494_v7 = vld [vmem:[%s5815_s1 + $0x28] sm:$0xff] }
 0x10d   :  { %3285 = vmatprep.subr.bf16.mxu1 %v4238_v45  ;;  %3349 = vmatprep.subr.bf16.mxu0 %v4238_v45  ;;  %vm2957_vm1 = vmpackc.low %vm947_vm8, %vm946_vm13  ;;  %vm358_vm8 = vcmp.eq.s32.totalorder %v4005_v59, %v3980_v49  ;;  %v5932_v59 = vld [vmem:[#allocation5_spill] sm:$0xff] }
 0x10e   :  { %1497 = vperm.xlu1 %3567, %v3719_v0   ;;  %1515 = vperm.xlu0 %3568, %v3792_v15   ;;  %v4244_v16 = vpop.f32.mrb[24].mxu0  ;;  %vm2899_vm13 = vmpackc.low %vm359_vm7, %vm358_vm8 }
 0x10f   :  { %5927 = vst [vmem:[#allocation63_spill] sm:$0xff] %v4244_v16  ;;  %v913_v41 = vpop.permute.xlu1 %912  ;;  %v4246_v1 = vpop.permute.xlu0 %921  ;;  %3286 = vmatpush3.bf16.msra.mxu1 %v4238_v45  ;;  %3350 = vmatpush3.bf16.msra.mxu0 %v4238_v45 }
 0x110   :  { %v220_v13 = vpop.f32.mrb[25].mxu0  ;;  %vm949_vm15 = vcmp.eq.s32.totalorder %v913_v41, %v3980_v49  ;;  %vm952_vm10 = vcmp.eq.s32.totalorder %v4246_v1, %v3980_v49  ;;  %v5941_v1 = vld [vmem:[#allocation8_spill] sm:$0xff] }
 0x111   :  { %v4250_v8 = vpop.f32.mrb[26].mxu0  ;;  %vm2959_vm2 = vmpackc.low %vm949_vm15, %vm948_vm14  ;;  %vm361_vm15 = vcmp.eq.s32.totalorder %v4009_v60, %v3980_v49 }
 0x112   :  { %5928 = vst [vmem:[#allocation64_spill] sm:$0xff] %v4250_v8  ;;  %1500 = vperm.xlu1 %3567, %v3739_v5   ;;  %v224_v10 = vpop.f32.mrb[27].mxu0  ;;  %1521 = vperm.xlu0 %3568, %v3808_v18  }
 0x113   :  { %v4254_v0 = vpop.permute.xlu1 %918  ;;  %v4256_v15 = vpop.permute.xlu0 %927  ;;  %v4258_v16 = vpack.c.bf16 %v224_v10, %v220_v13 }
 0x114   :  { %vm951_vm6 = vcmp.eq.s32.totalorder %v4254_v0, %v3980_v49 }
 0x115   :  { %3287 = vmatprep.subr.bf16.mxu1 %v4258_v16  ;;  %3351 = vmatprep.subr.bf16.mxu0 %v4258_v16 }
 0x116   :  { %1506 = vperm.xlu1 %3567, %v3758_v9   ;;  %3288 = vmatpush3.bf16.msra.mxu1 %v4258_v16 }
 0x117   :  { %v4264_v8 = vpop.f32.mrb[28].mxu0  ;;  %v4266_v5 = vpop.permute.xlu1 %924  ;;  %3352 = vmatpush3.bf16.msra.mxu0 %v4258_v16  ;;  %1527 = vperm.xlu0 %3568, %v3821_v20  }
 0x118   :  { %5929 = vst [vmem:[#allocation65_spill] sm:$0xff] %v4264_v8  ;;  %v230_v18 = vpop.f32.mrb[29].mxu0  ;;  %v4270_v37 = vpop.permute.xlu0 %933  ;;  %vm953_vm11 = vcmp.eq.s32.totalorder %v4266_v5, %v3980_v49  ;;  %v5943_v5 = vld [vmem:[#allocation30_spill] sm:$0xff] }
 0x119   :  { %v4272_v13 = vpop.f32.mrb[30].mxu0  ;;  %vm2963_vm14 = vmpackc.low %vm953_vm11, %vm952_vm10  ;;  %vm365_vm11 = vcmp.eq.s32.totalorder %v4021_v2, %v3980_v49  ;;  %v5934_v2 = vld [vmem:[#allocation6_spill] sm:$0xff] }
 0x11a   :  { %5930 = vst [vmem:[#allocation66_spill] sm:$0xff] %v4272_v13  ;;  %v234_v10 = vpop.f32.mrb[31].mxu0  ;;  %1512 = vperm.xlu1 %3567, %v3773_v12  }
 0x11b   :  { %v4275_v34 = vpack.c.bf16 %v234_v10, %v230_v18  ;;  %v4277_v9 = vpop.permute.xlu1 %930  ;;  %1533 = vperm.xlu0 %3568, %v3837_v23   ;;  %v4513_v18 = vld [vmem:[%s5815_s1 + $0x38] sm:$0xff]  ;;  %v5944_v10 = vld [vmem:[#allocation31_spill] sm:$0xff] }
 0x11c   :  { %v4282_v8 = vpop.permute.xlu0 %939 }
 0x11d   :  { %3289 = vmatprep.subr.bf16.mxu1 %v4275_v34  ;;  %3353 = vmatprep.subr.bf16.mxu0 %v4275_v34 }
 0x11e   :  { %3290 = vmatpush3.bf16.msra.mxu1 %v4275_v34  ;;  %3354 = vmatpush3.bf16.msra.mxu0 %v4275_v34 }
 0x11f   :  { %1518 = vperm.xlu1 %3567, %v3787_v14   ;;  %v4301_v12 = vpop.permute.xlu1 %936  ;;  %3307 = vmatprep.subr.bf16.mxu1 %v4131_v55 }
 0x120   :  { %v4306_v20 = vpop.permute.xlu0 %1098  ;;  %1692 = vperm.xlu0 %3568, %v3848_v25   ;;  %3403 = vmatprep.subr.bf16.mxu0 %v4131_v55  ;;  %vm957_vm7 = vcmp.eq.s32.totalorder %v4301_v12, %v3980_v49  ;;  %v4527_v12 = vld [vmem:[%s5815_s1 + $0x8] sm:$0xff] }
 0x121   :  { %3292 = vmatmul.mubr.msk.bf16.vlgmr.msra.gmra.mrb[0].mxu1 %vm2893_vm12, %v5924_v21  ;;  %3356 = vmatmul.mubr.msk.bf16.vlgmr.msra.gmra.mrb[32].mxu0 %vm2957_vm1, %v5924_v21  ;;  %vm2961_vm12 = vmpackc.low %vm951_vm6, %vm950_vm5  ;;  %vm360_vm1 = vcmp.eq.s32.totalorder %v4011_v61, %v3980_v49  ;;  %vm956_vm6 = vcmp.eq.s32.totalorder %v4270_v37, %v3980_v49 }
 0x122   :  { %3295 = vmatprep.mubr.msk.bf16.mxu1 %vm2895_vm0, %v5924_v21  ;;  %3308 = vmatpush3.bf16.msra.mxu1 %v4131_v55  ;;  %vm954_vm0 = vcmp.eq.s32.totalorder %v4256_v15, %v3980_v49  ;;  %vm2901_vm5 = vmpackc.low %vm361_vm15, %vm360_vm1  ;;  %vm648_vm15 = vcmp.eq.s32.totalorder %v4075_v36, %v3980_v49  ;;  %vm647_vm1 = vcmp.eq.s32.totalorder %v4077_v44, %v3980_v49  ;;  %v5936_v44 = vld [vmem:[#allocation25_spill] sm:$0xff] }
 0x123   :  { %3359 = vmatprep.mubr.msk.bf16.mxu0 %vm2959_vm2, %v5924_v21  ;;  %1524 = vperm.xlu1 %3567, %v3803_v17   ;;  %v4319_v14 = vpop.permute.xlu1 %942  ;;  %vm955_vm2 = vcmp.eq.s32.totalorder %v4277_v9, %v3980_v49  ;;  %vm2967_vm10 = vmpackc.low %vm957_vm7, %vm956_vm6  ;;  %vm651_vm6 = vcmp.eq.s32.totalorder %v4087_v50, %v3980_v49  ;;  %vm652_vm7 = vcmp.eq.s32.totalorder %v4089_v52, %v3980_v49  ;;  %v5938_v50 = vld [vmem:[#allocation27_spill] sm:$0xff]  ;;  %v5939_v52 = vld [vmem:[#allocation28_spill] sm:$0xff] }
 0x124   :  { %v4325_v23 = vpop.permute.xlu0 %1104  ;;  %3309 = vmatprep.subr.bf16.mxu1 %v4153_v11  ;;  %1698 = vperm.xlu0 %3568, %v3862_v28   ;;  %vm2965_vm8 = vmpackc.low %vm955_vm2, %vm954_vm0  ;;  %v5942_v15 = vld [vmem:[#allocation29_spill] sm:$0xff]  ;;  %v5945_v9 = vld [vmem:[#allocation32_spill] sm:$0xff] }
 0x125   :  { %3404 = vmatpush3.bf16.msra.mxu0 %v4131_v55 }
 0x126   :  { %3310 = vmatpush3.bf16.msra.mxu1 %v4153_v11  ;;  %3405 = vmatprep.subr.bf16.mxu0 %v4153_v11 }
 0x127   :  { %1530 = vperm.xlu1 %3567, %v3816_v19   ;;  %v4345_v17 = vpop.permute.xlu1 %1101  ;;  %3311 = vmatprep.subr.bf16.mxu1 %v4175_v4 }
 0x128   :  { %v4348_v39 = vpop.permute.xlu0 %1110  ;;  %1704 = vperm.xlu0 %3568, %v3873_v30  }
 0x129   :  { %3296 = vmatmul.mubr.msk.bf16.gmra.mrb[4].mxu1 %vm2897_vm9, %v5924_v21  ;;  %3360 = vmatmul.mubr.msk.bf16.gmra.mrb[36].mxu0 %vm2961_vm12, %v5924_v21  ;;  %vm2903_vm9 = vmpackc.low %vm363_vm3, %vm362_vm4  ;;  %vm364_vm12 = vcmp.eq.s32.totalorder %v4023_v3, %v3980_v49  ;;  %vm649_vm4 = vcmp.eq.s32.totalorder %v4081_v46, %v3980_v49  ;;  %v5937_v46 = vld [vmem:[#allocation26_spill] sm:$0xff] }
 0x12a   :  { %3299 = vmatprep.mubr.msk.bf16.mxu1 %vm2899_vm13, %v5924_v21  ;;  %3312 = vmatpush3.bf16.msra.mxu1 %v4175_v4  ;;  %vm958_vm13 = vcmp.eq.s32.totalorder %v4282_v8, %v3980_v49  ;;  %vm2905_vm0 = vmpackc.low %vm365_vm11, %vm364_vm12  ;;  %vm654_vm11 = vcmp.eq.s32.totalorder %v5937_v46, %v3980_v49  ;;  %vm655_vm12 = vcmp.eq.s32.totalorder %v5938_v50, %v3980_v49  ;;  %v4537_v46 = vld [vmem:[%s5815_s1 + $0x48] sm:$0xff]  ;;  %v4547_v50 = vld [vmem:[%s5815_s1 + $0x10] sm:$0xff] }
 0x12b   :  { %3363 = vmatprep.mubr.msk.bf16.mxu0 %vm2963_vm14, %v5924_v21  ;;  %1536 = vperm.xlu1 %3567, %v3832_v22   ;;  %v4357_v19 = vpop.permute.xlu1 %1107  ;;  %vm959_vm14 = vcmp.eq.s32.totalorder %v4319_v14, %v3980_v49  ;;  %vm2923_vm3 = vmpackc.low %vm648_vm15, %vm647_vm1  ;;  %vm657_vm1 = vcmp.eq.s32.totalorder %v5942_v15, %v3980_v49 }
 0x12c   :  { %v4363_v47 = vpop.permute.xlu0 %1116  ;;  %3313 = vmatprep.subr.bf16.mxu1 %v4197_v31  ;;  %1710 = vperm.xlu0 %3568, %v3887_v33   ;;  %vm2969_vm2 = vmpackc.low %vm959_vm14, %vm958_vm13  ;;  %vm656_vm13 = vcmp.eq.s32.totalorder %v5939_v52, %v3980_v49 }
 0x12d   :  { %3406 = vmatpush3.bf16.msra.mxu0 %v4153_v11  ;;  %vm2931_vm15 = vmpackc.low %vm656_vm13, %vm655_vm12 }
 0x12e   :  { %3314 = vmatpush3.bf16.msra.mxu1 %v4197_v31  ;;  %3407 = vmatprep.subr.bf16.mxu0 %v4175_v4 }
 0x12f   :  { %1695 = vperm.xlu1 %3567, %v3845_v24   ;;  %v4383_v22 = vpop.permute.xlu1 %1113  ;;  %3315 = vmatprep.subr.bf16.mxu1 %v4215_v42 }
 0x130   :  { %v4386_v51 = vpop.permute.xlu0 %1122  ;;  %1716 = vperm.xlu0 %3568, %v3898_v35  }
 0x131   :  { %3300 = vmatmul.mubr.msk.bf16.gmra.mrb[8].mxu1 %vm2901_vm5, %v5924_v21  ;;  %3364 = vmatmul.mubr.msk.bf16.gmra.mrb[40].mxu0 %vm2965_vm8, %v5924_v21  ;;  %vm650_vm5 = vcmp.eq.s32.totalorder %v4083_v48, %v3980_v49  ;;  %v4476_v48 = vld [vmem:[%s5815_s1 + $0x18] sm:$0xff] }
 0x132   :  { %3303 = vmatprep.mubr.msk.bf16.mxu1 %vm2903_vm9, %v5924_v21  ;;  %3316 = vmatpush3.bf16.msra.mxu1 %v4215_v42  ;;  %vm2925_vm8 = vmpackc.low %vm650_vm5, %vm649_vm4 }
 0x133   :  { %3367 = vmatprep.mubr.msk.bf16.mxu0 %vm2967_vm10, %v5924_v21  ;;  %1701 = vperm.xlu1 %3567, %v3859_v27   ;;  %v4395_v37 = vpop.permute.xlu1 %1119  ;;  %vm2927_vm9 = vmpackc.low %vm652_vm7, %vm651_vm6  ;;  %vm653_vm10 = vcmp.eq.s32.totalorder %v5936_v44, %v3980_v49 }
 0x134   :  { %v4401_v53 = vpop.permute.xlu0 %1128  ;;  %3317 = vmatprep.subr.bf16.mxu1 %v4238_v45  ;;  %1722 = vperm.xlu0 %3568, %v3912_v38   ;;  %vm2929_vm14 = vmpackc.low %vm654_vm11, %vm653_vm10 }
 0x135   :  { %3408 = vmatpush3.bf16.msra.mxu0 %v4175_v4 }
 0x136   :  { %3318 = vmatpush3.bf16.msra.mxu1 %v4238_v45  ;;  %3409 = vmatprep.subr.bf16.mxu0 %v4197_v31 }
 0x137   :  { %1707 = vperm.xlu1 %3567, %v3870_v29   ;;  %v4417_v54 = vpop.permute.xlu1 %1125  ;;  %3319 = vmatprep.subr.bf16.mxu1 %v4258_v16 }
 0x138   :  { %v4420_v56 = vpop.permute.xlu0 %1134  ;;  %1728 = vperm.xlu0 %3568, %v3923_v40  }
 0x139   :  { %5931 = vst [vmem:[#allocation67_spill] sm:$0xff] %v4420_v56  ;;  %3304 = vmatmul.mubr.msk.bf16.gmra.mrb[12].mxu1 %vm2905_vm0, %v5924_v21  ;;  %3368 = vmatmul.mubr.msk.bf16.gmra.mrb[44].mxu0 %vm2969_vm2, %v5924_v21  ;;  %vm658_vm0 = vcmp.eq.s32.totalorder %v5943_v5, %v3980_v49  ;;  %vm659_vm2 = vcmp.eq.s32.totalorder %v5944_v10, %v3980_v49  ;;  %v5946_v5 = vld [vmem:[#allocation33_spill] sm:$0xff]  ;;  %v5947_v10 = vld [vmem:[#allocation34_spill] sm:$0xff] }
 0x13a   :  { %3320 = vmatpush3.bf16.msra.mxu1 %v4258_v16  ;;  %3323 = vmatprep.mubr.msk.bf16.mxu1 %vm2923_vm3, %v5924_v21  ;;  %vm660_vm3 = vcmp.eq.s32.totalorder %v5945_v9, %v3980_v49  ;;  %vm2933_vm4 = vmpackc.low %vm658_vm0, %vm657_vm1  ;;  %vm661_vm6 = vcmp.eq.s32.totalorder %v5946_v5, %v3980_v49  ;;  %vm662_vm7 = vcmp.eq.s32.totalorder %v5947_v10, %v3980_v49  ;;  %v4559_v9 = vld [vmem:[%s5815_s1 + $0x60] sm:$0xff] }
 0x13b   :  { %1713 = vperm.xlu1 %3567, %v3884_v32   ;;  %v4428_v57 = vpop.permute.xlu1 %1131  ;;  %3321 = vmatprep.subr.bf16.mxu1 %v4275_v34  ;;  %vm2935_vm5 = vmpackc.low %vm660_vm3, %vm659_vm2  ;;  %v4570_v5 = vld [vmem:[%s5815_s1 + $0x20] sm:$0xff] }
 0x13c   :  { %v4431_v58 = vpop.permute.xlu0 %1140  ;;  %1734 = vperm.xlu0 %3568, %v3937_v43   ;;  %3410 = vmatpush3.bf16.msra.mxu0 %v4197_v31  ;;  %vm2937_vm10 = vmpackc.low %vm662_vm7, %vm661_vm6 }
 0x13d   :  { %3411 = vmatprep.subr.bf16.mxu0 %v4215_v42 }
 0x13e   :  { %3322 = vmatpush3.bf16.msra.mxu1 %v4275_v34 }
 0x13f   :  { %1719 = vperm.xlu1 %3567, %v5932_v59   ;;  %v4446_v60 = vpop.permute.xlu1 %1137  ;;  %3371 = vmatprep.subr.bf16.mxu1 %v4131_v55 }
 0x140   :  { %5933 = vst [vmem:[#allocation5_spill] sm:$0xff] %v4446_v60  ;;  %v4449_v61 = vpop.permute.xlu0 %1194  ;;  %3569 = vset.pattern.permute.xlu0 %v5856_v62  ;;  %3412 = vmatpush3.bf16.msra.mxu0 %v4215_v42  ;;  %v5950_v60 = vmov 6  }
 0x141   :  { %3324 = vmatmul.mubr.msk.bf16.vlgmr.msra.gmra.mrb[16].mxu1 %vm2925_vm8, %v5924_v21  ;;  %1788 = vperm.xlu0 %3569, %v4457_v63   ;;  %vm1241_vm8 = vcmp.eq.s32.totalorder %v4449_v61, %v3980_v49  ;;  %v5859_v61 = vmov 6  }
 0x142   :  { %3327 = vmatprep.mubr.msk.bf16.mxu1 %vm2927_vm9, %v5924_v21  ;;  %3372 = vmatpush3.bf16.msra.mxu1 %v4131_v55 }
 0x143   :  { %1725 = vperm.xlu1 %3567, %v5934_v2   ;;  %v4463_v3 = vpop.permute.xlu1 %1143  ;;  %3373 = vmatprep.subr.bf16.mxu1 %v4153_v11 }
 0x144   :  { %5935 = vst [vmem:[#allocation68_spill] sm:$0xff] %v4463_v3  ;;  %v4466_v36 = vpop.permute.xlu0 %1203  ;;  %3413 = vmatprep.subr.bf16.mxu0 %v4238_v45 }
 0x145   :  { %1797 = vperm.xlu0 %3569, %v4476_v48   ;;  %3414 = vmatpush3.bf16.msra.mxu0 %v4238_v45  ;;  %vm1244_vm12 = vcmp.eq.s32.totalorder %v4466_v36, %v3980_v49 }
 0x146   :  { %3374 = vmatpush3.bf16.msra.mxu1 %v4153_v11  ;;  %3415 = vmatprep.subr.bf16.mxu0 %v4258_v16 }
 0x147   :  { %1731 = vperm.xlu1 %3567, %v5940_v6   ;;  %3375 = vmatprep.subr.bf16.mxu1 %v4175_v4 }
 0x148   :  { %v1198_v41 = vpop.permute.xlu1 %1197  ;;  %v4488_v26 = vpop.permute.xlu0 %1209 }
 0x149   :  { %3328 = vmatmul.mubr.msk.bf16.gmra.mrb[20].mxu1 %vm2929_vm14, %v5924_v21  ;;  %1803 = vperm.xlu0 %3569, %v4494_v7   ;;  %vm1242_vm9 = vcmp.eq.s32.totalorder %v1198_v41, %v3980_v49  ;;  %v4584_v41 = vld [vmem:[%s5815_s1 + $0x30] sm:$0xff]  ;;  %vm1246_vm14 = vcmp.eq.s32.totalorder %v4488_v26, %v3980_v49 }
 0x14a   :  { %3331 = vmatprep.mubr.msk.bf16.mxu1 %vm2931_vm15, %v5924_v21  ;;  %3376 = vmatpush3.bf16.msra.mxu1 %v4175_v4  ;;  %vm2987_vm11 = vmpackc.low %vm1242_vm9, %vm1241_vm8  ;;  %v4615_v26 = vld [vmem:[%s5815_s1 + $0x50] sm:$0xff] }
 0x14b   :  { %1737 = vperm.xlu1 %3567, %v5941_v1   ;;  %3377 = vmatprep.subr.bf16.mxu1 %v4197_v31 }
 0x14c   :  { %v4501_v8 = vpop.permute.xlu1 %1200  ;;  %v4503_v0 = vpop.permute.xlu0 %1215  ;;  %3416 = vmatpush3.bf16.msra.mxu0 %v4258_v16 }
 0x14d   :  { %1809 = vperm.xlu0 %3569, %v4513_v18   ;;  %3417 = vmatprep.subr.bf16.mxu0 %v4275_v34  ;;  %vm1243_vm13 = vcmp.eq.s32.totalorder %v4501_v8, %v3980_v49  ;;  %vm1248_vm2 = vcmp.eq.s32.totalorder %v4503_v0, %v3980_v49 }
 0x14e   :  { %3378 = vmatpush3.bf16.msra.mxu1 %v4197_v31  ;;  %vm2989_vm1 = vmpackc.low %vm1244_vm12, %vm1243_vm13 }
 0x14f   :  { %3570 = vset.pattern.permute.xlu1 %v5856_v62  ;;  %3379 = vmatprep.subr.bf16.mxu1 %v4215_v42 }
 0x150   :  { %1791 = vperm.xlu1 %3570, %v4527_v12   ;;  %v1207_v14 = vpop.permute.xlu1 %1206  ;;  %v4530_v44 = vpop.permute.xlu0 %1221  ;;  %3418 = vmatpush3.bf16.msra.mxu0 %v4275_v34 }
 0x151   :  { %3332 = vmatmul.mubr.msk.bf16.gmra.mrb[24].mxu1 %vm2933_vm4, %v5924_v21  ;;  %1815 = vperm.xlu0 %3569, %v4537_v46   ;;  %vm1245_vm15 = vcmp.eq.s32.totalorder %v1207_v14, %v3980_v49  ;;  %vm1250_vm4 = vcmp.eq.s32.totalorder %v4530_v44, %v3980_v49 }
 0x152   :  { %3335 = vmatprep.mubr.msk.bf16.mxu1 %vm2935_vm5, %v5924_v21  ;;  %3380 = vmatpush3.bf16.msra.mxu1 %v4215_v42  ;;  %vm2991_vm0 = vmpackc.low %vm1246_vm14, %vm1245_vm15 }
 0x153   :  { %3381 = vmatprep.subr.bf16.mxu1 %v4238_v45  ;;  %3467 = vmatprep.subr.bf16.mxu0 %v4131_v55 }
 0x154   :  { %1794 = vperm.xlu1 %3570, %v4547_v50   ;;  %v1213_v52 = vpop.permute.xlu1 %1212  ;;  %v4550_v15 = vpop.permute.xlu0 %1227 }
 0x155   :  { %1824 = vperm.xlu0 %3569, %v4559_v9   ;;  %vm1247_vm3 = vcmp.eq.s32.totalorder %v1213_v52, %v3980_v49  ;;  %vm1252_vm8 = vcmp.eq.s32.totalorder %v4550_v15, %v3980_v49  ;;  %v5955_v52 = vmov 5  }
 0x156   :  { %3382 = vmatpush3.bf16.msra.mxu1 %v4238_v45  ;;  %vm2993_vm6 = vmpackc.low %vm1248_vm2, %vm1247_vm3 }
 0x157   :  { %3383 = vmatprep.subr.bf16.mxu1 %v4258_v16 }
 0x158   :  { %1800 = vperm.xlu1 %3570, %v4570_v5   ;;  %v1219_v10 = vpop.permute.xlu1 %1218  ;;  %v4573_v62 = vpop.permute.xlu0 %1233 }
 0x159   :  { %3336 = vmatmul.mubr.msk.bf16.gmra.mrb[28].mxu1 %vm2937_vm10, %v5924_v21  ;;  %3574 = vset.pattern.permute.xlu0 %v5859_v61  ;;  %v4602_v61 = vld [vmem:[%s5815_s1 + $0x40] sm:$0xff]  ;;  %vm1249_vm5 = vcmp.eq.s32.totalorder %v1219_v10, %v3980_v49  ;;  %vm1254_vm10 = vcmp.eq.s32.totalorder %v4573_v62, %v3980_v49  ;;  %v4654_v10 = vld [vmem:[%s5815_s1 + $0x58] sm:$0xff] }
 0x15a   :  { %3384 = vmatpush3.bf16.msra.mxu1 %v4258_v16  ;;  %3387 = vmatprep.mubr.msk.bf16.mxu1 %vm2987_vm11, %v5924_v21  ;;  %vm2995_vm7 = vmpackc.low %vm1250_vm4, %vm1249_vm5 }
 0x15b   :  { %3385 = vmatprep.subr.bf16.mxu1 %v4275_v34  ;;  %2085 = vperm.xlu0 %3574, %v4457_v63  }
 0x15c   :  { %1806 = vperm.xlu1 %3570, %v4584_v41   ;;  %v1225_v13 = vpop.permute.xlu1 %1224  ;;  %v4587_v3 = vpop.permute.xlu0 %1239 }
 0x15d   :  { %vm1251_vm9 = vcmp.eq.s32.totalorder %v1225_v13, %v3980_v49  ;;  %vm1256_vm14 = vcmp.eq.s32.totalorder %v4587_v3, %v3980_v49  ;;  %v3653_v3 = vld [vmem:[%s5815_s1 + $0x78] sm:$0xff] }
 0x15e   :  { %3386 = vmatpush3.bf16.msra.mxu1 %v4275_v34  ;;  %vm2997_vm12 = vmpackc.low %vm1252_vm8, %vm1251_vm9 }
 0x15f   :  { %3435 = vmatprep.subr.bf16.mxu1 %v4131_v55  ;;  %2091 = vperm.xlu0 %3574, %v4547_v50  }
 0x160   :  { %1812 = vperm.xlu1 %3570, %v4602_v61   ;;  %v1231_v36 = vpop.permute.xlu1 %1230  ;;  %v4605_v8 = vpop.permute.xlu0 %1398 }
 0x161   :  { %5948 = vst [vmem:[#allocation25_spill] sm:$0xff] %v4605_v8  ;;  %3388 = vmatmul.mubr.msk.bf16.vlgmr.msra.gmra.mrb[32].mxu1 %vm2989_vm1, %v5924_v21  ;;  %vm1253_vm11 = vcmp.eq.s32.totalorder %v1231_v36, %v3980_v49 }
 0x162   :  { %3391 = vmatprep.mubr.msk.bf16.mxu1 %vm2991_vm0, %v5924_v21  ;;  %3436 = vmatpush3.bf16.msra.mxu1 %v4131_v55  ;;  %vm2999_vm13 = vmpackc.low %vm1254_vm10, %vm1253_vm11 }
 0x163   :  { %3437 = vmatprep.subr.bf16.mxu1 %v4153_v11  ;;  %2100 = vperm.xlu0 %3574, %v4494_v7  }
 0x164   :  { %1818 = vperm.xlu1 %3570, %v4615_v26   ;;  %v1237_v14 = vpop.permute.xlu1 %1236  ;;  %v4618_v8 = vpop.permute.xlu0 %1404 }
 0x165   :  { %5949 = vst [vmem:[#allocation26_spill] sm:$0xff] %v4618_v8  ;;  %vm1255_vm15 = vcmp.eq.s32.totalorder %v1237_v14, %v3980_v49 }
 0x166   :  { %3438 = vmatpush3.bf16.msra.mxu1 %v4153_v11  ;;  %vm3001_vm1 = vmpackc.low %vm1256_vm14, %vm1255_vm15 }
 0x167   :  { %3439 = vmatprep.subr.bf16.mxu1 %v4175_v4  ;;  %2103 = vperm.xlu0 %3574, %v4584_v41  }
 0x168   :  { %3571 = vset.pattern.permute.xlu1 %v5950_v60  ;;  %v4630_v8 = vpop.permute.xlu1 %1395  ;;  %v4632_v56 = vpop.permute.xlu0 %1410 }
 0x169   :  { %5951 = vst [vmem:[#allocation27_spill] sm:$0xff] %v4630_v8  ;;  %5952 = vst [vmem:[#allocation28_spill] sm:$0xff] %v4632_v56  ;;  %2088 = vperm.xlu1 %3571, %v4527_v12   ;;  %3392 = vmatmul.mubr.msk.bf16.gmra.mrb[36].mxu1 %vm2993_vm6, %v5924_v21 }
 0x16a   :  { %3395 = vmatprep.mubr.msk.bf16.mxu1 %vm2995_vm7, %v5924_v21  ;;  %3440 = vmatpush3.bf16.msra.mxu1 %v4175_v4 }
 0x16b   :  { %3441 = vmatprep.subr.bf16.mxu1 %v4197_v31  ;;  %2109 = vperm.xlu0 %3574, %v4602_v61  }
 0x16c   :  { %v4640_v0 = vpop.permute.xlu1 %1401  ;;  %v4642_v44 = vpop.permute.xlu0 %1416 }
 0x16d   :  { %5953 = vst [vmem:[#allocation29_spill] sm:$0xff] %v4640_v0  ;;  %5954 = vst [vmem:[#allocation30_spill] sm:$0xff] %v4642_v44  ;;  %3572 = vset.pattern.permute.xlu1 %v5955_v52 }
 0x16e   :  { %1821 = vperm.xlu1 %3572, %v4654_v10   ;;  %3442 = vmatpush3.bf16.msra.mxu1 %v4197_v31 }
 0x16f   :  { %3443 = vmatprep.subr.bf16.mxu1 %v4215_v42  ;;  %2118 = vperm.xlu0 %3574, %v4654_v10  }
 0x170   :  { %v4660_v13 = vpop.permute.xlu1 %1407  ;;  %v4662_v15 = vpop.permute.xlu0 %1422 }
 0x171   :  { %5956 = vst [vmem:[#allocation31_spill] sm:$0xff] %v4660_v13  ;;  %5957 = vst [vmem:[#allocation32_spill] sm:$0xff] %v4662_v15  ;;  %3396 = vmatmul.mubr.msk.bf16.gmra.mrb[40].mxu1 %vm2997_vm12, %v5924_v21  ;;  %v4683_v15 = vld [vmem:[%s5815_s1 + $0x68] sm:$0xff]  ;;  %v4713_v13 = vld [vmem:[%s5815_s1 + $0x70] sm:$0xff] }
 0x172   :  { %3573 = vset.pattern.permute.xlu1 %v5950_v60  ;;  %3399 = vmatprep.mubr.msk.bf16.mxu1 %vm2999_vm13, %v5924_v21 }
 0x173   :  { %3444 = vmatpush3.bf16.msra.mxu1 %v4215_v42  ;;  %2094 = vperm.xlu1 %3573, %v4476_v48  }
 0x174   :  { %v4669_v62 = vpop.permute.xlu1 %1413  ;;  %v4671_v36 = vpop.permute.xlu0 %1428  ;;  %3445 = vmatprep.subr.bf16.mxu1 %v4238_v45  ;;  %2121 = vperm.xlu0 %3574, %v4559_v9  }
 0x175   :  { %5958 = vst [vmem:[#allocation33_spill] sm:$0xff] %v4669_v62  ;;  %5959 = vst [vmem:[#allocation34_spill] sm:$0xff] %v4671_v36 }
 0x177   :  { %3446 = vmatpush3.bf16.msra.mxu1 %v4238_v45  ;;  %3575 = vset.pattern.permute.xlu1 %v5955_v52 }
 0x178   :  { %1827 = vperm.xlu1 %3575, %v4683_v15   ;;  %v4686_v36 = vpop.permute.xlu1 %1419  ;;  %v4688_v56 = vpop.permute.xlu0 %1434  ;;  %3447 = vmatprep.subr.bf16.mxu1 %v4258_v16 }
 0x179   :  { %5960 = vst [vmem:[#allocation69_spill] sm:$0xff] %v4686_v36  ;;  %5961 = vst [vmem:[#allocation70_spill] sm:$0xff] %v4688_v56  ;;  %3400 = vmatmul.mubr.msk.bf16.gmra.mrb[44].mxu1 %vm3001_vm1, %v5924_v21  ;;  %2130 = vperm.xlu0 %3574, %v3653_v3   ;;  %v5863_v36 = vmov 7  }
 0x17b   :  { %3448 = vmatpush3.bf16.msra.mxu1 %v4258_v16 }
 0x17c   :  { %3576 = vset.pattern.permute.xlu1 %v5950_v60  ;;  %v4697_v14 = vpop.permute.xlu1 %1425  ;;  %3449 = vmatprep.subr.bf16.mxu1 %v4275_v34  ;;  %v4701_v56 = vpop.permute.xlu0 %1440 }
 0x17d   :  { %5962 = vst [vmem:[#allocation71_spill] sm:$0xff] %v4697_v14  ;;  %2097 = vperm.xlu1 %3576, %v4570_v5   ;;  %5963 = vst [vmem:[#allocation72_spill] sm:$0xff] %v4701_v56  ;;  %3585 = vset.pattern.permute.xlu0 %v5863_v36 }
 0x17e   :  { %2394 = vperm.xlu0 %3585, %v4570_v5  }
 0x17f   :  { %3450 = vmatpush3.bf16.msra.mxu1 %v4275_v34 }
 0x180   :  { %3531 = vmatprep.subr.bf16.mxu1 %v4131_v55  ;;  %v4707_v44 = vpop.permute.xlu1 %1431 }
 0x181   :  { %5964 = vst [vmem:[#allocation73_spill] sm:$0xff] %v4707_v44  ;;  %3577 = vset.pattern.permute.xlu1 %v5955_v52  ;;  %v1495_v14 = vpop.permute.xlu0 %1494 }
 0x182   :  { %1830 = vperm.xlu1 %3577, %v4713_v13   ;;  %2406 = vperm.xlu0 %3585, %v4602_v61   ;;  %vm1539_vm0 = vcmp.eq.s32.totalorder %v1495_v14, %v3980_v49 }
 0x184   :  { %v4717_v36 = vpop.permute.xlu1 %1437 }
 0x185   :  { %5965 = vst [vmem:[#allocation74_spill] sm:$0xff] %v4717_v36  ;;  %v1504_v5 = vpop.permute.xlu0 %1503 }
 0x186   :  { %1833 = vperm.xlu1 %3577, %v3653_v3   ;;  %2382 = vperm.xlu0 %3585, %v4457_v63   ;;  %vm1542_vm7 = vcmp.eq.s32.totalorder %v1504_v5, %v3980_v49 }
 0x189   :  { %v1492_v56 = vpop.permute.xlu1 %1491  ;;  %v1510_v44 = vpop.permute.xlu0 %1509 }
 0x18a   :  { %3578 = vset.pattern.permute.xlu1 %v5950_v60  ;;  %vm1538_vm2 = vcmp.eq.s32.totalorder %v1492_v56, %v3980_v49  ;;  %2421 = vperm.xlu0 %3585, %v4683_v15   ;;  %v5966_v56 = vmov 7   ;;  %vm1544_vm10 = vcmp.eq.s32.totalorder %v1510_v44, %v3980_v49 }
 0x18b   :  { %vm3019_vm3 = vmpackc.low %vm1539_vm0, %vm1538_vm2  ;;  %2106 = vperm.xlu1 %3578, %v4513_v18  }
 0x18c   :  { %3419 = vmatprep.mubr.msk.bf16.mxu0 %vm3019_vm3, %v5924_v21 }
 0x18d   :  { %v1498_v61 = vpop.permute.xlu1 %1497  ;;  %v1516_v36 = vpop.permute.xlu0 %1515 }
 0x18e   :  { %2391 = vperm.xlu0 %3585, %v4476_v48   ;;  %vm1540_vm4 = vcmp.eq.s32.totalorder %v1498_v61, %v3980_v49  ;;  %vm1546_vm13 = vcmp.eq.s32.totalorder %v1516_v36, %v3980_v49 }
 0x18f   :  { %2112 = vperm.xlu1 %3578, %v4537_v46  }
 0x191   :  { %v1501_v63 = vpop.permute.xlu1 %1500  ;;  %v1522_v14 = vpop.permute.xlu0 %1521 }
 0x192   :  { %vm1541_vm5 = vcmp.eq.s32.totalorder %v1501_v63, %v3980_v49  ;;  %2427 = vperm.xlu0 %3585, %v3653_v3   ;;  %vm1548_vm1 = vcmp.eq.s32.totalorder %v1522_v14, %v3980_v49 }
 0x193   :  { %vm3021_vm6 = vmpackc.low %vm1541_vm5, %vm1540_vm4  ;;  %3579 = vset.pattern.permute.xlu1 %v5966_v56 }
 0x194   :  { %2397 = vperm.xlu1 %3579, %v4494_v7   ;;  %3420 = vmatmul.mubr.msk.bf16.vlgmr.msra.gmra.mrb[48].mxu0 %vm3021_vm6, %v5924_v21 }
 0x195   :  { %3468 = vmatpush3.bf16.msra.mxu0 %v4131_v55  ;;  %v1507_v48 = vpop.permute.xlu1 %1506 }
 0x196   :  { %vm1543_vm8 = vcmp.eq.s32.totalorder %v1507_v48, %v3980_v49  ;;  %3469 = vmatprep.subr.bf16.mxu0 %v4153_v11  ;;  %v1528_v61 = vpop.permute.xlu0 %1527  ;;  %3588 = vset.pattern.permute.xlu0 %v5955_v52 }
 0x197   :  { %vm3023_vm9 = vmpackc.low %vm1543_vm8, %vm1542_vm7  ;;  %1992 = vperm.xlu0 %3588, %v3845_v24   ;;  %vm1550_vm3 = vcmp.eq.s32.totalorder %v1528_v61, %v3980_v49 }
 0x198   :  { %3580 = vset.pattern.permute.xlu1 %v5950_v60  ;;  %3423 = vmatprep.mubr.msk.bf16.mxu0 %vm3023_vm9, %v5924_v21 }
 0x199   :  { %2115 = vperm.xlu1 %3580, %v4615_v26   ;;  %3470 = vmatpush3.bf16.msra.mxu0 %v4153_v11  ;;  %v1513_v7 = vpop.permute.xlu1 %1512 }
 0x19a   :  { %vm1545_vm11 = vcmp.eq.s32.totalorder %v1513_v7, %v3980_v49  ;;  %3471 = vmatprep.subr.bf16.mxu0 %v4175_v4  ;;  %v1534_v3 = vpop.permute.xlu0 %1533 }
 0x19b   :  { %vm3025_vm12 = vmpackc.low %vm1545_vm11, %vm1544_vm10  ;;  %2001 = vperm.xlu0 %3588, %v3873_v30   ;;  %vm1552_vm6 = vcmp.eq.s32.totalorder %v1534_v3, %v3980_v49 }
 0x19c   :  { %3424 = vmatmul.mubr.msk.bf16.gmra.mrb[52].mxu0 %vm3025_vm12, %v5924_v21 }
 0x19d   :  { %3581 = vset.pattern.permute.xlu1 %v5966_v56  ;;  %3472 = vmatpush3.bf16.msra.mxu0 %v4175_v4 }
 0x19e   :  { %2400 = vperm.xlu1 %3581, %v4584_v41   ;;  %v1519_v44 = vpop.permute.xlu1 %1518  ;;  %3473 = vmatprep.subr.bf16.mxu0 %v4197_v31 }
 0x19f   :  { %vm1547_vm14 = vcmp.eq.s32.totalorder %v1519_v44, %v3980_v49  ;;  %v4754_v5 = vpop.permute.xlu0 %1692  ;;  %2007 = vperm.xlu0 %3588, %v3887_v33  }
 0x1a0   :  { %5967 = vst [vmem:[#allocation75_spill] sm:$0xff] %v4754_v5  ;;  %vm3027_vm15 = vmpackc.low %vm1547_vm14, %vm1546_vm13 }
 0x1a1   :  { %3427 = vmatprep.mubr.msk.bf16.mxu0 %vm3027_vm15, %v5924_v21  ;;  %3474 = vmatpush3.bf16.msra.mxu0 %v4197_v31 }
 0x1a2   :  { %2403 = vperm.xlu1 %3581, %v4513_v18   ;;  %v1525_v36 = vpop.permute.xlu1 %1524  ;;  %3475 = vmatprep.subr.bf16.mxu0 %v4215_v42 }
 0x1a3   :  { %vm1549_vm0 = vcmp.eq.s32.totalorder %v1525_v36, %v3980_v49  ;;  %v4763_v41 = vpop.permute.xlu0 %1698  ;;  %2013 = vperm.xlu0 %3588, %v3898_v35  }
 0x1a4   :  { %5968 = vst [vmem:[#allocation76_spill] sm:$0xff] %v4763_v41  ;;  %vm3029_vm2 = vmpackc.low %vm1549_vm0, %vm1548_vm1 }
 0x1a5   :  { %3428 = vmatmul.mubr.msk.bf16.gmra.mrb[56].mxu0 %vm3029_vm2, %v5924_v21 }
 0x1a6   :  { %3476 = vmatpush3.bf16.msra.mxu0 %v4215_v42  ;;  %3582 = vset.pattern.permute.xlu1 %v5950_v60  ;;  %v1531_v63 = vpop.permute.xlu1 %1530 }
 0x1a7   :  { %vm1551_vm4 = vcmp.eq.s32.totalorder %v1531_v63, %v3980_v49  ;;  %3477 = vmatprep.subr.bf16.mxu0 %v4238_v45  ;;  %2124 = vperm.xlu1 %3582, %v4683_v15   ;;  %v4773_v18 = vpop.permute.xlu0 %1704 }
 0x1a8   :  { %5969 = vst [vmem:[#allocation77_spill] sm:$0xff] %v4773_v18  ;;  %vm3031_vm5 = vmpackc.low %vm1551_vm4, %vm1550_vm3  ;;  %2019 = vperm.xlu0 %3588, %v3912_v38  }
 0x1a9   :  { %3431 = vmatprep.mubr.msk.bf16.mxu0 %vm3031_vm5, %v5924_v21 }
 0x1aa   :  { %3478 = vmatpush3.bf16.msra.mxu0 %v4238_v45  ;;  %v1537_v14 = vpop.permute.xlu1 %1536 }
 0x1ab   :  { %vm1553_vm7 = vcmp.eq.s32.totalorder %v1537_v14, %v3980_v49  ;;  %3583 = vset.pattern.permute.xlu1 %v5966_v56  ;;  %3479 = vmatprep.subr.bf16.mxu0 %v4258_v16  ;;  %v4782_v48 = vpop.permute.xlu0 %1710 }
 0x1ac   :  { %5970 = vst [vmem:[#allocation78_spill] sm:$0xff] %v4782_v48  ;;  %vm3033_vm8 = vmpackc.low %vm1553_vm7, %vm1552_vm6  ;;  %2409 = vperm.xlu1 %3583, %v4537_v46   ;;  %2025 = vperm.xlu0 %3588, %v3923_v40  }
 0x1ad   :  { %3432 = vmatmul.mubr.msk.bf16.gmra.mrb[60].mxu0 %vm3033_vm8, %v5924_v21 }
 0x1ae   :  { %3480 = vmatpush3.bf16.msra.mxu0 %v4258_v16  ;;  %v4788_v15 = vpop.permute.xlu1 %1695 }
 0x1af   :  { %5971 = vst [vmem:[#allocation79_spill] sm:$0xff] %v4788_v15  ;;  %3481 = vmatprep.subr.bf16.mxu0 %v4275_v34  ;;  %v4791_v61 = vpop.permute.xlu0 %1716 }
 0x1b0   :  { %5972 = vst [vmem:[#allocation80_spill] sm:$0xff] %v4791_v61  ;;  %3584 = vset.pattern.permute.xlu1 %v5950_v60  ;;  %2031 = vperm.xlu0 %3588, %v3937_v43  }
 0x1b1   :  { %2127 = vperm.xlu1 %3584, %v4713_v13  }
 0x1b2   :  { %3482 = vmatpush3.bf16.msra.mxu0 %v4275_v34  ;;  %v4797_v46 = vpop.permute.xlu1 %1701 }
 0x1b3   :  { %5973 = vst [vmem:[#allocation81_spill] sm:$0xff] %v4797_v46  ;;  %3499 = vmatprep.subr.bf16.mxu0 %v4131_v55  ;;  %v4800_v7 = vpop.permute.xlu0 %1722 }
 0x1b4   :  { %5974 = vst [vmem:[#allocation82_spill] sm:$0xff] %v4800_v7  ;;  %3589 = vset.pattern.permute.xlu0 %v5950_v60 }
 0x1b5   :  { %3586 = vset.pattern.permute.xlu1 %v5966_v56  ;;  %2286 = vperm.xlu0 %3589, %v3848_v25  }
 0x1b6   :  { %2412 = vperm.xlu1 %3586, %v4615_v26   ;;  %v4806_v3 = vpop.permute.xlu1 %1707 }
 0x1b7   :  { %5975 = vst [vmem:[#allocation83_spill] sm:$0xff] %v4806_v3  ;;  %v4808_v44 = vpop.permute.xlu0 %1728 }
 0x1b8   :  { %5976 = vst [vmem:[#allocation84_spill] sm:$0xff] %v4808_v44 }
 0x1b9   :  { %2295 = vperm.xlu0 %3589, %v3859_v27  }
 0x1ba   :  { %2415 = vperm.xlu1 %3586, %v4654_v10   ;;  %v4812_v36 = vpop.permute.xlu1 %1713 }
 0x1bb   :  { %5977 = vst [vmem:[#allocation85_spill] sm:$0xff] %v4812_v36  ;;  %v4814_v63 = vpop.permute.xlu0 %1734 }
 0x1bc   :  { %5978 = vst [vmem:[#allocation86_spill] sm:$0xff] %v4814_v63 }
 0x1bd   :  { %2301 = vperm.xlu0 %3589, %v3870_v29  }
 0x1be   :  { %2385 = vperm.xlu1 %3586, %v4527_v12   ;;  %v4818_v14 = vpop.permute.xlu1 %1719 }
 0x1bf   :  { %5979 = vst [vmem:[#allocation87_spill] sm:$0xff] %v4818_v14 }
 0x1c0   :  { %v1789_v61 = vpop.permute.xlu0 %1788 }
 0x1c1   :  { %2307 = vperm.xlu0 %3589, %v3884_v32   ;;  %vm1835_vm9 = vcmp.eq.s32.totalorder %v1789_v61, %v3980_v49 }
 0x1c2   :  { %2418 = vperm.xlu1 %3586, %v4559_v9   ;;  %v4822_v26 = vpop.permute.xlu1 %1725 }
 0x1c3   :  { %5980 = vst [vmem:[#allocation88_spill] sm:$0xff] %v4822_v26 }
 0x1c4   :  { %v1798_v44 = vpop.permute.xlu0 %1797 }
 0x1c5   :  { %2313 = vperm.xlu0 %3589, %v5932_v59   ;;  %vm1838_vm12 = vcmp.eq.s32.totalorder %v1798_v44, %v3980_v49 }
 0x1c6   :  { %2388 = vperm.xlu1 %3586, %v4547_v50   ;;  %v4826_v10 = vpop.permute.xlu1 %1731 }
 0x1c7   :  { %5981 = vst [vmem:[#allocation89_spill] sm:$0xff] %v4826_v10 }
 0x1c8   :  { %v1804_v63 = vpop.permute.xlu0 %1803 }
 0x1c9   :  { %2319 = vperm.xlu0 %3589, %v5934_v2   ;;  %vm1840_vm15 = vcmp.eq.s32.totalorder %v1804_v63, %v3980_v49 }
 0x1ca   :  { %2424 = vperm.xlu1 %3586, %v4713_v13   ;;  %v4830_v12 = vpop.permute.xlu1 %1737 }
 0x1cb   :  { %5982 = vst [vmem:[#allocation90_spill] sm:$0xff] %v4830_v12 }
 0x1cc   :  { %v1810_v14 = vpop.permute.xlu0 %1809 }
 0x1cd   :  { %2325 = vperm.xlu0 %3589, %v5940_v6   ;;  %vm1842_vm2 = vcmp.eq.s32.totalorder %v1810_v14, %v3980_v49 }
 0x1ce   :  { %3587 = vset.pattern.permute.xlu1 %v5955_v52 }
 0x1cf   :  { %v1792_v9 = vpop.permute.xlu1 %1791  ;;  %1989 = vperm.xlu1 %3587, %v3848_v25  }
 0x1d0   :  { %vm1836_vm10 = vcmp.eq.s32.totalorder %v1792_v9, %v3980_v49  ;;  %v1816_v50 = vpop.permute.xlu0 %1815 }
 0x1d1   :  { %vm3051_vm11 = vmpackc.low %vm1836_vm10, %vm1835_vm9  ;;  %2331 = vperm.xlu0 %3589, %v5941_v1   ;;  %vm1844_vm5 = vcmp.eq.s32.totalorder %v1816_v50, %v3980_v49 }
 0x1d2   :  { %3451 = vmatprep.mubr.msk.bf16.mxu1 %vm3051_vm11, %v5924_v21 }
 0x1d3   :  { %v1795_v13 = vpop.permute.xlu1 %1794  ;;  %1995 = vperm.xlu1 %3587, %v3862_v28  }
 0x1d4   :  { %vm1837_vm13 = vcmp.eq.s32.totalorder %v1795_v13, %v3980_v49  ;;  %v4842_v61 = vpop.permute.xlu0 %1824 }
 0x1d5   :  { %vm3053_vm14 = vmpackc.low %vm1838_vm12, %vm1837_vm13  ;;  %3592 = vset.pattern.permute.xlu0 %v5966_v56 }
 0x1d6   :  { %3452 = vmatmul.mubr.msk.bf16.vlgmr.msra.gmra.mrb[48].mxu1 %vm3053_vm14, %v5924_v21  ;;  %2586 = vperm.xlu0 %3592, %v3845_v24  }
 0x1d7   :  { %3539 = vmatpush3.bf16.msra.mxu1 %v4131_v55  ;;  %v1801_v52 = vpop.permute.xlu1 %1800  ;;  %1998 = vperm.xlu1 %3587, %v3859_v27  }
 0x1d8   :  { %vm1839_vm1 = vcmp.eq.s32.totalorder %v1801_v52, %v3980_v49  ;;  %3532 = vmatprep.subr.bf16.mxu1 %v4153_v11 }
 0x1d9   :  { %vm3055_vm0 = vmpackc.low %vm1840_vm15, %vm1839_vm1 }
 0x1da   :  { %3455 = vmatprep.mubr.msk.bf16.mxu1 %vm3055_vm0, %v5924_v21  ;;  %v2086_v44 = vpop.permute.xlu0 %2085  ;;  %2595 = vperm.xlu0 %3592, %v3873_v30   ;;  %vm1847_vm0 = vcmp.eq.s32.totalorder %v4842_v61, %v3980_v49 }
 0x1db   :  { %3540 = vmatpush3.bf16.msra.mxu1 %v4153_v11  ;;  %v1807_v63 = vpop.permute.xlu1 %1806  ;;  %2004 = vperm.xlu1 %3587, %v3870_v29   ;;  %vm2132_vm8 = vcmp.eq.s32.totalorder %v2086_v44, %v3980_v49 }
 0x1dc   :  { %vm1841_vm3 = vcmp.eq.s32.totalorder %v1807_v63, %v3980_v49  ;;  %3533 = vmatprep.subr.bf16.mxu1 %v4175_v4 }
 0x1dd   :  { %vm3057_vm4 = vmpackc.low %vm1842_vm2, %vm1841_vm3 }
 0x1de   :  { %3456 = vmatmul.mubr.msk.bf16.gmra.mrb[52].mxu1 %vm3057_vm4, %v5924_v21  ;;  %v2092_v9 = vpop.permute.xlu0 %2091  ;;  %2601 = vperm.xlu0 %3592, %v3887_v33  }
 0x1df   :  { %3541 = vmatpush3.bf16.msra.mxu1 %v4175_v4  ;;  %v1813_v14 = vpop.permute.xlu1 %1812  ;;  %2010 = vperm.xlu1 %3587, %v3884_v32   ;;  %vm2134_vm14 = vcmp.eq.s32.totalorder %v2092_v9, %v3980_v49 }
 0x1e0   :  { %vm1843_vm6 = vcmp.eq.s32.totalorder %v1813_v14, %v3980_v49  ;;  %3534 = vmatprep.subr.bf16.mxu1 %v4197_v31 }
 0x1e1   :  { %vm3059_vm7 = vmpackc.low %vm1844_vm5, %vm1843_vm6 }
 0x1e2   :  { %3459 = vmatprep.mubr.msk.bf16.mxu1 %vm3059_vm7, %v5924_v21  ;;  %v4867_v13 = vpop.permute.xlu0 %2100  ;;  %2607 = vperm.xlu0 %3592, %v3898_v35  }
 0x1e3   :  { %3542 = vmatpush3.bf16.msra.mxu1 %v4197_v31  ;;  %v1819_v50 = vpop.permute.xlu1 %1818  ;;  %2016 = vperm.xlu1 %3587, %v5932_v59   ;;  %vm2137_vm4 = vcmp.eq.s32.totalorder %v4867_v13, %v3980_v49 }
 0x1e4   :  { %3535 = vmatprep.subr.bf16.mxu1 %v4215_v42  ;;  %vm1845_vm11 = vcmp.eq.s32.totalorder %v1819_v50, %v3980_v49 }
 0x1e6   :  { %2613 = vperm.xlu0 %3592, %v3912_v38   ;;  %v4876_v52 = vpop.permute.xlu0 %2103 }
 0x1e7   :  { %3543 = vmatpush3.bf16.msra.mxu1 %v4215_v42  ;;  %2022 = vperm.xlu1 %3587, %v5934_v2   ;;  %v5990_v2 = vld [vmem:[#allocation10_spill] sm:$0xff] }
 0x1e8   :  { %3536 = vmatprep.subr.bf16.mxu1 %v4238_v45  ;;  %v2089_v63 = vpop.permute.xlu1 %2088 }
 0x1e9   :  { %vm2133_vm9 = vcmp.eq.s32.totalorder %v2089_v63, %v3980_v49 }
 0x1ea   :  { %vm3083_vm10 = vmpackc.low %vm2133_vm9, %vm2132_vm8  ;;  %2619 = vperm.xlu0 %3592, %v3923_v40   ;;  %v4886_v14 = vpop.permute.xlu0 %2109 }
 0x1eb   :  { %3544 = vmatpush3.bf16.msra.mxu1 %v4238_v45  ;;  %3483 = vmatprep.mubr.msk.bf16.mxu0 %vm3083_vm10, %v5924_v21  ;;  %vm2138_vm10 = vcmp.eq.s32.totalorder %v4876_v52, %v3980_v49 }
 0x1ec   :  { %3537 = vmatprep.subr.bf16.mxu1 %v4258_v16  ;;  %2028 = vperm.xlu1 %3587, %v5940_v6  }
 0x1ed   :  { %v1822_v44 = vpop.permute.xlu1 %1821 }
 0x1ee   :  { %vm1846_vm12 = vcmp.eq.s32.totalorder %v1822_v44, %v3980_v49  ;;  %2625 = vperm.xlu0 %3592, %v3937_v43   ;;  %v4898_v50 = vpop.permute.xlu0 %2118 }
 0x1ef   :  { %vm3061_vm13 = vmpackc.low %vm1846_vm12, %vm1845_vm11  ;;  %3545 = vmatpush3.bf16.msra.mxu1 %v4258_v16 }
 0x1f0   :  { %3538 = vmatprep.subr.bf16.mxu1 %v4275_v34  ;;  %3460 = vmatmul.mubr.msk.bf16.gmra.mrb[56].mxu1 %vm3061_vm13, %v5924_v21  ;;  %vm2140_vm13 = vcmp.eq.s32.totalorder %v4886_v14, %v3980_v49 }
 0x1f1   :  { %2034 = vperm.xlu1 %3587, %v5941_v1  }
 0x1f2   :  { %v2095_v63 = vpop.permute.xlu1 %2094 }
 0x1f3   :  { %vm2135_vm15 = vcmp.eq.s32.totalorder %v2095_v63, %v3980_v49  ;;  %3546 = vmatpush3.bf16.msra.mxu1 %v4275_v34 }
 0x1f4   :  { %vm3085_vm1 = vmpackc.low %vm2135_vm15, %vm2134_vm14  ;;  %v4900_v44 = vpop.f32.mrb[0].mxu1  ;;  %v4902_v10 = vpop.f32.mrb[32].mxu0 }
 0x1f5   :  { %v4904_v12 = vpop.f32.mrb[1].mxu1  ;;  %v4906_v26 = vpop.f32.mrb[33].mxu0  ;;  %3484 = vmatmul.mubr.msk.bf16.vlgmr.msra.gmra.mrb[64].mxu0 %vm3085_vm1, %v5924_v21  ;;  %3590 = vset.pattern.permute.xlu1 %v5950_v60  ;;  %vm567_vm1 = vcmp.eq.s32.totalorder %v5990_v2, 1 }
 0x1f6   :  { %3500 = vmatpush3.bf16.msra.mxu0 %v4131_v55  ;;  %v4913_v9 = vpop.f32.mrb[2].mxu1  ;;  %v4915_v63 = vpop.f32.mrb[34].mxu0  ;;  %2289 = vperm.xlu1 %3590, %v3845_v24  }
 0x1f7   :  { %3501 = vmatprep.subr.bf16.mxu0 %v4153_v11  ;;  %v1828_v7 = vpop.permute.xlu1 %1827  ;;  %v4919_v3 = vpop.f32.mrb[3].mxu1 }
 0x1f8   :  { %vm1848_vm2 = vcmp.eq.s32.totalorder %v1828_v7, %v3980_v49  ;;  %v4922_v36 = vpop.f32.mrb[35].mxu0  ;;  %v4929_v24 = vpop.permute.xlu0 %2121 }
 0x1f9   :  { %vm3063_vm3 = vmpackc.low %vm1848_vm2, %vm1847_vm0 }
 0x1fa   :  { %3502 = vmatpush3.bf16.msra.mxu0 %v4153_v11  ;;  %3463 = vmatprep.mubr.msk.bf16.mxu1 %vm3063_vm3, %v5924_v21 }
 0x1fb   :  { %3503 = vmatprep.subr.bf16.mxu0 %v4175_v4  ;;  %2292 = vperm.xlu1 %3590, %v3862_v28  }
 0x1fc   :  { %v2098_v55 = vpop.permute.xlu1 %2097  ;;  %v4932_v60 = vpop.f32.mrb[4].mxu1 }
 0x1fd   :  { %vm2136_vm5 = vcmp.eq.s32.totalorder %v2098_v55, %v3980_v49  ;;  %v4935_v7 = vpop.f32.mrb[36].mxu0  ;;  %v4937_v61 = vpop.f32.mrb[5].mxu1 }
 0x1fe   :  { %vm3087_vm6 = vmpackc.low %vm2137_vm4, %vm2136_vm5  ;;  %v4939_v11 = vpop.f32.mrb[37].mxu0  ;;  %3504 = vmatpush3.bf16.msra.mxu0 %v4175_v4  ;;  %v4942_v18 = vpop.f32.mrb[6].mxu1 }
 0x1ff   :  { %v4944_v13 = vpop.f32.mrb[38].mxu0  ;;  %3505 = vmatprep.subr.bf16.mxu0 %v4197_v31  ;;  %v4947_v48 = vpop.f32.mrb[7].mxu1  ;;  %3487 = vmatprep.mubr.msk.bf16.mxu0 %vm3087_vm6, %v5924_v21 }
 0x200   :  { %v4950_v55 = vpop.f32.mrb[39].mxu0  ;;  %2298 = vperm.xlu1 %3590, %v3873_v30   ;;  %v4955_v4 = vpop.permute.xlu0 %2130 }
 0x201   :  { %v1831_v15 = vpop.permute.xlu1 %1830 }
 0x202   :  { %3506 = vmatpush3.bf16.msra.mxu0 %v4197_v31  ;;  %vm1849_vm7 = vcmp.eq.s32.totalorder %v1831_v15, %v3980_v49 }
 0x203   :  { %3507 = vmatprep.subr.bf16.mxu0 %v4215_v42 }
 0x204   :  { %v4957_v46 = vpop.f32.mrb[8].mxu1  ;;  %v4959_v5 = vpop.f32.mrb[40].mxu0  ;;  %2304 = vperm.xlu1 %3590, %v3887_v33  }
 0x205   :  { %v1834_v41 = vpop.permute.xlu1 %1833  ;;  %v4962_v62 = vpop.f32.mrb[9].mxu1 }
 0x206   :  { %vm1850_vm8 = vcmp.eq.s32.totalorder %v1834_v41, %v3980_v49  ;;  %v4966_v30 = vpop.f32.mrb[41].mxu0  ;;  %3508 = vmatpush3.bf16.msra.mxu0 %v4215_v42  ;;  %v4969_v31 = vpop.f32.mrb[10].mxu1 }
 0x207   :  { %vm3065_vm9 = vmpackc.low %vm1850_vm8, %vm1849_vm7  ;;  %v4971_v1 = vpop.f32.mrb[42].mxu0  ;;  %3509 = vmatprep.subr.bf16.mxu0 %v4238_v45  ;;  %v4974_v6 = vpop.f32.mrb[11].mxu1 }
 0x208   :  { %v4976_v33 = vpop.f32.mrb[43].mxu0  ;;  %3464 = vmatmul.mubr.msk.bf16.gmra.mrb[60].mxu1 %vm3065_vm9, %v5924_v21  ;;  %2310 = vperm.xlu1 %3590, %v3898_v35   ;;  %v2395_v41 = vpop.permute.xlu0 %2394  ;;  %vm1147_vm9 = vcmp.eq.s32.totalorder %v4325_v23, 1 }
 0x209   :  { %vm2433_vm4 = vcmp.eq.s32.totalorder %v2395_v41, %v3980_v49 }
 0x20a   :  { %3510 = vmatpush3.bf16.msra.mxu0 %v4238_v45  ;;  %v2107_v42 = vpop.permute.xlu1 %2106 }
 0x20b   :  { %vm2139_vm11 = vcmp.eq.s32.totalorder %v2107_v42, %v3980_v49  ;;  %3511 = vmatprep.subr.bf16.mxu0 %v4258_v16 }
 0x20c   :  { %vm3089_vm12 = vmpackc.low %vm2139_vm11, %vm2138_vm10  ;;  %v4985_v15 = vpop.f32.mrb[12].mxu1  ;;  %v4987_v8 = vpop.f32.mrb[44].mxu0  ;;  %2316 = vperm.xlu1 %3590, %v3912_v38   ;;  %vm1145_vm10 = vcmp.eq.s32.totalorder %v4306_v20, 1  ;;  %vm1146_vm11 = vcmp.eq.s32.totalorder %v4345_v17, 1 }
 0x20d   :  { %5983 = vst [vmem:[#allocation91_spill] sm:$0xff] %v4987_v8  ;;  %v4992_v35 = vpop.f32.mrb[13].mxu1  ;;  %v4994_v52 = vpop.f32.mrb[45].mxu0  ;;  %3488 = vmatmul.mubr.msk.bf16.gmra.mrb[68].mxu0 %vm3089_vm12, %v5924_v21  ;;  %v1163_v8 = vsel %vm1147_vm9, %v4902_v10, -inf  ;;  %v1161_v41 = vsel %vm1145_vm10, %v4906_v26, -inf }
 0x20e   :  { %5984 = vst [vmem:[#allocation92_spill] sm:$0xff] %v4992_v35  ;;  %5985 = vst [vmem:[#allocation93_spill] sm:$0xff] %v4994_v52  ;;  %3512 = vmatpush3.bf16.msra.mxu0 %v4258_v16  ;;  %v2113_v45 = vpop.permute.xlu1 %2112  ;;  %v4998_v42 = vpop.f32.mrb[14].mxu1  ;;  %v5991_v16 = vld [vmem:[#allocation12_spill] sm:$0xff]  ;;  %v5997_v52 = vld [vmem:[#allocation38_spill] sm:$0xff] }
 0x20f   :  { %5986 = vst [vmem:[#allocation94_spill] sm:$0xff] %v4998_v42  ;;  %vm2141_vm14 = vcmp.eq.s32.totalorder %v2113_v45, %v3980_v49  ;;  %v5001_v0 = vpop.f32.mrb[46].mxu0  ;;  %3513 = vmatprep.subr.bf16.mxu0 %v4275_v34  ;;  %v5004_v38 = vpop.f32.mrb[15].mxu1  ;;  %vm569_vm0 = vcmp.eq.s32.totalorder %v5991_v16, 1  ;;  %v5992_v42 = vld [vmem:[#allocation11_spill] sm:$0xff]  ;;  %v5993_v45 = vld [vmem:[#allocation9_spill] sm:$0xff] }
 0x210   :  { %5987 = vst [vmem:[#allocation95_spill] sm:$0xff] %v5001_v0  ;;  %5988 = vst [vmem:[#allocation96_spill] sm:$0xff] %v5004_v38  ;;  %v5006_v14 = vpop.f32.mrb[47].mxu0  ;;  %2322 = vperm.xlu1 %3590, %v3923_v40   ;;  %vm570_vm2 = vcmp.eq.s32.totalorder %v5992_v42, 1  ;;  %vm568_vm3 = vcmp.eq.s32.totalorder %v5993_v45, 1  ;;  %v5994_v38 = vld [vmem:[#allocation39_spill] sm:$0xff] }
 0x211   :  { %vm3091_vm15 = vmpackc.low %vm2141_vm14, %vm2140_vm13  ;;  %5989 = vst [vmem:[#allocation97_spill] sm:$0xff] %v5006_v14  ;;  %vm850_vm5 = vcmp.eq.s32.totalorder %v5994_v38, 1  ;;  %v5995_v14 = vld [vmem:[#allocation37_spill] sm:$0xff]  ;;  %v5996_v40 = vld [vmem:[#allocation40_spill] sm:$0xff]  ;;  %vm849_vm8 = vcmp.eq.s32.totalorder %v5997_v52, 1  ;;  %v585_v38 = vsel %vm569_vm0, %v4900_v44, -inf  ;;  %vm2143_vm14 = vcmp.eq.s32.totalorder %v4898_v50, %v3980_v49 }
 0x212   :  { %3491 = vmatprep.mubr.msk.bf16.mxu0 %vm3091_vm15, %v5924_v21  ;;  %3514 = vmatpush3.bf16.msra.mxu0 %v4275_v34  ;;  %vm848_vm6 = vcmp.eq.s32.totalorder %v5995_v14, 1  ;;  %vm851_vm7 = vcmp.eq.s32.totalorder %v5996_v40, 1  ;;  %vm1148_vm13 = vcmp.eq.s32.totalorder %v4357_v19, 1  ;;  %v5998_v52 = vld [vmem:[#allocation14_spill] sm:$0xff]  ;;  %v6004_v40 = vld [vmem:[#allocation45_spill] sm:$0xff] }
 0x213   :  { %v2398_v0 = vpop.permute.xlu1 %2397  ;;  %v1164_v26 = vsel %vm1148_vm13, %v4915_v63, -inf  ;;  %vm571_vm0 = vcmp.eq.s32.totalorder %v5998_v52, 1  ;;  %v6001_v63 = vld [vmem:[#allocation15_spill] sm:$0xff]  ;;  %vm854_vm9 = vcmp.eq.s32.totalorder %v6004_v40, 1  ;;  %v6005_v50 = vld [vmem:[#allocation46_spill] sm:$0xff]  ;;  %vm1152_vm13 = vcmp.eq.s32.totalorder %v4395_v37, 1 }
 0x214   :  { %vm2434_vm12 = vcmp.eq.s32.totalorder %v2398_v0, %v3980_v49  ;;  %v3325_v34 = vpop.f32.mrb[16].mxu1  ;;  %2328 = vperm.xlu1 %3590, %v3937_v43   ;;  %v583_v43 = vsel %vm567_vm1, %v4904_v12, -inf  ;;  %vm855_vm10 = vcmp.eq.s32.totalorder %v6005_v50, 1  ;;  %v6011_v37 = vld [vmem:[#allocation49_spill] sm:$0xff] }
 0x215   :  { %vm3119_vm15 = vmpackc.low %vm2434_vm12, %vm2433_vm4  ;;  %v866_v23 = vsel %vm850_vm5, %v3325_v34, -inf  ;;  %v737_v35 = vpop.f32.mrb[17].mxu1  ;;  %v586_v34 = vsel %vm570_vm2, %v4913_v9, -inf  ;;  %vm574_vm5 = vcmp.eq.s32.totalorder %v6001_v63, 1  ;;  %vm1151_vm12 = vcmp.eq.s32.totalorder %v4363_v47, 1  ;;  %v6010_v63 = vld [vmem:[#allocation51_spill] sm:$0xff] }
 0x216   :  { %v882_v0 = vmax.f32 %v585_v38, %v866_v23  ;;  %v864_v44 = vsel %vm848_vm6, %v737_v35, -inf  ;;  %v3326_v16 = vpop.f32.mrb[18].mxu1  ;;  %3519 = vmatprep.mubr.msk.bf16.mxu1 %vm3119_vm15, %v5924_v21  ;;  %v584_v35 = vsel %vm568_vm3, %v4919_v3, -inf  ;;  %v1162_v3 = vsel %vm1146_vm11, %v4922_v36, -inf  ;;  %v6003_v36 = vld [vmem:[#allocation20_spill] sm:$0xff] }
 0x217   :  { %v880_v10 = vmax.f32 %v583_v43, %v864_v44  ;;  %v867_v2 = vsel %vm851_vm7, %v3326_v16, -inf  ;;  %v740_v12 = vpop.f32.mrb[19].mxu1  ;;  %vm1149_vm7 = vcmp.eq.s32.totalorder %v4348_v39, 1  ;;  %v6006_v43 = vld [vmem:[#allocation44_spill] sm:$0xff]  ;;  %v6007_v44 = vld [vmem:[#allocation18_spill] sm:$0xff] }
 0x218   :  { %v883_v14 = vmax.f32 %v586_v34, %v867_v2  ;;  %v865_v38 = vsel %vm849_vm8, %v740_v12, -inf  ;;  %v2116_v23 = vpop.permute.xlu1 %2115  ;;  %v5053_v20 = vmax.f32 %v882_v0, %v1163_v8  ;;  %3591 = vset.pattern.permute.xlu1 %v5966_v56  ;;  %v5999_v8 = vld [vmem:[#allocation13_spill] sm:$0xff]  ;;  %v6000_v56 = vld [vmem:[#allocation16_spill] sm:$0xff]  ;;  %vm577_vm8 = vcmp.eq.s32.totalorder %v6003_v36, 1  ;;  %v6008_v12 = vld [vmem:[#allocation19_spill] sm:$0xff] }
 0x219   :  { %v881_v9 = vmax.f32 %v584_v35, %v865_v38  ;;  %vm2142_vm1 = vcmp.eq.s32.totalorder %v2116_v23, %v3980_v49  ;;  %v5060_v42 = vmax.f32 %v880_v10, %v1161_v41  ;;  %2583 = vperm.xlu1 %3591, %v3848_v25   ;;  %vm572_vm2 = vcmp.eq.s32.totalorder %v5999_v8, 1  ;;  %v6002_v25 = vld [vmem:[#allocation43_spill] sm:$0xff] }
 0x21a   :  { %vm3093_vm3 = vmpackc.low %vm2143_vm14, %vm2142_vm1  ;;  %v5071_v19 = vmax.f32 %v883_v14, %v1164_v26  ;;  %vm573_vm4 = vcmp.eq.s32.totalorder %v6000_v56, 1  ;;  %vm852_vm6 = vcmp.eq.s32.totalorder %v6002_v25, 1  ;;  %vm853_vm11 = vcmp.eq.s32.totalorder %v6006_v43, 1  ;;  %v6014_v25 = vld [vmem:[#allocation52_spill] sm:$0xff] }
 0x21b   :  { %3492 = vmatmul.mubr.msk.bf16.gmra.mrb[72].mxu0 %vm3093_vm3, %v5924_v21  ;;  %v5077_v17 = vmax.f32 %v881_v9, %v1162_v3  ;;  %v589_v0 = vsel %vm573_vm4, %v4932_v60, -inf  ;;  %vm575_vm14 = vcmp.eq.s32.totalorder %v6007_v44, 1  ;;  %v1167_v10 = vsel %vm1151_vm12, %v4935_v7, -inf  ;;  %v6009_v7 = vld [vmem:[#allocation17_spill] sm:$0xff] }
 0x21c   :  { %v3329_v45 = vpop.f32.mrb[20].mxu1  ;;  %v587_v2 = vsel %vm571_vm0, %v4937_v61, -inf  ;;  %vm578_vm15 = vcmp.eq.s32.totalorder %v6008_v12, 1  ;;  %v1165_v14 = vsel %vm1149_vm7, %v4939_v11, -inf  ;;  %vm576_vm1 = vcmp.eq.s32.totalorder %v6009_v7, 1  ;;  %v6021_v7 = vld [vmem:[#allocation56_spill] sm:$0xff] }
 0x21d   :  { %v870_v16 = vsel %vm854_vm9, %v3329_v45, -inf  ;;  %v2401_v41 = vpop.permute.xlu1 %2400  ;;  %v753_v34 = vpop.f32.mrb[21].mxu1  ;;  %2589 = vperm.xlu1 %3591, %v3862_v28   ;;  %v590_v28 = vsel %vm574_vm5, %v4942_v18, -inf  ;;  %v588_v26 = vsel %vm572_vm2, %v4947_v48, -inf  ;;  %v1168_v18 = vsel %vm1152_vm13, %v4944_v13, -inf }
 0x21e   :  { %v886_v60 = vmax.f32 %v589_v0, %v870_v16  ;;  %v868_v47 = vsel %vm852_vm6, %v753_v34, -inf  ;;  %v3330_v35 = vpop.f32.mrb[22].mxu1  ;;  %vm1150_vm0 = vcmp.eq.s32.totalorder %v4383_v22, 1  ;;  %vm2435_vm2 = vcmp.eq.s32.totalorder %v2401_v41, %v3980_v49  ;;  %v6012_v22 = vld [vmem:[#allocation50_spill] sm:$0xff]  ;;  %v6016_v16 = vld [vmem:[#allocation23_spill] sm:$0xff] }
 0x21f   :  { %v884_v38 = vmax.f32 %v587_v2, %v868_v47  ;;  %v871_v61 = vsel %vm855_vm10, %v3330_v35, -inf  ;;  %v756_v23 = vpop.f32.mrb[23].mxu1  ;;  %v1166_v48 = vsel %vm1150_vm0, %v4950_v55, -inf  ;;  %vm858_vm5 = vcmp.eq.s32.totalorder %v6010_v63, 1  ;;  %v2407_v47 = vpop.permute.xlu0 %2406 }
 0x220   :  { %v887_v9 = vmax.f32 %v590_v28, %v871_v61  ;;  %v869_v39 = vsel %vm853_vm11, %v756_v23, -inf  ;;  %v5110_v11 = vmax.f32 %v886_v60, %v1167_v10  ;;  %vm856_vm6 = vcmp.eq.s32.totalorder %v6011_v37, 1  ;;  %v6017_v10 = vld [vmem:[#allocation21_spill] sm:$0xff] }
 0x221   :  { %v885_v3 = vmax.f32 %v588_v26, %v869_v39  ;;  %v2404_v52 = vpop.permute.xlu1 %2403  ;;  %v5116_v56 = vmax.f32 %v884_v38, %v1165_v14  ;;  %2592 = vperm.xlu1 %3591, %v3859_v27   ;;  %vm857_vm7 = vcmp.eq.s32.totalorder %v6012_v22, 1  ;;  %vm1155_vm9 = vcmp.eq.s32.totalorder %v4401_v53, 1  ;;  %v6013_v27 = vld [vmem:[#allocation24_spill] sm:$0xff]  ;;  %v6015_v53 = vld [vmem:[#allocation22_spill] sm:$0xff]  ;;  %v6018_v14 = vld [vmem:[#allocation55_spill] sm:$0xff] }
 0x222   :  { %vm2436_vm3 = vcmp.eq.s32.totalorder %v2404_v52, %v3980_v49  ;;  %v5122_v8 = vmax.f32 %v887_v9, %v1168_v18  ;;  %vm1153_vm10 = vcmp.eq.s32.totalorder %v4386_v51, 1  ;;  %vm1156_vm11 = vcmp.eq.s32.totalorder %v4428_v57, 1  ;;  %v6024_v26 = vld [vmem:[#allocation68_spill] sm:$0xff]  ;;  %v6025_v39 = vld [vmem:[#allocation91_spill] sm:$0xff]  ;;  %v6027_v37 = vld [vmem:[#allocation93_spill] sm:$0xff] }
 0x223   :  { %vm3121_vm4 = vmpackc.low %vm2436_vm3, %vm2435_vm2  ;;  %v5127_v13 = vmax.f32 %v885_v3, %v1166_v48  ;;  %vm581_vm12 = vcmp.eq.s32.totalorder %v6013_v27, 1  ;;  %vm859_vm13 = vcmp.eq.s32.totalorder %v6014_v25, 1  ;;  %v593_v45 = vsel %vm577_vm8, %v4957_v46, -inf  ;;  %v6026_v3 = vld [vmem:[#allocation92_spill] sm:$0xff]  ;;  %v6028_v27 = vld [vmem:[#allocation94_spill] sm:$0xff] }
 0x224   :  { %v3333_v55 = vpop.f32.mrb[24].mxu1  ;;  %3520 = vmatmul.mubr.msk.bf16.vlgmr.msra.gmra.mrb[64].mxu1 %vm3121_vm4, %v5924_v21  ;;  %v1171_v40 = vsel %vm1155_vm9, %v4959_v5, -inf  ;;  %vm2144_vm0 = vcmp.eq.s32.totalorder %v4929_v24, %v3980_v49  ;;  %vm579_vm2 = vcmp.eq.s32.totalorder %v6015_v53, 1  ;;  %v591_v43 = vsel %vm575_vm14, %v4962_v62, -inf }
 0x225   :  { %v874_v51 = vsel %vm858_vm5, %v3333_v55, -inf  ;;  %v769_v50 = vpop.f32.mrb[25].mxu1  ;;  %2598 = vperm.xlu1 %3591, %v3870_v29   ;;  %v1169_v0 = vsel %vm1153_vm10, %v4966_v30, -inf  ;;  %vm582_vm3 = vcmp.eq.s32.totalorder %v6016_v16, 1  ;;  %v594_v34 = vsel %vm578_vm15, %v4969_v31, -inf }
 0x226   :  { %v890_v46 = vmax.f32 %v593_v45, %v874_v51  ;;  %v872_v5 = vsel %vm856_vm6, %v769_v50, -inf  ;;  %v2125_v36 = vpop.permute.xlu1 %2124  ;;  %v3334_v41 = vpop.f32.mrb[26].mxu1  ;;  %vm580_vm8 = vcmp.eq.s32.totalorder %v6017_v10, 1  ;;  %v592_v44 = vsel %vm576_vm1, %v4974_v6, -inf }
 0x227   :  { %v888_v29 = vmax.f32 %v591_v43, %v872_v5  ;;  %vm2145_vm4 = vcmp.eq.s32.totalorder %v2125_v36, %v3980_v49  ;;  %v875_v62 = vsel %vm859_vm13, %v3334_v41, -inf  ;;  %v772_v30 = vpop.f32.mrb[27].mxu1  ;;  %v1172_v60 = vsel %vm1156_vm11, %v4971_v1, -inf  ;;  %v6019_v1 = vld [vmem:[#allocation57_spill] sm:$0xff]  ;;  %v6031_v41 = vld [vmem:[#allocation6_spill] sm:$0xff] }
 0x228   :  { %vm3095_vm14 = vmpackc.low %vm2145_vm4, %vm2144_vm0  ;;  %v891_v2 = vmax.f32 %v594_v34, %v875_v62  ;;  %v873_v31 = vsel %vm857_vm7, %v772_v30, -inf  ;;  %v5165_v12 = vmax.f32 %v890_v46, %v1171_v40  ;;  %vm1154_vm15 = vcmp.eq.s32.totalorder %v4417_v54, 1  ;;  %v6020_v54 = vld [vmem:[#allocation58_spill] sm:$0xff]  ;;  %v6029_v40 = vld [vmem:[#allocation96_spill] sm:$0xff]  ;;  %v2383_v30 = vpop.permute.xlu0 %2382 }
 0x229   :  { %v889_v35 = vmax.f32 %v592_v44, %v873_v31  ;;  %3495 = vmatprep.mubr.msk.bf16.mxu0 %vm3095_vm14, %v5924_v21  ;;  %v5172_v6 = vmax.f32 %v888_v29, %v1169_v0  ;;  %2604 = vperm.xlu1 %3591, %v3884_v32   ;;  %v1170_v24 = vsel %vm1154_vm15, %v4976_v33, -inf  ;;  %vm2437_vm1 = vcmp.eq.s32.totalorder %v2407_v47, %v3980_v49  ;;  %v6022_v32 = vld [vmem:[#allocation67_spill] sm:$0xff]  ;;  %v6023_v33 = vld [vmem:[#allocation5_spill] sm:$0xff] }
 0x22a   :  { %vm860_vm5 = vcmp.eq.s32.totalorder %v6018_v14, 1  ;;  %v5178_v28 = vmax.f32 %v891_v2, %v1172_v60  ;;  %vm862_vm6 = vcmp.eq.s32.totalorder %v6019_v1, 1  ;;  %vm863_vm7 = vcmp.eq.s32.totalorder %v6020_v54, 1  ;;  %v6030_v46 = vld [vmem:[#allocation95_spill] sm:$0xff]  ;;  %v6032_v34 = vld [vmem:[#allocation97_spill] sm:$0xff]  ;;  %v6036_v1 = vld [vmem:[#allocation26_spill] sm:$0xff] }
 0x22b   :  { %v2410_v57 = vpop.permute.xlu1 %2409  ;;  %vm861_vm9 = vcmp.eq.s32.totalorder %v6021_v7, 1  ;;  %v5183_v38 = vmax.f32 %v889_v35, %v1170_v24  ;;  %vm1159_vm10 = vcmp.eq.s32.totalorder %v4431_v58, 1  ;;  %vm1157_vm11 = vcmp.eq.s32.totalorder %v6022_v32, 1  ;;  %v6033_v2 = vld [vmem:[#allocation29_spill] sm:$0xff]  ;;  %v6034_v35 = vld [vmem:[#allocation27_spill] sm:$0xff] }
 0x22c   :  { %vm1158_vm13 = vcmp.eq.s32.totalorder %v6023_v33, 1  ;;  %vm2438_vm0 = vcmp.eq.s32.totalorder %v2410_v57, %v3980_v49  ;;  %v3337_v61 = vpop.f32.mrb[28].mxu1  ;;  %v597_v23 = vsel %vm581_vm12, %v4985_v15, -inf  ;;  %vm1160_vm4 = vcmp.eq.s32.totalorder %v6024_v26, 1  ;;  %v6035_v24 = vld [vmem:[#allocation7_spill] sm:$0xff]  ;;  %v6037_v33 = vld [vmem:[#allocation25_spill] sm:$0xff] }
 0x22d   :  { %vm2147_vm14 = vcmp.eq.s32.totalorder %v4955_v4, %v3980_v49  ;;  %vm3123_vm15 = vmpackc.low %vm2438_vm0, %vm2437_vm1  ;;  %v878_v58 = vsel %vm862_vm6, %v3337_v61, -inf  ;;  %v785_v9 = vpop.f32.mrb[29].mxu1  ;;  %2610 = vperm.xlu1 %3591, %v5932_v59   ;;  %v1175_v18 = vsel %vm1159_vm10, %v6025_v39, -inf  ;;  %v595_v52 = vsel %vm579_vm2, %v6026_v3, -inf  ;;  %v2422_v39 = vpop.permute.xlu0 %2421  ;;  %v6039_v3 = vld [vmem:[#allocation33_spill] sm:$0xff] }
 0x22e   :  { %v894_v48 = vmax.f32 %v597_v23, %v878_v58  ;;  %v876_v15 = vsel %vm860_vm5, %v785_v9, -inf  ;;  %v3338_v63 = vpop.f32.mrb[30].mxu1  ;;  %3523 = vmatprep.mubr.msk.bf16.mxu1 %vm3123_vm15, %v5924_v21  ;;  %v1173_v22 = vsel %vm1157_vm11, %v6027_v37, -inf  ;;  %v598_v59 = vsel %vm582_vm3, %v6028_v27, -inf  ;;  %v6038_v9 = vld [vmem:[#allocation8_spill] sm:$0xff]  ;;  %v6041_v37 = vld [vmem:[#allocation30_spill] sm:$0xff] }
 0x22f   :  { %v892_v55 = vmax.f32 %v595_v52, %v876_v15  ;;  %v879_v25 = vsel %vm863_vm7, %v3338_v63, -inf  ;;  %v788_v45 = vpop.f32.mrb[31].mxu1  ;;  %v596_v53 = vsel %vm580_vm8, %v6029_v40, -inf  ;;  %v1176_v16 = vsel %vm1160_vm4, %v6030_v46, -inf  ;;  %v6040_v63 = vld [vmem:[#allocation31_spill] sm:$0xff]  ;;  %v6042_v40 = vld [vmem:[#allocation28_spill] sm:$0xff] }
 0x230   :  { %v895_v51 = vmax.f32 %v598_v59, %v879_v25  ;;  %v877_v50 = vsel %vm861_vm9, %v788_v45, -inf  ;;  %v2128_v43 = vpop.permute.xlu1 %2127  ;;  %v5218_v0 = vmax.f32 %v894_v48, %v1175_v18  ;;  %v1174_v10 = vsel %vm1158_vm13, %v6032_v34, -inf }
 0x231   :  { %v893_v5 = vmax.f32 %v596_v53, %v877_v50  ;;  %vm2146_vm12 = vcmp.eq.s32.totalorder %v2128_v43, %v3980_v49  ;;  %v5224_v36 = vmax.f32 %v892_v55, %v1173_v22  ;;  %2616 = vperm.xlu1 %3591, %v6031_v41   ;;  %vm1444_vm3 = vcmp.eq.s32.totalorder %v6033_v2, 1  ;;  %v2392_v50 = vpop.permute.xlu0 %2391 }
 0x232   :  { %vm3097_vm2 = vmpackc.low %vm2147_vm14, %vm2146_vm12  ;;  %v5233_v29 = vmax.f32 %v895_v51, %v1176_v16  ;;  %vm1442_vm8 = vcmp.eq.s32.totalorder %v6034_v35, 1  ;;  %vm1445_vm1 = vcmp.eq.s32.totalorder %v6036_v1, 1  ;;  %vm1443_vm5 = vcmp.eq.s32.totalorder %v6037_v33, 1 }
 0x233   :  { %3496 = vmatmul.mubr.msk.bf16.gmra.mrb[76].mxu0 %vm3097_vm2, %v5924_v21  ;;  %v5236_v62 = vmax.f32 %v893_v5, %v1174_v10  ;;  %vm1448_vm10 = vcmp.eq.s32.totalorder %v6039_v3, 1  ;;  %vm1446_vm11 = vcmp.eq.s32.totalorder %v6040_v63, 1  ;;  %vm1449_vm13 = vcmp.eq.s32.totalorder %v6041_v37, 1  ;;  %v6043_v5 = vld [vmem:[#allocation71_spill] sm:$0xff]  ;;  %v6047_v3 = vld [vmem:[#allocation74_spill] sm:$0xff]  ;;  %v6048_v63 = vld [vmem:[#allocation73_spill] sm:$0xff] }
 0x234   :  { %v3389_v44 = vpop.f32.mrb[32].mxu1  ;;  %vm2429_vm0 = vcmp.eq.s32.totalorder %v2383_v30, %v3980_v49  ;;  %vm1447_vm15 = vcmp.eq.s32.totalorder %v6042_v40, 1  ;;  %vm2442_vm12 = vcmp.eq.s32.totalorder %v2422_v39, %v3980_v49  ;;  %v6044_v30 = vld [vmem:[#allocation69_spill] sm:$0xff]  ;;  %v6049_v40 = vld [vmem:[#allocation72_spill] sm:$0xff] }
 0x235   :  { %v5239_v31 = vsel %vm1444_vm3, %v3389_v44, -inf  ;;  %v2413_v60 = vpop.permute.xlu1 %2412  ;;  %v1331_v47 = vpop.f32.mrb[33].mxu1  ;;  %2622 = vperm.xlu1 %3591, %v6035_v24   ;;  %v6045_v44 = vld [vmem:[#allocation34_spill] sm:$0xff] }
 0x236   :  { %v1476_v4 = vmax.f32 %v5053_v20, %v5239_v31  ;;  %v5245_v14 = vsel %vm1442_vm8, %v1331_v47, -inf  ;;  %v3390_v57 = vpop.f32.mrb[34].mxu1  ;;  %vm2439_vm6 = vcmp.eq.s32.totalorder %v2413_v60, %v3980_v49  ;;  %vm1452_vm8 = vcmp.eq.s32.totalorder %v6043_v5, 1  ;;  %v2428_v35 = vpop.permute.xlu0 %2427 }
 0x237   :  { %v1474_v54 = vmax.f32 %v5060_v42, %v5245_v14  ;;  %v5250_v7 = vsel %vm1445_vm1, %v3390_v57, -inf  ;;  %v1334_v32 = vpop.f32.mrb[35].mxu1  ;;  %vm1450_vm1 = vcmp.eq.s32.totalorder %v6044_v30, 1  ;;  %v6056_v14 = vld [vmem:[#allocation77_spill] sm:$0xff] }
 0x238   :  { %v1477_v61 = vmax.f32 %v5071_v19, %v5250_v7  ;;  %v5255_v23 = vsel %vm1443_vm5, %v1334_v32, -inf  ;;  %vm1453_vm5 = vcmp.eq.s32.totalorder %v6045_v44, 1  ;;  %v6046_v32 = vld [vmem:[#allocation32_spill] sm:$0xff] }
 0x239   :  { %v1475_v26 = vmax.f32 %v5077_v17, %v5255_v23  ;;  %v2416_v58 = vpop.permute.xlu1 %2415  ;;  %2628 = vperm.xlu1 %3591, %v6038_v9  }
 0x23a   :  { %vm2440_vm7 = vcmp.eq.s32.totalorder %v2416_v58, %v3980_v49 }
 0x23b   :  { %vm3125_vm9 = vmpackc.low %vm2440_vm7, %vm2439_vm6  ;;  %vm2432_vm6 = vcmp.eq.s32.totalorder %v2392_v50, %v3980_v49 }
 0x23c   :  { %v3393_v18 = vpop.f32.mrb[36].mxu1  ;;  %3524 = vmatmul.mubr.msk.bf16.gmra.mrb[68].mxu1 %vm3125_vm9, %v5924_v21 }
 0x23d   :  { %v5264_v52 = vsel %vm1448_vm10, %v3393_v18, -inf  ;;  %v2386_v48 = vpop.permute.xlu1 %2385  ;;  %v1347_v15 = vpop.f32.mrb[37].mxu1  ;;  %vm1451_vm10 = vcmp.eq.s32.totalorder %v6046_v32, 1 }
 0x23e   :  { %v1480_v22 = vmax.f32 %v5110_v11, %v5264_v52  ;;  %vm2430_vm4 = vcmp.eq.s32.totalorder %v2386_v48, %v3980_v49  ;;  %v5272_v27 = vsel %vm1446_vm11, %v1347_v15, -inf  ;;  %v3394_v59 = vpop.f32.mrb[38].mxu1  ;;  %vm2444_vm11 = vcmp.eq.s32.totalorder %v2428_v35, %v3980_v49  ;;  %v6052_v35 = vld [vmem:[#allocation75_spill] sm:$0xff] }
 0x23f   :  { %vm3115_vm14 = vmpackc.low %vm2430_vm4, %vm2429_vm0  ;;  %v1478_v55 = vmax.f32 %v5116_v56, %v5272_v27  ;;  %v5276_v25 = vsel %vm1449_vm13, %v3394_v59, -inf  ;;  %v1350_v45 = vpop.f32.mrb[39].mxu1  ;;  %vm1456_vm4 = vcmp.eq.s32.totalorder %v6047_v3, 1  ;;  %v6060_v27 = vld [vmem:[#allocation80_spill] sm:$0xff] }
 0x240   :  { %v1481_v53 = vmax.f32 %v5122_v8, %v5276_v25  ;;  %v5281_v51 = vsel %vm1447_vm15, %v1350_v45, -inf  ;;  %3515 = vmatprep.mubr.msk.bf16.mxu0 %vm3115_vm14, %v5924_v21  ;;  %vm1454_vm14 = vcmp.eq.s32.totalorder %v6048_v63, 1  ;;  %vm1457_vm15 = vcmp.eq.s32.totalorder %v6049_v40, 1 }
 0x241   :  { %v1479_v43 = vmax.f32 %v5127_v13, %v5281_v51  ;;  %v2419_v46 = vpop.permute.xlu1 %2418 }
 0x242   :  { %vm2441_vm2 = vcmp.eq.s32.totalorder %v2419_v46, %v3980_v49 }
 0x243   :  { %vm3127_vm3 = vmpackc.low %vm2442_vm12, %vm2441_vm2 }
 0x244   :  { %v3397_v16 = vpop.f32.mrb[40].mxu1  ;;  %3527 = vmatprep.mubr.msk.bf16.mxu1 %vm3127_vm3, %v5924_v21  ;;  %vm1739_vm3 = vcmp.eq.s32.totalorder %v6052_v35, 1 }
 0x245   :  { %v5290_v41 = vsel %vm1452_vm8, %v3397_v16, -inf  ;;  %v2389_v34 = vpop.permute.xlu1 %2388  ;;  %v1363_v10 = vpop.f32.mrb[41].mxu1 }
 0x246   :  { %v1484_v2 = vmax.f32 %v5165_v12, %v5290_v41  ;;  %vm2431_vm7 = vcmp.eq.s32.totalorder %v2389_v34, %v3980_v49  ;;  %v5298_v60 = vsel %vm1450_vm1, %v1363_v10, -inf  ;;  %v3398_v47 = vpop.f32.mrb[42].mxu1  ;;  %v6051_v10 = vld [vmem:[#allocation76_spill] sm:$0xff] }
 0x247   :  { %vm3117_vm9 = vmpackc.low %vm2432_vm6, %vm2431_vm7  ;;  %v1482_v24 = vmax.f32 %v5172_v6, %v5298_v60  ;;  %v5302_v57 = vsel %vm1453_vm5, %v3398_v47, -inf  ;;  %v1366_v1 = vpop.f32.mrb[43].mxu1  ;;  %vm1741_vm2 = vcmp.eq.s32.totalorder %v6051_v10, 1  ;;  %vm1743_vm6 = vcmp.eq.s32.totalorder %v6056_v14, 1  ;;  %v6058_v10 = vld [vmem:[#allocation83_spill] sm:$0xff] }
 0x248   :  { %v1485_v33 = vmax.f32 %v5178_v28, %v5302_v57  ;;  %v5307_v58 = vsel %vm1451_vm10, %v1366_v1, -inf  ;;  %3516 = vmatmul.mubr.msk.bf16.vlgmr.msra.gmra.mrb[80].mxu0 %vm3117_vm9, %v5924_v21  ;;  %vm1744_vm9 = vcmp.eq.s32.totalorder %v6058_v10, 1 }
 0x249   :  { %v1483_v9 = vmax.f32 %v5183_v38, %v5307_v58  ;;  %v2425_v39 = vpop.permute.xlu1 %2424 }
 0x24a   :  { %vm2443_vm13 = vcmp.eq.s32.totalorder %v2425_v39, %v3980_v49 }
 0x24b   :  { %vm3129_vm0 = vmpackc.low %vm2444_vm11, %vm2443_vm13  ;;  %vm1747_vm11 = vcmp.eq.s32.totalorder %v6060_v27, 1 }
 0x24c   :  { %v3401_v18 = vpop.f32.mrb[44].mxu1  ;;  %3528 = vmatmul.mubr.msk.bf16.gmra.mrb[72].mxu1 %vm3129_vm0, %v5924_v21  ;;  %v6050_v21 = vld [vmem:[#allocation70_spill] sm:$0xff] }
 0x24d   :  { %v5316_v48 = vsel %vm1456_vm4, %v3401_v18, -inf  ;;  %v1379_v15 = vpop.f32.mrb[45].mxu1  ;;  %vm1455_vm12 = vcmp.eq.s32.totalorder %v6050_v21, 1  ;;  %v6053_v18 = vld [vmem:[#allocation81_spill] sm:$0xff] }
 0x24e   :  { %v1488_v37 = vmax.f32 %v5218_v0, %v5316_v48  ;;  %v5321_v59 = vsel %vm1454_vm14, %v1379_v15, -inf  ;;  %v3402_v45 = vpop.f32.mrb[46].mxu1  ;;  %vm1742_vm8 = vcmp.eq.s32.totalorder %v6053_v18, 1  ;;  %v1990_v35 = vpop.permute.xlu1 %1989 }
 0x24f   :  { %v1486_v49 = vmax.f32 %v5224_v36, %v5321_v59  ;;  %v5326_v50 = vsel %vm1457_vm15, %v3402_v45, -inf  ;;  %v1382_v46 = vpop.f32.mrb[47].mxu1  ;;  %v6054_v45 = vld [vmem:[#allocation79_spill] sm:$0xff]  ;;  %v1993_v36 = vpop.permute.xlu0 %1992 }
 0x250   :  { %v1489_v16 = vmax.f32 %v5233_v29, %v5326_v50  ;;  %v5331_v5 = vsel %vm1455_vm12, %v1382_v46, -inf  ;;  %vm1740_vm1 = vcmp.eq.s32.totalorder %v6054_v45, 1  ;;  %v6066_v45 = vld [vmem:[#allocation89_spill] sm:$0xff] }
 0x251   :  { %v1487_v34 = vmax.f32 %v5236_v62, %v5331_v5  ;;  %vm1752_vm12 = vcmp.eq.s32.totalorder %v6066_v45, 1 }
 0x252   :  { %v1996_v60 = vpop.permute.xlu1 %1995 }
 0x267   :  { %v3421_v30 = vpop.f32.mrb[48].mxu0 }
 0x268   :  { %v1757_v44 = vsel %vm1741_vm2, %v3421_v30, -inf  ;;  %v1628_v47 = vpop.f32.mrb[49].mxu0  ;;  %vm2038_vm2 = vcmp.eq.s32.totalorder %v1996_v60, 1 }
 0x269   :  { %v5340_v1 = vmax.f32 %v1476_v4, %v1757_v44  ;;  %v1755_v32 = vsel %vm1739_vm3, %v1628_v47, -inf  ;;  %v3422_v39 = vpop.f32.mrb[50].mxu0  ;;  %v6055_v4 = vld [vmem:[#allocation78_spill] sm:$0xff]  ;;  %vm2036_vm3 = vcmp.eq.s32.totalorder %v1990_v35, 1 }
 0x26a   :  { %v5346_v3 = vmax.f32 %v1474_v54, %v1755_v32  ;;  %v1758_v15 = vsel %vm1742_vm8, %v3422_v39, -inf  ;;  %v1631_v63 = vpop.f32.mrb[51].mxu0  ;;  %vm1745_vm5 = vcmp.eq.s32.totalorder %v6055_v4, 1  ;;  %v6062_v32 = vld [vmem:[#allocation87_spill] sm:$0xff]  ;;  %v6063_v39 = vld [vmem:[#allocation86_spill] sm:$0xff] }
 0x26b   :  { %v5352_v40 = vmax.f32 %v1477_v61, %v1758_v15  ;;  %v1756_v20 = vsel %vm1740_vm1, %v1631_v63, -inf  ;;  %v6057_v61 = vld [vmem:[#allocation85_spill] sm:$0xff]  ;;  %vm1748_vm0 = vcmp.eq.s32.totalorder %v6062_v32, 1  ;;  %vm1753_vm4 = vcmp.eq.s32.totalorder %v6063_v39, 1  ;;  %v6065_v63 = vld [vmem:[#allocation90_spill] sm:$0xff] }
 0x26c   :  { %v5357_v31 = vmax.f32 %v1475_v26, %v1756_v20  ;;  %vm1746_vm7 = vcmp.eq.s32.totalorder %v6057_v61, 1  ;;  %vm1754_vm15 = vcmp.eq.s32.totalorder %v6065_v63, 1  ;;  %vm2037_vm1 = vcmp.eq.s32.totalorder %v1993_v36, 1 }
 0x26f   :  { %v3425_v42 = vpop.f32.mrb[52].mxu0 }
 0x270   :  { %v1761_v54 = vsel %vm1745_vm5, %v3425_v42, -inf  ;;  %v1644_v46 = vpop.f32.mrb[53].mxu0 }
 0x271   :  { %v5364_v21 = vmax.f32 %v1480_v22, %v1761_v54  ;;  %v1759_v19 = vsel %vm1743_vm6, %v1644_v46, -inf  ;;  %v3426_v7 = vpop.f32.mrb[54].mxu0  ;;  %v6059_v22 = vld [vmem:[#allocation82_spill] sm:$0xff] }
 0x272   :  { %v5370_v17 = vmax.f32 %v1478_v55, %v1759_v19  ;;  %v1762_v23 = vsel %vm1746_vm7, %v3426_v7, -inf  ;;  %v1647_v26 = vpop.f32.mrb[55].mxu0  ;;  %vm1749_vm10 = vcmp.eq.s32.totalorder %v6059_v22, 1 }
 0x273   :  { %v5376_v30 = vmax.f32 %v1481_v53, %v1762_v23  ;;  %v1760_v11 = vsel %vm1744_vm9, %v1647_v26, -inf  ;;  %v6061_v53 = vld [vmem:[#allocation88_spill] sm:$0xff] }
 0x274   :  { %v5381_v52 = vmax.f32 %v1479_v43, %v1760_v11  ;;  %vm1750_vm13 = vcmp.eq.s32.totalorder %v6061_v53, 1 }
 0x278   :  { %v3429_v56 = vpop.f32.mrb[56].mxu0 }
 0x279   :  { %v1765_v55 = vsel %vm1749_vm10, %v3429_v56, -inf  ;;  %v1660_v44 = vpop.f32.mrb[57].mxu0 }
 0x27a   :  { %v5388_v47 = vmax.f32 %v1484_v2, %v1765_v55  ;;  %v1763_v8 = vsel %vm1747_vm11, %v1660_v44, -inf  ;;  %v3430_v25 = vpop.f32.mrb[58].mxu0 }
 0x27b   :  { %v5394_v13 = vmax.f32 %v1482_v24, %v1763_v8  ;;  %v1766_v51 = vsel %vm1750_vm13, %v3430_v25, -inf  ;;  %v1663_v43 = vpop.f32.mrb[59].mxu0  ;;  %v6064_v24 = vld [vmem:[#allocation84_spill] sm:$0xff] }
 0x27c   :  { %v5400_v12 = vmax.f32 %v1485_v33, %v1766_v51  ;;  %v1764_v41 = vsel %vm1748_vm0, %v1663_v43, -inf  ;;  %vm1751_vm14 = vcmp.eq.s32.totalorder %v6064_v24, 1 }
 0x27d   :  { %v5405_v2 = vmax.f32 %v1483_v9, %v1764_v41 }
 0x280   :  { %v3433_v6 = vpop.f32.mrb[60].mxu0 }
 0x281   :  { %v1769_v18 = vsel %vm1753_vm4, %v3433_v6, -inf  ;;  %v1676_v15 = vpop.f32.mrb[61].mxu0 }
 0x282   :  { %v5412_v28 = vmax.f32 %v1488_v37, %v1769_v18  ;;  %v1767_v57 = vsel %vm1751_vm14, %v1676_v15, -inf  ;;  %v3434_v33 = vpop.f32.mrb[62].mxu0  ;;  %v1999_v37 = vpop.permute.xlu1 %1998 }
 0x283   :  { %v5418_v38 = vmax.f32 %v1486_v49, %v1767_v57  ;;  %v1770_v58 = vsel %vm1754_vm15, %v3434_v33, -inf  ;;  %v1679_v9 = vpop.f32.mrb[63].mxu0  ;;  %v2002_v49 = vpop.permute.xlu0 %2001  ;;  %vm2039_vm8 = vcmp.eq.s32.totalorder %v1999_v37, 1 }
 0x284   :  { %v5424_v20 = vmax.f32 %v1489_v16, %v1770_v58  ;;  %v1768_v0 = vsel %vm1752_vm12, %v1679_v9, -inf  ;;  %vm2040_vm6 = vcmp.eq.s32.totalorder %v2002_v49, 1 }
 0x285   :  { %v5429_v48 = vmax.f32 %v1487_v34, %v1768_v0 }
 0x286   :  { %v2005_v4 = vpop.permute.xlu1 %2004 }
 0x287   :  { %v2008_v14 = vpop.permute.xlu0 %2007  ;;  %vm2041_vm9 = vcmp.eq.s32.totalorder %v2005_v4, 1 }
 0x288   :  { %vm2042_vm5 = vcmp.eq.s32.totalorder %v2008_v14, 1 }
 0x28a   :  { %v2011_v59 = vpop.permute.xlu1 %2010 }
 0x28b   :  { %v2014_v46 = vpop.permute.xlu0 %2013  ;;  %vm2043_vm7 = vcmp.eq.s32.totalorder %v2011_v59, 1 }
 0x28c   :  { %vm2044_vm11 = vcmp.eq.s32.totalorder %v2014_v46, 1 }
 0x28e   :  { %v5431_v42 = vpop.permute.xlu1 %2016 }
 0x28f   :  { %v2020_v29 = vpop.permute.xlu0 %2019  ;;  %vm2045_vm0 = vcmp.eq.s32.totalorder %v5431_v42, 1 }
 0x290   :  { %vm2046_vm10 = vcmp.eq.s32.totalorder %v2020_v29, 1 }
 0x292   :  { %v2023_v54 = vpop.permute.xlu1 %2022 }
 0x293   :  { %v5440_v56 = vpop.permute.xlu0 %2025  ;;  %vm2047_vm13 = vcmp.eq.s32.totalorder %v2023_v54, 1 }
 0x296   :  { %v5433_v19 = vpop.permute.xlu1 %2028 }
 0x297   :  { %v2032_v53 = vpop.permute.xlu0 %2031 }
 0x29a   :  { %v5435_v5 = vpop.permute.xlu1 %2034 }
 0x29b   :  { %v2287_v6 = vpop.permute.xlu0 %2286 }
 0x29c   :  { %vm2333_vm14 = vcmp.eq.s32.totalorder %v2287_v6, 1 }
 0x29e   :  { %v2290_v55 = vpop.permute.xlu1 %2289 }
 0x29f   :  { %v2296_v24 = vpop.permute.xlu0 %2295  ;;  %vm2334_vm12 = vcmp.eq.s32.totalorder %v2290_v55, 1 }
 0x2a0   :  { %vm2336_vm15 = vcmp.eq.s32.totalorder %v2296_v24, 1 }
 0x2a2   :  { %v2293_v43 = vpop.permute.xlu1 %2292 }
 0x2a3   :  { %v5465_v63 = vpop.permute.xlu0 %2301  ;;  %vm2335_vm4 = vcmp.eq.s32.totalorder %v2293_v43, 1 }
 0x2a6   :  { %v5459_v60 = vpop.permute.xlu1 %2298 }
 0x2a9   :  { %v3453_v50 = vpop.f32.mrb[48].mxu1 }
 0x2aa   :  { %v2054_v62 = vsel %vm2038_vm2, %v3453_v50, -inf  ;;  %v1925_v16 = vpop.f32.mrb[49].mxu1  ;;  %v5461_v18 = vpop.permute.xlu1 %2304  ;;  %vm2050_vm2 = vcmp.eq.s32.totalorder %v2032_v53, 1 }
 0x2ab   :  { %v2070_v34 = vmax.f32 %v5340_v1, %v2054_v62  ;;  %v2052_v7 = vsel %vm2036_vm3, %v1925_v16, -inf  ;;  %v3454_v61 = vpop.f32.mrb[50].mxu1  ;;  %v2308_v16 = vpop.permute.xlu0 %2307  ;;  %vm2048_vm3 = vcmp.eq.s32.totalorder %v5440_v56, 1 }
 0x2ac   :  { %v2068_v23 = vmax.f32 %v5346_v3, %v2052_v7  ;;  %v2055_v26 = vsel %vm2039_vm8, %v3454_v61, -inf  ;;  %v1928_v10 = vpop.f32.mrb[51].mxu1  ;;  %vm2051_vm8 = vcmp.eq.s32.totalorder %v5435_v5, 1 }
 0x2ad   :  { %v2071_v11 = vmax.f32 %v5352_v40, %v2055_v26  ;;  %v2053_v22 = vsel %vm2037_vm1, %v1928_v10, -inf  ;;  %vm2049_vm1 = vcmp.eq.s32.totalorder %v5433_v19, 1 }
 0x2ae   :  { %v2069_v27 = vmax.f32 %v5357_v31, %v2053_v22  ;;  %v5476_v36 = vpop.permute.xlu1 %2310 }
 0x2b1   :  { %v3457_v44 = vpop.f32.mrb[52].mxu1 }
 0x2b2   :  { %v5443_v1 = vsel %vm2042_vm5, %v3457_v44, -inf  ;;  %v1941_v8 = vpop.f32.mrb[53].mxu1  ;;  %v2317_v44 = vpop.permute.xlu1 %2316  ;;  %vm2339_vm5 = vcmp.eq.s32.totalorder %v5461_v18, 1 }
 0x2b3   :  { %v2074_v3 = vmax.f32 %v5364_v21, %v5443_v1  ;;  %v5447_v25 = vsel %vm2040_vm6, %v1941_v8, -inf  ;;  %v3458_v40 = vpop.f32.mrb[54].mxu1  ;;  %vm2337_vm6 = vcmp.eq.s32.totalorder %v5459_v60, 1 }
 0x2b4   :  { %v2072_v35 = vmax.f32 %v5370_v17, %v5447_v25  ;;  %v5451_v31 = vsel %vm2043_vm7, %v3458_v40, -inf  ;;  %v1944_v51 = vpop.f32.mrb[55].mxu1  ;;  %v2314_v40 = vpop.permute.xlu0 %2313  ;;  %vm2340_vm7 = vcmp.eq.s32.totalorder %v2308_v16, 1 }
 0x2b5   :  { %v2075_v32 = vmax.f32 %v5376_v30, %v5451_v31  ;;  %v5455_v41 = vsel %vm2041_vm9, %v1944_v51, -inf  ;;  %vm2338_vm9 = vcmp.eq.s32.totalorder %v5465_v63, 1 }
 0x2b6   :  { %v2073_v39 = vmax.f32 %v5381_v52, %v5455_v41  ;;  %v5492_v51 = vpop.permute.xlu1 %2322 }
 0x2b8   :  { %v2320_v55 = vpop.permute.xlu0 %2319 }
 0x2ba   :  { %v5494_v43 = vpop.permute.xlu1 %2328 }
 0x2bc   :  { %v5499_v24 = vpop.permute.xlu0 %2325 }
 0x2c3   :  { %v3461_v15 = vpop.f32.mrb[56].mxu1 }
 0x2c4   :  { %v5463_v57 = vsel %vm2046_vm10, %v3461_v15, -inf  ;;  %v1957_v33 = vpop.f32.mrb[57].mxu1  ;;  %vm2343_vm10 = vcmp.eq.s32.totalorder %v2317_v44, 1 }
 0x2c5   :  { %v2078_v58 = vmax.f32 %v5388_v47, %v5463_v57  ;;  %v5469_v9 = vsel %vm2044_vm11, %v1957_v33, -inf  ;;  %v3462_v45 = vpop.f32.mrb[58].mxu1  ;;  %vm2341_vm11 = vcmp.eq.s32.totalorder %v5476_v36, 1 }
 0x2c6   :  { %v2076_v0 = vmax.f32 %v5394_v13, %v5469_v9  ;;  %v5474_v37 = vsel %vm2047_vm13, %v3462_v45, -inf  ;;  %v1960_v4 = vpop.f32.mrb[59].mxu1  ;;  %v5512_v45 = vpop.permute.xlu1 %2583  ;;  %vm2344_vm13 = vcmp.eq.s32.totalorder %v2320_v55, 1 }
 0x2c7   :  { %v2079_v59 = vmax.f32 %v5400_v12, %v5474_v37  ;;  %v5480_v49 = vsel %vm2045_vm0, %v1960_v4, -inf  ;;  %vm2342_vm0 = vcmp.eq.s32.totalorder %v2314_v40, 1 }
 0x2c8   :  { %v2077_v14 = vmax.f32 %v5405_v2, %v5480_v49  ;;  %v3485_v54 = vpop.f32.mrb[64].mxu0 }
 0x2c9   :  { %v2351_v42 = vsel %vm2335_vm4, %v3485_v54, -inf  ;;  %v2222_v46 = vpop.f32.mrb[65].mxu0 }
 0x2ca   :  { %v5484_v29 = vmax.f32 %v2070_v34, %v2351_v42  ;;  %v2349_v50 = vsel %vm2333_vm14, %v2222_v46, -inf  ;;  %v3486_v62 = vpop.f32.mrb[66].mxu0 }
 0x2cb   :  { %v5486_v7 = vmax.f32 %v2068_v23, %v2349_v50  ;;  %v2352_v61 = vsel %vm2336_vm15, %v3486_v62, -inf  ;;  %v2225_v26 = vpop.f32.mrb[67].mxu0  ;;  %v5525_v62 = vpop.permute.xlu0 %2331 }
 0x2cc   :  { %v5488_v10 = vmax.f32 %v2071_v11, %v2352_v61  ;;  %v2350_v22 = vsel %vm2334_vm12, %v2225_v26, -inf }
 0x2cd   :  { %v5490_v8 = vmax.f32 %v2069_v27, %v2350_v22 }
 0x2cf   :  { %v5538_v1 = vpop.permute.xlu0 %2586 }
 0x2db   :  { %v3465_v34 = vpop.f32.mrb[60].mxu1 }
 0x2dc   :  { %v5497_v23 = vsel %vm2050_vm2, %v3465_v34, -inf  ;;  %v1973_v6 = vpop.f32.mrb[61].mxu1  ;;  %v5533_v34 = vpop.permute.xlu1 %2589  ;;  %vm2347_vm2 = vcmp.eq.s32.totalorder %v5494_v43, 1 }
 0x2dd   :  { %v2082_v11 = vmax.f32 %v5412_v28, %v5497_v23  ;;  %v5504_v27 = vsel %vm2048_vm3, %v1973_v6, -inf  ;;  %v3466_v15 = vpop.f32.mrb[62].mxu1  ;;  %v2596_v6 = vpop.permute.xlu0 %2595  ;;  %vm2345_vm3 = vcmp.eq.s32.totalorder %v5492_v51, 1  ;;  %v6071_v23 = vld [vmem:[#allocation59_spill] sm:$0xff] }
 0x2de   :  { %v2080_v56 = vmax.f32 %v5418_v38, %v5504_v27  ;;  %v5510_v53 = vsel %vm2051_vm8, %v3466_v15, -inf  ;;  %v1976_v33 = vpop.f32.mrb[63].mxu1  ;;  %vm2634_vm14 = vcmp.eq.s32.totalorder %v2596_v6, 1  ;;  %vm2348_vm8 = vcmp.eq.s32.totalorder %v5525_v62, 1 }
 0x2df   :  { %v2083_v5 = vmax.f32 %v5424_v20, %v5510_v53  ;;  %v5517_v4 = vsel %vm2049_vm1, %v1976_v33, -inf  ;;  %vm2346_vm1 = vcmp.eq.s32.totalorder %v5499_v24, 1 }
 0x2e0   :  { %v2081_v19 = vmax.f32 %v5429_v48, %v5517_v4  ;;  %v3489_v18 = vpop.f32.mrb[68].mxu0 }
 0x2e1   :  { %v2355_v54 = vsel %vm2339_vm5, %v3489_v18, -inf  ;;  %v2238_v42 = vpop.f32.mrb[69].mxu0  ;;  %v2602_v15 = vpop.permute.xlu0 %2601 }
 0x2e2   :  { %v2371_v46 = vmax.f32 %v2074_v3, %v2355_v54  ;;  %v2353_v50 = vsel %vm2337_vm6, %v2238_v42, -inf  ;;  %v3490_v60 = vpop.f32.mrb[70].mxu0  ;;  %v5540_v3 = vpop.permute.xlu1 %2592  ;;  %vm2636_vm4 = vcmp.eq.s32.totalorder %v2602_v15, 1  ;;  %v6069_v42 = vld [vmem:[#allocation54_spill] sm:$0xff] }
 0x2e3   :  { %v2369_v16 = vmax.f32 %v2072_v35, %v2353_v50  ;;  %v2356_v61 = vsel %vm2340_vm7, %v3490_v60, -inf  ;;  %v2241_v26 = vpop.f32.mrb[71].mxu0 }
 0x2e4   :  { %v2372_v63 = vmax.f32 %v2075_v32, %v2356_v61  ;;  %v2354_v22 = vsel %vm2338_vm9, %v2241_v26, -inf }
 0x2e5   :  { %v2370_v21 = vmax.f32 %v2073_v39, %v2354_v22  ;;  %v6070_v22 = vld [vmem:[#allocation48_spill] sm:$0xff]  ;;  %v2608_v15 = vpop.permute.xlu0 %2607 }
 0x2e6   :  { %v2599_v30 = vpop.permute.xlu1 %2598  ;;  %vm2638_vm5 = vcmp.eq.s32.totalorder %v2608_v15, 1 }
 0x2e7   :  { %vm2635_vm12 = vcmp.eq.s32.totalorder %v2599_v30, 1 }
 0x2e9   :  { %v2614_v38 = vpop.permute.xlu0 %2613 }
 0x2ea   :  { %v2605_v57 = vpop.permute.xlu1 %2604  ;;  %vm2640_vm9 = vcmp.eq.s32.totalorder %v2614_v38, 1 }
 0x2eb   :  { %vm2637_vm15 = vcmp.eq.s32.totalorder %v2605_v57, 1 }
 0x2ee   :  { %v3493_v17 = vpop.f32.mrb[72].mxu0 }
 0x2ef   :  { %v2359_v25 = vsel %vm2343_vm10, %v3493_v17, -inf  ;;  %v2254_v35 = vpop.f32.mrb[73].mxu0 }
 0x2f0   :  { %v5546_v31 = vmax.f32 %v2078_v58, %v2359_v25  ;;  %v2357_v52 = vsel %vm2341_vm11, %v2254_v35, -inf  ;;  %v3494_v32 = vpop.f32.mrb[74].mxu0  ;;  %v5566_v58 = vld [vmem:[%s5817_s3] ss:$0 sm:$0xff]  ;;  %s3688_s3 = smov [#allocation2]  }
 0x2f1   :  { %v5551_v41 = vmax.f32 %v2076_v0, %v2357_v52  ;;  %v2360_v39 = vsel %vm2344_vm13, %v3494_v32, -inf  ;;  %v2257_v44 = vpop.f32.mrb[75].mxu0  ;;  %v6067_v0 = vld [vmem:[#allocation53_spill] sm:$0xff]  ;;  %v251_v50 = vadd.f32 %v5566_v58, %v6069_v42  ;;  %s2843_s21 = sshll.u32 %s3688_s3, 4  ;;  %s2844_s21 = int_to_ptr.vmem [resolvable:$true] %s2843_s21 }
 0x2f2   :  { %v5556_v36 = vmax.f32 %v2079_v59, %v2360_v39  ;;  %v2358_v55 = vsel %vm2342_vm0, %v2257_v44, -inf  ;;  %v250_v37 = vadd.f32 %v5566_v58, %v6067_v0  ;;  %s3655_s22 = scalar_lea.vmem %s2844_s21, 2048  ;;  %p3660_p1 = scmp.lt.s32.totalorder %s2844_s21, %s2844_s21 }
 0x2f3   :  { %v5561_v47 = vmax.f32 %v2077_v14, %v2358_v55  ;;  %v6068_v14 = vld [vmem:[#allocation47_spill] sm:$0xff]  ;;  %p3656_p0 = scmp.ne.s32.totalorder %s2844_s21, %s3655_s22  ;;  %p3661_p2 = scmp.lt.s32.totalorder %s3655_s22, %s3655_s22 }
 0x2f4   :  { %v248_v40 = vadd.f32 %v5566_v58, %v6068_v14  ;;  %v6072_v14 = vld [vmem:[#allocation61_spill] sm:$0xff] }
 0x2f5   :  { %v254_v24 = vadd.f32 %v5566_v58, %v6072_v14  ;;  %v6076_v14 = vld [vmem:[#allocation36_spill] sm:$0xff]  ;;  %p3662_p3 = por %p3661_p2, %p3660_p1 }
 0x2f7   :  { %v3521_v13 = vpop.f32.mrb[64].mxu1  ;;  %p3663_p4 = pnand %p3662_p3, %p3656_p0 }
 0x2f8   :  { %v2652_v12 = vsel %vm2636_vm4, %v3521_v13, -inf  ;;  %v2535_v9 = vpop.f32.mrb[65].mxu1 }
 0x2f9   :  { %v5570_v59 = vmax.f32 %v2371_v46, %v2652_v12  ;;  %v2650_v2 = vsel %vm2634_vm14, %v2535_v9, -inf  ;;  %v3522_v49 = vpop.f32.mrb[66].mxu1  ;;  %v249_v46 = vadd.f32 %v5566_v58, %v6070_v22 }
 0x2fa   :  { %v5574_v33 = vmax.f32 %v2369_v16, %v2650_v2  ;;  %v2653_v18 = vsel %vm2637_vm15, %v3522_v49, -inf  ;;  %v2538_v54 = vpop.f32.mrb[67].mxu1 }
 0x2fb   :  { %v2700_v60 = vadd.f32 %v5570_v59, %v250_v37  ;;  %v5579_v61 = vmax.f32 %v2372_v63, %v2653_v18  ;;  %v2651_v26 = vsel %vm2635_vm12, %v2538_v54, -inf  ;;  %vm2684_vm6 = vcmp.eq.f32.partialorder %v5570_v59, -inf }
 0x2fc   :  { %v2698_v6 = vadd.f32 %v5574_v33, %v248_v40  ;;  %v5584_v17 = vmax.f32 %v2370_v21, %v2651_v26  ;;  %v5591_v21 = vpop.permute.xlu1 %2610  ;;  %vm2682_vm11 = vcmp.eq.f32.partialorder %v5574_v33, -inf }
 0x2fd   :  { %v2732_v25 = vmin.f32 %v2700_v60, 0.0  ;;  %v2701_v16 = vadd.f32 %v5579_v61, %v251_v50  ;;  %vm2716_vm10 = vcmp.gt.f32.partialorder %v2700_v60, 0.0  ;;  %vm2685_vm13 = vcmp.eq.f32.partialorder %v5579_v61, -inf }
 0x2fe   :  { %v2730_v35 = vmin.f32 %v2698_v6, 0.0  ;;  %v5588_v30 = vadd.f32 %v5584_v17, %v249_v46  ;;  %vm2714_vm0 = vcmp.gt.f32.partialorder %v2698_v6, 0.0  ;;  %vm2683_vm4 = vcmp.eq.f32.partialorder %v5584_v17, -inf }
 0x2ff   :  { %v2754_v52 = vmul.f32 1.442695, %v2732_v25  ;;  %v2733_v32 = vmin.f32 %v2701_v16, 0.0  ;;  %vm2717_vm14 = vcmp.gt.f32.partialorder %v2701_v16, 0.0  ;;  %vm2639_vm12 = vcmp.eq.s32.totalorder %v5591_v21, 1 }
 0x300   :  { %v2750_v39 = vmul.f32 1.442695, %v2730_v35  ;;  %v2731_v63 = vmin.f32 %v5588_v30, 0.0  ;;  %v2617_v40 = vpop.permute.xlu1 %2616  ;;  %vm2715_vm15 = vcmp.gt.f32.partialorder %v5588_v30, 0.0 }
 0x301   :  { %3607 = vpow2.f32 %v2754_v52  ;;  %v2756_v44 = vmul.f32 1.442695, %v2733_v32  ;;  %vm2641_vm7 = vcmp.eq.s32.totalorder %v2617_v40, 1  ;;  %v6077_v40 = vld [vmem:[#allocation41_spill] sm:$0xff] }
 0x302   :  { %3609 = vpow2.f32 %v2750_v39  ;;  %v2752_v55 = vmul.f32 1.442695, %v2731_v63  ;;  %v6073_v39 = vld [vmem:[#allocation62_spill] sm:$0xff]  ;;  %v246_v38 = vadd.f32 %v5566_v58, %v6077_v40 }
 0x303   :  { %3611 = vpow2.f32 %v2756_v44 }
 0x304   :  { %3613 = vpow2.f32 %v2752_v55  ;;  %v6074_v55 = vld [vmem:[#allocation60_spill] sm:$0xff] }
 0x305   :  { %v253_v17 = vadd.f32 %v5566_v58, %v6074_v55 }
 0x306   :  { %v3497_v57 = vpop.f32.mrb[76].mxu0 }
 0x307   :  { %v2363_v13 = vsel %vm2347_vm2, %v3497_v57, -inf  ;;  %v2270_v12 = vpop.f32.mrb[77].mxu0  ;;  %vm2632_vm2 = vcmp.eq.s32.totalorder %v5533_v34, 1 }
 0x308   :  { %v5599_v9 = vmax.f32 %v2082_v11, %v2363_v13  ;;  %v2361_v0 = vsel %vm2345_vm3, %v2270_v12, -inf  ;;  %v3498_v37 = vpop.f32.mrb[78].mxu0  ;;  %v252_v11 = vadd.f32 %v5566_v58, %v6071_v23  ;;  %v5661_v13 = vpop.permute.xlu0 %2619  ;;  %vm2630_vm3 = vcmp.eq.s32.totalorder %v5512_v45, 1 }
 0x309   :  { %v5605_v43 = vmax.f32 %v2080_v56, %v2361_v0  ;;  %v2364_v2 = vsel %vm2348_vm8, %v3498_v37, -inf  ;;  %v2273_v51 = vpop.f32.mrb[79].mxu0  ;;  %v5667_v0 = vpop.permute.xlu1 %2622  ;;  %vm2633_vm8 = vcmp.eq.s32.totalorder %v5540_v3, 1 }
 0x30a   :  { %v5610_v62 = vmax.f32 %v2083_v5, %v2364_v2  ;;  %v2362_v49 = vsel %vm2346_vm1, %v2273_v51, -inf  ;;  %vm2631_vm1 = vcmp.eq.s32.totalorder %v5538_v1, 1 }
 0x30b   :  { %v3608_v28 = vpop.eup %3607  ;;  %v5619_v27 = vmax.f32 %v2081_v19, %v2362_v49 }
 0x30c   :  { %v3610_v56 = vpop.eup %3609  ;;  %v3137_v20 = vadd.f32 -1.0, %v3608_v28  ;;  %v6075_v28 = vld [vmem:[#allocation35_spill] sm:$0xff] }
 0x30d   :  { %v3612_v53 = vpop.eup %3611  ;;  %v3135_v5 = vadd.f32 -1.0, %v3610_v56  ;;  %v244_v23 = vadd.f32 %v5566_v58, %v6075_v28 }
 0x30e   :  { %v3614_v18 = vpop.eup %3613  ;;  %v2796_v54 = vsel %vm2716_vm10, %v2700_v60, %v3137_v20  ;;  %v3138_v42 = vadd.f32 -1.0, %v3612_v53  ;;  %v6078_v20 = vld [vmem:[#allocation42_spill] sm:$0xff] }
 0x30f   :  { %v2812_v48 = vsel %vm2684_vm6, -inf, %v2796_v54  ;;  %v2794_v4 = vsel %vm2714_vm0, %v2698_v6, %v3135_v5  ;;  %v3136_v19 = vadd.f32 -1.0, %v3614_v18  ;;  %v3525_v59 = vpop.f32.mrb[68].mxu1  ;;  %v247_v53 = vadd.f32 %v5566_v58, %v6078_v20  ;;  %v2626_v5 = vpop.permute.xlu0 %2625 }
 0x310   :  { %2828 = vst [vmem:[#allocation2 + $0x30] sm:$0xff] %v2812_v48  ;;  %v2810_v50 = vsel %vm2682_vm11, -inf, %v2794_v4  ;;  %v2797_v26 = vsel %vm2717_vm14, %v2701_v16, %v3138_v42  ;;  %v2656_v33 = vsel %vm2640_vm9, %v3525_v59, -inf  ;;  %v2551_v22 = vpop.f32.mrb[69].mxu1  ;;  %v6079_v42 = vld [vmem:[#allocation63_spill] sm:$0xff]  ;;  %v5686_v4 = vpop.permute.xlu1 %2628 }
 0x311   :  { %2826 = vst [vmem:[#allocation2 + $0x20] sm:$0xff] %v2810_v50  ;;  %v2813_v60 = vsel %vm2685_vm13, -inf, %v2797_v26  ;;  %v2795_v46 = vsel %vm2715_vm15, %v5588_v30, %v3136_v19  ;;  %v5631_v25 = vmax.f32 %v5546_v31, %v2656_v33  ;;  %v2654_v6 = vsel %vm2638_vm5, %v2551_v22, -inf  ;;  %v3526_v35 = vpop.f32.mrb[70].mxu1  ;;  %v6080_v50 = vld [vmem:[#allocation65_spill] sm:$0xff] }
 0x312   :  { %2829 = vst [vmem:[#allocation2 + $0x38] sm:$0xff] %v2813_v60  ;;  %v2811_v16 = vsel %vm2683_vm4, -inf, %v2795_v46  ;;  %v5638_v52 = vmax.f32 %v5551_v41, %v2654_v6  ;;  %v2657_v61 = vsel %vm2641_vm7, %v3526_v35, -inf  ;;  %v2554_v32 = vpop.f32.mrb[71].mxu1  ;;  %v255_v30 = vadd.f32 %v5566_v58, %v6073_v39 }
 0x313   :  { %2827 = vst [vmem:[#allocation2 + $0x28] sm:$0xff] %v2811_v16  ;;  %v5644_v31 = vadd.f32 %v5631_v25, %v254_v24  ;;  %v5647_v63 = vmax.f32 %v5556_v36, %v2657_v61  ;;  %v2655_v44 = vsel %vm2639_vm12, %v2554_v32, -inf  ;;  %v245_v24 = vadd.f32 %v5566_v58, %v6076_v14 }
 0x314   :  { %v5652_v41 = vadd.f32 %v5638_v52, %v252_v11  ;;  %v5655_v21 = vmax.f32 %v5561_v47, %v2655_v44  ;;  %v5683_v48 = vadd.f32 %v5566_v58, %v6079_v42  ;;  %v258_v45 = vadd.f32 %v5566_v58, %v6080_v50  ;;  %v6082_v42 = vld [vmem:[#allocation64_spill] sm:$0xff] }
 0x315   :  { %v2736_v15 = vmin.f32 %v5644_v31, 0.0  ;;  %v5659_v57 = vadd.f32 %v5647_v63, %v255_v30  ;;  %vm2644_vm5 = vcmp.eq.s32.totalorder %v2626_v5, 1  ;;  %vm2645_vm6 = vcmp.eq.s32.totalorder %v5686_v4, 1  ;;  %v6081_v5 = vld [vmem:[#allocation66_spill] sm:$0xff] }
 0x316   :  { %v2734_v36 = vmin.f32 %v5652_v41, 0.0  ;;  %v5665_v12 = vadd.f32 %v5655_v21, %v253_v17  ;;  %vm2642_vm7 = vcmp.eq.s32.totalorder %v5661_v13, 1  ;;  %vm2688_vm9 = vcmp.eq.f32.partialorder %v5631_v25, -inf }
 0x317   :  { %v2762_v37 = vmul.f32 1.442695, %v2736_v15  ;;  %v2737_v2 = vmin.f32 %v5659_v57, 0.0  ;;  %vm2720_vm10 = vcmp.gt.f32.partialorder %v5644_v31, 0.0  ;;  %vm2686_vm11 = vcmp.eq.f32.partialorder %v5638_v52, -inf }
 0x318   :  { %v2758_v51 = vmul.f32 1.442695, %v2734_v36  ;;  %v2735_v47 = vmin.f32 %v5665_v12, 0.0  ;;  %vm2718_vm13 = vcmp.gt.f32.partialorder %v5652_v41, 0.0  ;;  %vm2689_vm0 = vcmp.eq.f32.partialorder %v5647_v63, -inf }
 0x319   :  { %3615 = vpow2.f32 %v2762_v37  ;;  %v2764_v49 = vmul.f32 1.442695, %v2737_v2  ;;  %vm2687_vm4 = vcmp.eq.f32.partialorder %v5655_v21, -inf  ;;  %vm2721_vm14 = vcmp.gt.f32.partialorder %v5659_v57, 0.0 }
 0x31a   :  { %3617 = vpow2.f32 %v2758_v51  ;;  %v2760_v11 = vmul.f32 1.442695, %v2735_v47  ;;  %vm2719_vm15 = vcmp.gt.f32.partialorder %v5665_v12, 0.0  ;;  %vm2643_vm12 = vcmp.eq.s32.totalorder %v5667_v0, 1 }
 0x31b   :  { %3619 = vpow2.f32 %v2764_v49  ;;  %v3517_v56 = vpop.f32.mrb[80].mxu0  ;;  %v257_v4 = vadd.f32 %v5566_v58, %v6082_v42 }
 0x31c   :  { %3621 = vpow2.f32 %v2760_v11  ;;  %v2648_v18 = vsel %vm2632_vm2, %v3517_v56, -inf  ;;  %v2519_v54 = vpop.f32.mrb[81].mxu0 }
 0x31d   :  { %v5689_v34 = vmax.f32 %v5484_v29, %v2648_v18  ;;  %v2646_v19 = vsel %vm2630_vm3, %v2519_v54, -inf  ;;  %v3518_v59 = vpop.f32.mrb[82].mxu0 }
 0x31e   :  { %v5695_v26 = vmax.f32 %v5486_v7, %v2646_v19  ;;  %v2649_v33 = vsel %vm2633_vm8, %v3518_v59, -inf  ;;  %v2522_v22 = vpop.f32.mrb[83].mxu0 }
 0x31f   :  { %v5698_v3 = vadd.f32 %v5689_v34, %v246_v38  ;;  %v5701_v60 = vmax.f32 %v5488_v10, %v2649_v33  ;;  %v2647_v29 = vsel %vm2631_vm1, %v2522_v22, -inf  ;;  %v3529_v46 = vpop.f32.mrb[72].mxu1  ;;  %vm2680_vm2 = vcmp.eq.f32.partialorder %v5689_v34, -inf }
 0x320   :  { %v5707_v7 = vadd.f32 %v5695_v26, %v244_v23  ;;  %v5710_v1 = vmax.f32 %v5490_v8, %v2647_v29  ;;  %v2660_v6 = vsel %vm2644_vm5, %v3529_v46, -inf  ;;  %v2567_v35 = vpop.f32.mrb[73].mxu1  ;;  %vm2678_vm3 = vcmp.eq.f32.partialorder %v5695_v26, -inf }
 0x321   :  { %v2728_v10 = vmin.f32 %v5698_v3, 0.0  ;;  %v5716_v16 = vadd.f32 %v5701_v60, %v247_v53  ;;  %v3530_v61 = vpop.f32.mrb[74].mxu1  ;;  %v5727_v17 = vmax.f32 %v5599_v9, %v2660_v6  ;;  %v2658_v52 = vsel %vm2642_vm7, %v2567_v35, -inf }
 0x322   :  { %v2726_v32 = vmin.f32 %v5707_v7, 0.0  ;;  %v5722_v8 = vadd.f32 %v5710_v1, %v245_v24  ;;  %v2570_v39 = vpop.f32.mrb[75].mxu1  ;;  %v2661_v20 = vsel %vm2645_vm6, %v3530_v61, -inf  ;;  %v5762_v63 = vmax.f32 %v5605_v43, %v2658_v52 }
 0x323   :  { %v3616_v30 = vpop.eup %3615  ;;  %v2746_v44 = vmul.f32 1.442695, %v2728_v10  ;;  %v2729_v55 = vmin.f32 %v5716_v16, 0.0  ;;  %v5746_v56 = vadd.f32 %v5727_v17, %v258_v45  ;;  %v5767_v13 = vmax.f32 %v5610_v62, %v2661_v20 }
 0x324   :  { %v3618_v15 = vpop.eup %3617  ;;  %v3141_v36 = vadd.f32 -1.0, %v3616_v30  ;;  %v2742_v37 = vmul.f32 1.442695, %v2726_v32  ;;  %v2727_v2 = vmin.f32 %v5722_v8, 0.0  ;;  %v2659_v18 = vsel %vm2643_vm12, %v2570_v39, -inf }
 0x325   :  { %v3620_v51 = vpop.eup %3619  ;;  %v3139_v47 = vadd.f32 -1.0, %v3618_v15  ;;  %3623 = vpow2.f32 %v2746_v44  ;;  %v2748_v49 = vmul.f32 1.442695, %v2729_v55  ;;  %v2740_v53 = vmin.f32 %v5746_v56, 0.0 }
 0x326   :  { %v3622_v28 = vpop.eup %3621  ;;  %v2800_v23 = vsel %vm2720_vm10, %v5644_v31, %v3141_v36  ;;  %v3142_v9 = vadd.f32 -1.0, %v3620_v51  ;;  %3625 = vpow2.f32 %v2742_v37  ;;  %v2744_v11 = vmul.f32 1.442695, %v2727_v2 }
 0x327   :  { %v2816_v14 = vsel %vm2688_vm9, -inf, %v2800_v23  ;;  %v2798_v24 = vsel %vm2718_vm13, %v5652_v41, %v3139_v47  ;;  %v3140_v40 = vadd.f32 -1.0, %v3622_v28  ;;  %3627 = vpow2.f32 %v2748_v49 }
 0x328   :  { %2832 = vst [vmem:[#allocation2 + $0x50] sm:$0xff] %v2816_v14  ;;  %v2814_v38 = vsel %vm2686_vm11, -inf, %v2798_v24  ;;  %v2801_v31 = vsel %vm2721_vm14, %v5659_v57, %v3142_v9  ;;  %3629 = vpow2.f32 %v2744_v11  ;;  %v2770_v54 = vmul.f32 1.442695, %v2740_v53 }
 0x329   :  { %2830 = vst [vmem:[#allocation2 + $0x40] sm:$0xff] %v2814_v38  ;;  %v2817_v25 = vsel %vm2689_vm0, -inf, %v2801_v31  ;;  %v2799_v41 = vsel %vm2719_vm15, %v5665_v12, %v3140_v40  ;;  %v259_v12 = vadd.f32 %v5566_v58, %v6081_v5  ;;  %v2706_v0 = vadd.f32 %v5762_v63, %v5683_v48 }
 0x32a   :  { %2833 = vst [vmem:[#allocation2 + $0x58] sm:$0xff] %v2817_v25  ;;  %v2815_v57 = vsel %vm2687_vm4, -inf, %v2799_v41  ;;  %v5772_v21 = vmax.f32 %v5619_v27, %v2659_v18  ;;  %3631 = vpow2.f32 %v2770_v54  ;;  %vm2712_vm8 = vcmp.gt.f32.partialorder %v5698_v3, 0.0 }
 0x32b   :  { %2831 = vst [vmem:[#allocation2 + $0x48] sm:$0xff] %v2815_v57  ;;  %v2709_v43 = vadd.f32 %v5767_v13, %v259_v12  ;;  %v2738_v19 = vmin.f32 %v2706_v0, 0.0  ;;  %vm2681_vm1 = vcmp.eq.f32.partialorder %v5701_v60, -inf  ;;  %vm2710_vm5 = vcmp.gt.f32.partialorder %v5707_v7, 0.0 }
 0x32c   :  { %v2707_v50 = vadd.f32 %v5772_v21, %v257_v4  ;;  %vm2713_vm6 = vcmp.gt.f32.partialorder %v5716_v16, 0.0  ;;  %vm2711_vm7 = vcmp.gt.f32.partialorder %v5722_v8, 0.0  ;;  %vm2679_vm9 = vcmp.eq.f32.partialorder %v5710_v1, -inf }
 0x32d   :  { %v2741_v62 = vmin.f32 %v2709_v43, 0.0  ;;  %v2766_v48 = vmul.f32 1.442695, %v2738_v19  ;;  %vm2724_vm10 = vcmp.gt.f32.partialorder %v5746_v56, 0.0  ;;  %vm2692_vm11 = vcmp.eq.f32.partialorder %v5727_v17, -inf }
 0x32e   :  { %v2739_v29 = vmin.f32 %v2707_v50, 0.0  ;;  %vm2722_vm13 = vcmp.gt.f32.partialorder %v2706_v0, 0.0  ;;  %vm2690_vm0 = vcmp.eq.f32.partialorder %v5762_v63, -inf  ;;  %vm2725_vm4 = vcmp.gt.f32.partialorder %v2709_v43, 0.0 }
 0x32f   :  { %v3624_v59 = vpop.eup %3623  ;;  %v2772_v22 = vmul.f32 1.442695, %v2741_v62  ;;  %3633 = vpow2.f32 %v2766_v48  ;;  %vm2693_vm14 = vcmp.eq.f32.partialorder %v5767_v13, -inf  ;;  %vm2723_vm15 = vcmp.gt.f32.partialorder %v2707_v50, 0.0 }
 0x330   :  { %v3626_v45 = vpop.eup %3625  ;;  %v3133_v27 = vadd.f32 -1.0, %v3624_v59  ;;  %vm2691_vm12 = vcmp.eq.f32.partialorder %v5772_v21, -inf }
 0x331   :  { %v3628_v58 = vpop.eup %3627  ;;  %v3131_v33 = vadd.f32 -1.0, %v3626_v45  ;;  %3635 = vpow2.f32 %v2772_v22 }
 0x332   :  { %v3630_v46 = vpop.eup %3629  ;;  %v2792_v6 = vsel %vm2712_vm8, %v5698_v3, %v3133_v27  ;;  %v3134_v35 = vadd.f32 -1.0, %v3628_v58  ;;  %v2768_v3 = vmul.f32 1.442695, %v2739_v29 }
 0x333   :  { %v2808_v10 = vsel %vm2680_vm2, -inf, %v2792_v6  ;;  %v2790_v61 = vsel %vm2710_vm5, %v5707_v7, %v3131_v33  ;;  %v3132_v32 = vadd.f32 -1.0, %v3630_v46 }
 0x334   :  { %2824 = vst [vmem:[#allocation2 + $0x10] sm:$0xff] %v2808_v10  ;;  %v2806_v39 = vsel %vm2678_vm3, -inf, %v2790_v61  ;;  %v2793_v30 = vsel %vm2713_vm6, %v5716_v16, %v3134_v35  ;;  %3637 = vpow2.f32 %v2768_v3  ;;  %v3632_v55 = vpop.eup %3631 }
 0x335   :  { %2822 = vst [vmem:[#allocation2] sm:$0xff] %v2806_v39  ;;  %v2809_v44 = vsel %vm2681_vm1, -inf, %v2793_v30  ;;  %v2791_v34 = vsel %vm2711_vm7, %v5722_v8, %v3132_v32  ;;  %v3145_v26 = vadd.f32 -1.0, %v3632_v55 }
 0x336   :  { %2825 = vst [vmem:[#allocation2 + $0x18] sm:$0xff] %v2809_v44  ;;  %v2807_v7 = vsel %vm2679_vm9, -inf, %v2791_v34 }
 0x337   :  { %2823 = vst [vmem:[#allocation2 + $0x8] sm:$0xff] %v2807_v7  ;;  %v2804_v16 = vsel %vm2724_vm10, %v5746_v56, %v3145_v26 }
 0x338   :  { %v2820_v36 = vsel %vm2692_vm11, -inf, %v2804_v16 }
 0x339   :  { %v3634_v15 = vpop.eup %3633  ;;  %2836 = vst [vmem:[#allocation2 + $0x70] sm:$0xff] %v2820_v36 }
 0x33a   :  { %v3143_v37 = vadd.f32 -1.0, %v3634_v15 }
 0x33b   :  { %v3636_v60 = vpop.eup %3635 }
 0x33c   :  { %v3146_v1 = vadd.f32 -1.0, %v3636_v60  ;;  %v2802_v8 = vsel %vm2722_vm13, %v2706_v0, %v3143_v37 }
 0x33d   :  { %v2818_v51 = vsel %vm2690_vm0, -inf, %v2802_v8 }
 0x33e   :  { %v3638_v2 = vpop.eup %3637  ;;  %v2805_v17 = vsel %vm2725_vm4, %v2709_v43, %v3146_v1  ;;  %2834 = vst [vmem:[#allocation2 + $0x60] sm:$0xff] %v2818_v51 }
 0x33f   :  { %v2821_v47 = vsel %vm2693_vm14, -inf, %v2805_v17  ;;  %v3144_v49 = vadd.f32 -1.0, %v3638_v2 }
 0x340   :  { %2837 = vst [vmem:[#allocation2 + $0x78] sm:$0xff] %v2821_v47 }
 0x341   :  { %v2803_v28 = vsel %vm2723_vm15, %v2707_v50, %v3144_v49 }
 0x342   :  { %v2819_v23 = vsel %vm2691_vm12, -inf, %v2803_v28 }
 0x343   :  { %2835 = vst [vmem:[#allocation2 + $0x68] sm:$0xff] %v2819_v23 }
 0x344   :  { %3666 = shalt.err (!%p3663_p4)
}
 0x345   :  { %s3667_s25 = scalar_lea.hbm %s5818_s4, 2048 }
 0x346   :  { %p3668_p5 = scmp.ne.s32.totalorder %s5818_s4, %s3667_s25  ;;  %p3671_p6 = scmp.lt.u32.totalorder %s3667_s25, %s5818_s4 }
 0x348   :  { %p3673_p7 = pnand %p3671_p6, %p3668_p5 }
 0x34a   :  { %3676 = shalt.err (!%p3673_p7)
}
 0x34b   :  { %s3689_s30 = smov 128   ;;  %s3690_s5 = smov 8  }
 0x34c   :  { %2849 = dma.vmem_to_hbm [thread:$0]  %s2844_s21, 2048, %s5818_s4, [#allocation3], %s3689_s30, %s3689_s30, %s3690_s5  }
 0x34d   :  { %3677 = dma.done.wait [#allocation3], 2048  }
 0x34e   :  { %3678 = vsyncadd [#allocation3], 4294965248 }
 0x34f   :  { %2853 = vsyncpa [#allocation3], 1 }

</bundles_post_ra>
